<compile_context>
chip_gen: v5e
topology: v5e:2x2
jax: 0.10.0
libtpu: 0.0.40
codegen_flags: <defaults>
</compile_context>

<pallas_src>
import jax
import jax.numpy as jnp
from jax.experimental import pallas as pl
from jax.experimental.pallas import tpu as pltpu


def mlp_kernel(x_ref, w1_ref, b1_ref, w2_ref, b2_ref, w3_ref, b3_ref,
               w4_ref, b4_ref, o_ref):
    # Layer 1: Linear(n_features, 256) + ReLU  (bf16 MXU matmul, f32 accumulate)
    h = jnp.dot(x_ref[...], w1_ref[...], preferred_element_type=jnp.float32)
    h = jnp.maximum(h + b1_ref[...], 0.0)
    # Layer 2: Linear(256, 128) + ReLU
    h = jnp.dot(h.astype(jnp.bfloat16), w2_ref[...],
                preferred_element_type=jnp.float32)
    h = jnp.maximum(h + b2_ref[...], 0.0)
    # Layer 3: Linear(128, 64) + ReLU
    h = jnp.dot(h.astype(jnp.bfloat16), w3_ref[...],
                preferred_element_type=jnp.float32)
    h = jnp.maximum(h + b3_ref[...], 0.0)                       # (TB, 64) f32
    # Layer 4: Linear(64, 1) as a lane reduction (avoid an N=1 MXU matmul).
    # w4_ref is the weight row (1, 64); reduce over lanes on the VPU/XLU.
    logits = jnp.sum(h * w4_ref[...], axis=-1, keepdims=True) + b4_ref[...]
    # Numerically stable sigmoid on the EUP: exp(-|x|) + approx reciprocal.
    z = jnp.exp(-jnp.abs(logits))
    inv = pl.reciprocal(1.0 + z, approx=True)
    o_ref[...] = jnp.where(logits >= 0, inv, z * inv)


def mlp_forward(x, params, *, tb=256):
    """x: (B, n_features) f32; params: list of (W, b) with W:(in,out), b:(1,out)."""
    B, F = x.shape
    (w1, b1), (w2, b2), (w3, b3), (w4, b4) = params

    # bf16 matmul datapath, f32 accumulation / epilogue.
    x_bf = x.astype(jnp.bfloat16)
    w1_bf = w1.astype(jnp.bfloat16)
    w2_bf = w2.astype(jnp.bfloat16)
    w3_bf = w3.astype(jnp.bfloat16)
    w4_row = w4.reshape(1, -1).astype(jnp.float32)   # (1, 64) lane-broadcast row
    b4_sc = b4.reshape(1, 1).astype(jnp.float32)     # (1, 1)

    # Pad batch to a multiple of the batch tile (tile must be a multiple of 8).
    if B >= tb:
        b_pad = pl.cdiv(B, tb) * tb
    else:
        tb = pl.cdiv(B, 8) * 8
        b_pad = tb
    if b_pad != B:
        x_bf = jnp.pad(x_bf, ((0, b_pad - B), (0, 0)))

    const2 = lambda i: (0, 0)
    out = pl.pallas_call(
        mlp_kernel,
        out_shape=jax.ShapeDtypeStruct((b_pad, 1), jnp.float32),
        grid=(b_pad // tb,),
        in_specs=[
            pl.BlockSpec((tb, F), lambda i: (i, 0)),        # x tile (pipelined)
            pl.BlockSpec(w1_bf.shape, const2),              # weights: resident
            pl.BlockSpec(b1.shape, const2),
            pl.BlockSpec(w2_bf.shape, const2),
            pl.BlockSpec(b2.shape, const2),
            pl.BlockSpec(w3_bf.shape, const2),
            pl.BlockSpec(b3.shape, const2),
            pl.BlockSpec(w4_row.shape, const2),
            pl.BlockSpec(b4_sc.shape, const2),
        ],
        out_specs=pl.BlockSpec((tb, 1), lambda i: (i, 0)),
        compiler_params=pltpu.CompilerParams(
            dimension_semantics=("parallel",)),
    )(x_bf, w1_bf, b1, w2_bf, b2, w3_bf, b3, w4_row, b4_sc)
    return out[:B]


def init_linear(key, fan_in, fan_out):
    """Deterministic init mimicking PyTorch nn.Linear's U(-1/sqrt(fan_in), +)."""
    kw, kb = jax.random.split(key)
    bound = 1.0 / (fan_in ** 0.5)
    w = jax.random.uniform(kw, (fan_in, fan_out), jnp.float32, -bound, bound)
    b = jax.random.uniform(kb, (1, fan_out), jnp.float32, -bound, bound)
    return w, b


def reference_forward(x, params):
    h = x
    for i, (w, b) in enumerate(params):
        h = h @ w + b
        if i < len(params) - 1:
            h = jnp.maximum(h, 0.0)
    return jax.nn.sigmoid(h)


if __name__ == "__main__":
    # Small but MXU-friendly shapes consistent with the module:
    # MLP_NN(n_features=512), batch=512 -> grid of two TB=256 tiles.
    n_features = 512
    batch = 512

    key = jax.random.PRNGKey(0)
    kx, k1, k2, k3, k4 = jax.random.split(key, 5)

    x = jax.random.normal(kx, (batch, n_features), jnp.float32)

    params = [
        init_linear(k1, n_features, 256),
        init_linear(k2, 256, 128),
        init_linear(k3, 128, 64),
        init_linear(k4, 64, 1),
    ]

    out = jax.block_until_ready(mlp_forward(x, params))
    ref = jax.block_until_ready(reference_forward(x, params))

    assert out.shape == (batch, 1), out.shape
    err = float(jnp.max(jnp.abs(out - ref)))
    # bf16 matmul datapath vs f32 reference -> loosened tolerance.
    assert err < 2e-2, f"mismatch vs JAX reference, max abs err = {err}"
    print("KERNEL_OK")
</pallas_src>

<mosaic_0001>
module attributes {stable_mosaic.version = 11 : i64} {
  func.func @mlp_kernel(%arg0: i32, %arg1: memref<256x512xbf16, #tpu.memory_space<vmem>>, %arg2: memref<512x256xbf16, #tpu.memory_space<vmem>>, %arg3: memref<1x256xf32, #tpu.memory_space<vmem>>, %arg4: memref<256x128xbf16, #tpu.memory_space<vmem>>, %arg5: memref<1x128xf32, #tpu.memory_space<vmem>>, %arg6: memref<128x64xbf16, #tpu.memory_space<vmem>>, %arg7: memref<1x64xf32, #tpu.memory_space<vmem>>, %arg8: memref<1x64xf32, #tpu.memory_space<vmem>>, %arg9: memref<1x1xf32, #tpu.memory_space<vmem>>, %arg10: memref<256x1xf32, #tpu.memory_space<vmem>>) attributes {dimension_semantics = [#tpu.dimension_semantics<parallel>], iteration_bounds = array<i64: 2>, scalar_prefetch = 0 : i64, scratch_operands = 0 : i64, tpu.core_type = #tpu.core_type<tc>, window_params = [{transform_indices = @transform_0, window_bounds = array<i64: 256, 512>}, {pipeline_mode = #tpu.pipeline_mode<synchronous>, transform_indices = @transform_1, window_bounds = array<i64: 512, 256>}, {pipeline_mode = #tpu.pipeline_mode<synchronous>, transform_indices = @transform_2, window_bounds = array<i64: 1, 256>}, {pipeline_mode = #tpu.pipeline_mode<synchronous>, transform_indices = @transform_3, window_bounds = array<i64: 256, 128>}, {pipeline_mode = #tpu.pipeline_mode<synchronous>, transform_indices = @transform_4, window_bounds = array<i64: 1, 128>}, {pipeline_mode = #tpu.pipeline_mode<synchronous>, transform_indices = @transform_5, window_bounds = array<i64: 128, 64>}, {pipeline_mode = #tpu.pipeline_mode<synchronous>, transform_indices = @transform_6, window_bounds = array<i64: 1, 64>}, {pipeline_mode = #tpu.pipeline_mode<synchronous>, transform_indices = @transform_7, window_bounds = array<i64: 1, 64>}, {pipeline_mode = #tpu.pipeline_mode<synchronous>, transform_indices = @transform_8, window_bounds = array<i64: 1, 1>}, {transform_indices = @transform_9, window_bounds = array<i64: 256, 1>}]} {
    %c0 = arith.constant 0 : index
    %c0_0 = arith.constant 0 : index
    %0 = vector.load %arg1[%c0, %c0_0] : memref<256x512xbf16, #tpu.memory_space<vmem>>, vector<256x512xbf16>
    %c0_1 = arith.constant 0 : index
    %c0_2 = arith.constant 0 : index
    %1 = vector.load %arg2[%c0_1, %c0_2] : memref<512x256xbf16, #tpu.memory_space<vmem>>, vector<512x256xbf16>
    %cst = arith.constant dense<0.000000e+00> : vector<256x256xf32>
    %2 = tpu.matmul %0, %1, %cst {dimension_numbers = #tpu.dot_dimension_numbers<[1], [0], [0], [1], [0, 0, 1, 1], [], []>} : vector<256x512xbf16>, vector<512x256xbf16>, vector<256x256xf32> -> vector<256x256xf32>
    %c0_3 = arith.constant 0 : index
    %c0_4 = arith.constant 0 : index
    %3 = vector.load %arg3[%c0_3, %c0_4] : memref<1x256xf32, #tpu.memory_space<vmem>>, vector<1x256xf32>
    %4 = vector.broadcast %3 : vector<1x256xf32> to vector<256x256xf32>
    %5 = arith.addf %2, %4 : vector<256x256xf32>
    %cst_5 = arith.constant 0.000000e+00 : f32
    %6 = vector.broadcast %cst_5 : f32 to vector<256x256xf32>
    %7 = arith.maximumf %5, %6 : vector<256x256xf32>
    %8 = arith.truncf %7 : vector<256x256xf32> to vector<256x256xbf16>
    %c0_6 = arith.constant 0 : index
    %c0_7 = arith.constant 0 : index
    %9 = vector.load %arg4[%c0_6, %c0_7] : memref<256x128xbf16, #tpu.memory_space<vmem>>, vector<256x128xbf16>
    %cst_8 = arith.constant dense<0.000000e+00> : vector<256x128xf32>
    %10 = tpu.matmul %8, %9, %cst_8 {dimension_numbers = #tpu.dot_dimension_numbers<[1], [0], [0], [1], [0, 0, 1, 1], [], []>} : vector<256x256xbf16>, vector<256x128xbf16>, vector<256x128xf32> -> vector<256x128xf32>
    %c0_9 = arith.constant 0 : index
    %c0_10 = arith.constant 0 : index
    %11 = vector.load %arg5[%c0_9, %c0_10] : memref<1x128xf32, #tpu.memory_space<vmem>>, vector<1x128xf32>
    %12 = vector.broadcast %11 : vector<1x128xf32> to vector<256x128xf32>
    %13 = arith.addf %10, %12 : vector<256x128xf32>
    %cst_11 = arith.constant 0.000000e+00 : f32
    %14 = vector.broadcast %cst_11 : f32 to vector<256x128xf32>
    %15 = arith.maximumf %13, %14 : vector<256x128xf32>
    %16 = arith.truncf %15 : vector<256x128xf32> to vector<256x128xbf16>
    %c0_12 = arith.constant 0 : index
    %c0_13 = arith.constant 0 : index
    %17 = vector.load %arg6[%c0_12, %c0_13] : memref<128x64xbf16, #tpu.memory_space<vmem>>, vector<128x64xbf16>
    %cst_14 = arith.constant dense<0.000000e+00> : vector<256x64xf32>
    %18 = tpu.matmul %16, %17, %cst_14 {dimension_numbers = #tpu.dot_dimension_numbers<[1], [0], [0], [1], [0, 0, 1, 1], [], []>} : vector<256x128xbf16>, vector<128x64xbf16>, vector<256x64xf32> -> vector<256x64xf32>
    %c0_15 = arith.constant 0 : index
    %c0_16 = arith.constant 0 : index
    %19 = vector.load %arg7[%c0_15, %c0_16] : memref<1x64xf32, #tpu.memory_space<vmem>>, vector<1x64xf32>
    %20 = vector.broadcast %19 : vector<1x64xf32> to vector<256x64xf32>
    %21 = arith.addf %18, %20 : vector<256x64xf32>
    %cst_17 = arith.constant 0.000000e+00 : f32
    %22 = vector.broadcast %cst_17 : f32 to vector<256x64xf32>
    %23 = arith.maximumf %21, %22 : vector<256x64xf32>
    %c0_18 = arith.constant 0 : index
    %c0_19 = arith.constant 0 : index
    %24 = vector.load %arg8[%c0_18, %c0_19] : memref<1x64xf32, #tpu.memory_space<vmem>>, vector<1x64xf32>
    %25 = vector.broadcast %24 : vector<1x64xf32> to vector<256x64xf32>
    %26 = arith.mulf %23, %25 : vector<256x64xf32>
    %cst_20 = arith.constant dense<0.000000e+00> : vector<256xf32>
    %27 = vector.multi_reduction <add>, %26, %cst_20 [1] : vector<256x64xf32> to vector<256xf32>
    %28 = vector.shape_cast %27 : vector<256xf32> to vector<256x1xf32>
    %c0_21 = arith.constant 0 : index
    %c0_22 = arith.constant 0 : index
    %29 = vector.load %arg9[%c0_21, %c0_22] : memref<1x1xf32, #tpu.memory_space<vmem>>, vector<1x1xf32>
    %30 = vector.broadcast %29 : vector<1x1xf32> to vector<256x1xf32>
    %31 = arith.addf %28, %30 : vector<256x1xf32>
    %32 = math.absf %31 : vector<256x1xf32>
    %cst_23 = arith.constant 0.000000e+00 : f32
    %33 = vector.broadcast %cst_23 : f32 to vector<256x1xf32>
    %34 = arith.subf %33, %32 : vector<256x1xf32>
    %35 = math.exp %34 : vector<256x1xf32>
    %cst_24 = arith.constant 1.000000e+00 : f32
    %36 = vector.broadcast %cst_24 : f32 to vector<256x1xf32>
    %37 = arith.addf %36, %35 : vector<256x1xf32>
    %38 = tpu.reciprocal %37 {approx = true} : vector<256x1xf32> -> vector<256x1xf32>
    %cst_25 = arith.constant 0.000000e+00 : f32
    %39 = vector.broadcast %cst_25 : f32 to vector<256x1xf32>
    %40 = arith.cmpf oge, %31, %39 : vector<256x1xf32>
    %41 = arith.mulf %35, %38 : vector<256x1xf32>
    %42 = arith.select %40, %38, %41 : vector<256x1xi1>, vector<256x1xf32>
    %c0_26 = arith.constant 0 : index
    %c0_27 = arith.constant 0 : index
    %43 = vector.load %arg10[%c0_26, %c0_27] : memref<256x1xf32, #tpu.memory_space<vmem>>, vector<256x1xf32>
    tpu.vector_store %arg10[%c0_26, %c0_27], %42 {strides = array<i32>} : memref<256x1xf32, #tpu.memory_space<vmem>>, vector<256x1xf32>,
    return
  }
  func.func @transform_0(%arg0: i32) -> (i32, i32) {
    %c0_i32 = arith.constant 0 : i32
    %c0_i32_0 = arith.constant 0 : i32
    return %arg0, %c0_i32 : i32, i32
  }
  func.func @transform_1(%arg0: i32) -> (i32, i32) {
    %c0_i32 = arith.constant 0 : i32
    %c0_i32_0 = arith.constant 0 : i32
    %c0_i32_1 = arith.constant 0 : i32
    return %c0_i32, %c0_i32_0 : i32, i32
  }
  func.func @transform_2(%arg0: i32) -> (i32, i32) {
    %c0_i32 = arith.constant 0 : i32
    %c0_i32_0 = arith.constant 0 : i32
    %c0_i32_1 = arith.constant 0 : i32
    return %c0_i32, %c0_i32_0 : i32, i32
  }
  func.func @transform_3(%arg0: i32) -> (i32, i32) {
    %c0_i32 = arith.constant 0 : i32
    %c0_i32_0 = arith.constant 0 : i32
    %c0_i32_1 = arith.constant 0 : i32
    return %c0_i32, %c0_i32_0 : i32, i32
  }
  func.func @transform_4(%arg0: i32) -> (i32, i32) {
    %c0_i32 = arith.constant 0 : i32
    %c0_i32_0 = arith.constant 0 : i32
    %c0_i32_1 = arith.constant 0 : i32
    return %c0_i32, %c0_i32_0 : i32, i32
  }
  func.func @transform_5(%arg0: i32) -> (i32, i32) {
    %c0_i32 = arith.constant 0 : i32
    %c0_i32_0 = arith.constant 0 : i32
    %c0_i32_1 = arith.constant 0 : i32
    return %c0_i32, %c0_i32_0 : i32, i32
  }
  func.func @transform_6(%arg0: i32) -> (i32, i32) {
    %c0_i32 = arith.constant 0 : i32
    %c0_i32_0 = arith.constant 0 : i32
    %c0_i32_1 = arith.constant 0 : i32
    return %c0_i32, %c0_i32_0 : i32, i32
  }
  func.func @transform_7(%arg0: i32) -> (i32, i32) {
    %c0_i32 = arith.constant 0 : i32
    %c0_i32_0 = arith.constant 0 : i32
    %c0_i32_1 = arith.constant 0 : i32
    return %c0_i32, %c0_i32_0 : i32, i32
  }
  func.func @transform_8(%arg0: i32) -> (i32, i32) {
    %c0_i32 = arith.constant 0 : i32
    %c0_i32_0 = arith.constant 0 : i32
    %c0_i32_1 = arith.constant 0 : i32
    return %c0_i32, %c0_i32_0 : i32, i32
  }
  func.func @transform_9(%arg0: i32) -> (i32, i32) {
    %c0_i32 = arith.constant 0 : i32
    %c0_i32_0 = arith.constant 0 : i32
    return %arg0, %c0_i32 : i32, i32
  }
}

</mosaic_0001>

<bundles_post_ra>
// kernel: tpu_custom_call.1
= control target key start
LH: loop header
LB: loop body
LE: loop exit
PB: predicated region body
PF: predicated region fallthrough
CT: control target
= control target key end

     0   :  { %s5683_s0 = inlined_call_operand.hbm [shape: bf16[512,512], index: 0, kind: input, shape index: {}]   ;;  %s5684_s1 = inlined_call_operand.hbm [shape: bf16[512,256], index: 1, kind: input, shape index: {}]   ;;  %s5685_s2 = inlined_call_operand.vmem [shape: f32[1,256], index: 2, kind: input, shape index: {}]   ;;  %s5686_s3 = inlined_call_operand.hbm [shape: bf16[256,128], index: 3, kind: input, shape index: {}]   ;;  %s5687_s4 = inlined_call_operand.vmem [shape: f32[1,128], index: 4, kind: input, shape index: {}]   ;;  %s5688_s5 = inlined_call_operand.vmem [shape: bf16[128,64], index: 5, kind: input, shape index: {}]   ;;  %s5689_s6 = inlined_call_operand.vmem [shape: f32[1,64], index: 6, kind: input, shape index: {}]   ;;  %s5690_s7 = inlined_call_operand.vmem [shape: f32[1,64], index: 7, kind: input, shape index: {}]   ;;  %s5691_s8 = inlined_call_operand.<no memory space> [shape: f32[1,1], index: 8, kind: input, shape index: {}]   ;;  %s5692_s9 = inlined_call_operand.vmem [shape: f32[512,1], index: 9, kind: output, shape index: {}]  }
   0x1   :  { %5722 = sst [smem:[#allocation41_spill]] %s5684_s1  ;;  %v14_v0 = vstv %s5691_s8 }
   0x2   :  { %15 = vst [vmem:[#allocation2] sm:$0x1] %v14_v0 }
   0x3   :  { %16 = vsyncpa [#allocation4], 0 }
   0x4   :  { %18 = vsyncpa [#allocation4 + $0x1], 0 }
   0x5   :  { %19 = vsyncpa [#allocation6], 0  ;;  %s4292_s11 = smov 0   ;;  %s4294_s12 = smov 0  }
   0x6   :  { %s4296_s13 = smov 0   ;;  %s4298_s14 = smov 0  }
   0x7 LB: > { %s5693_s8 = sadd.s32 4294967295, %s4229_s14   ;;  %p45_p0 = scmp.ne.s32.totalorder %s4221_s12, %s4217_s11  ;;  %s4229_s14 = sphi %s4298_s14, %s5797_s14   ;;  %s4225_s13 = sphi %s4296_s13, %s5796_s13   ;;  %s4221_s12 = sphi %s4294_s12, %s5795_s12   ;;  %s4217_s11 = sphi %s4292_s11, %s5794_s11  }
   0x8   : > { %p4314_p1 = scmp.eq.s32.totalorder %s5693_s8, 0  ;;  %p3100_p2 = scmp.ge.s32.totalorder %s4229_s14, 1 }
   0x9   : > { %p250_p3 = scmp.lt.s32.totalorder %s4229_s14, 3  ;;  %s5725_s1 = sld [smem:[#allocation41_spill]] }
   0xa   : > { %p4322_p4 = por %p4314_p1, %p45_p0  ;;  %s4231_s21 = smov [#allocation5]  }
   0xb   : > { %p4329_p5 = pnand %p3100_p2, %p250_p3  ;;  %s263_s22 = sshll.u32 %s4231_s21, 4  ;;  %s264_s22 = int_to_ptr.vmem [resolvable:$true] %s263_s22 }
   0xc   : > { %s278_s25 = sshll.u32 %s5686_s3, 4  ;;  %s4232_s26 = smov 128   ;;  %s279_s25 = int_to_ptr.hbm [resolvable:$true] %s278_s25 }
   0xd   : > { %p3912_p6 = pneg %p4329_p5  ;;  %s4233_s27 = smov 8  }
   0xe   : > { %s4234_s28 = smov [#allocation7]   ;;  %s4235_s30 = smov 64  }
   0xf   : > { %s261_s19 = sshll.u32 %s5725_s1, 4  ;;  %p3913_p7 = pnand %p3912_p6, %p4314_p1  ;;  %s262_s19 = int_to_ptr.hbm [resolvable:$true] %s261_s19 }
  0x10   : > { %s280_s29 = sshll.u32 %s4234_s28, 4  ;;  %s4236_s10 = smov 4   ;;  %s281_s29 = int_to_ptr.vmem [resolvable:$true] %s280_s29 }
  0x11   : > { %3915 = dma.hbm_to_vmem [thread:$0]  (!%p3913_p7), %s262_s19, 8192, %s264_s22, [#allocation6], %s4232_s26, %s4232_s26, %s4233_s27  }
  0x12   : > { %3918 = dma.hbm_to_vmem [thread:$0]  (!%p3913_p7), %s279_s25, 2048, %s281_s29, [#allocation6], %s4235_s30, %s4235_s30, %s4236_s10  }
  0x13   : > { %s4341_s11 = sadd.s32 1, %s4229_s14   ;;  %s32_s18 = sadd.s32 1, %s4225_s13 }
  0x14   : > { %s29_s17 = ssub.s32 %s4229_s14, %s4341_s11  ;;  %p39_p9 = scmp.ne.s32.totalorder %s4225_s13, %s4221_s12 }
  0x15   : > { %p30_p8 = scmp.eq.s32.totalorder %s29_s17, 0  ;;  %p40_p10 = scmp.eq.s32.totalorder %s4229_s14, 0 }
  0x16   : > { %p3925_p12 = scmp.lt.s32.totalorder %s4229_s14, 2  ;;  %s309_s19 = sand.u32 1, %s4225_s13  }
  0x17   : > { %s4350_s21 = scalar_select %p30_p8, %s4225_s13, %s32_s18  }
  0x18   : > { %p41_p11 = por %p40_p10, %p39_p9  ;;  %s3725_s22 = sshll.u32 %s4229_s14, 9 }
  0x19   : > { %s3104_s23 = sshll.u32 %s309_s19, 9  ;;  %s319_s27 = scalar_lea.hbm %s5683_s0, %s3725_s22 }
  0x1a   : > { %s320_s25 = sshll.u32 %s319_s27, 4  ;;  %s313_s28 = scalar_lea.vmem [#allocation3], %s3104_s23  ;;  %s321_s25 = int_to_ptr.hbm [resolvable:$true] %s320_s25 }
  0x1b   : > { %s322_s29 = sshll.u32 %s313_s28, 4  ;;  %p4358_p13 = pnand %p3925_p12, %p41_p11  ;;  %s323_s29 = int_to_ptr.vmem [resolvable:$true] %s322_s29 }
  0x1c   : > { %s310_s10 = scalar_lea.sflag [#allocation4], %s309_s19  ;;  %s4161_s17 = sshra.s32 %s321_s25, 4  ;;  %s4162_s17 = int_to_ptr.hbm [resolvable:$true] %s4161_s17 }
  0x1d   : > { %s4163_s18 = scalar_lea.hbm %s4162_s17, 512  ;;  %p4165_p2 = pneg %p4358_p13 }
  0x1e   : > { %p4164_p0 = scmp.ne.s32.totalorder %s4162_s17, %s4163_s18  ;;  %s4168_s23 = scalar_lea.hbm %s5683_s0, 1024 }
  0x1f   : > { %p4169_p7 = scmp.lt.s32.totalorder %s4162_s17, %s5683_s0  ;;  %p4170_p8 = scmp.lt.s32.totalorder %s4168_s23, %s4163_s18 }
  0x20   : > { %p4166_p3 = pnand %p4165_p2, %p4164_p0 }
  0x21   : > { %p4171_p9 = por %p4170_p8, %p4169_p7 }
  0x22   : > { %p4167_p6 = pneg %p4166_p3 }
  0x24   : > { %p4172_p10 = pnand %p4171_p9, %p4167_p6 }
  0x26   : > { %4175 = shalt.err (!%p4172_p10)
}
  0x27   : > { %s4237_s19 = smov 256   ;;  %s4238_s28 = smov 16  }
  0x28   : > { %3922 = dma.hbm_to_vmem [thread:$0]  (!%p4358_p13), %s321_s25, 8192, %s323_s29, %s310_s10, %s4237_s19, %s4237_s19, %s4238_s28  }
  0x29   : > { %334 = sbr.rel (%p4329_p5) target bundleno = 1351 (0x547), region = 56 }
  0x2e   : > { %s336_s22 = sand.u32 1, %s4221_s12  }
  0x2f   : > { %s3109_s24 = sshll.u32 %s336_s22, 9  ;;  %s337_s8 = scalar_lea.sflag [#allocation4], %s336_s22 }
  0x30   : > { %s4375_s1 = scalar_lea.vmem [#allocation3], %s3109_s24 }
  0x31   : > { %4208 = dma.done.wait (%p4322_p4), %s337_s8, 8192  }
  0x32   : > { %4210 = vsyncadd (%p4322_p4), %s337_s8, 4294959104 }
  0x33   : > { %4212 = dma.done.wait (%p4314_p1), [#allocation6], 10240  }
  0x34   : > { %4214 = vsyncadd (%p4314_p1), [#allocation6], 4294957056  ;;  %v3428_v1 = vld [vmem:[#allocation5 + $0x70] sm:$0xf]  ;;  %v3805_v2 = vld [vmem:[#allocation5 + $0x74] sm:$0xf0] }
  0x35   : > { %v3420_v3 = vld [vmem:[#allocation5 + $0x60] sm:$0xf]  ;;  %v3429_v4 = vor.u32 %v3805_v2, %v3428_v1  ;;  %v3803_v5 = vld [vmem:[#allocation5 + $0x64] sm:$0xf0]  ;;  %v3412_v7 = vld [vmem:[#allocation5 + $0x50] sm:$0xf] }
  0x36   : > { %v3421_v6 = vor.u32 %v3803_v5, %v3420_v3  ;;  %v3801_v8 = vld [vmem:[#allocation5 + $0x54] sm:$0xf0]  ;;  %v3492_v9 = vld [vmem:[#allocation5 + $0xf0] sm:$0xf]  ;;  %v3404_v11 = vld [vmem:[#allocation5 + $0x40] sm:$0xf] }
  0x37   : > { %1167 = vmatpush.bf16.msra.mxu0 %v3429_v4  ;;  %3878 = vmatpush.bf16.msra.mxu3 %v3429_v4  ;;  %v3413_v10 = vor.u32 %v3801_v8, %v3412_v7  ;;  %v3799_v12 = vld [vmem:[#allocation5 + $0x44] sm:$0xf0]  ;;  %v3821_v13 = vld [vmem:[#allocation5 + $0xf4] sm:$0xf0]  ;;  %v3484_v15 = vld [vmem:[#allocation5 + $0xe0] sm:$0xf] }
  0x38   : > { %v3493_v14 = vor.u32 %v3821_v13, %v3492_v9  ;;  %v3819_v16 = vld [vmem:[#allocation5 + $0xe4] sm:$0xf0]  ;;  %v3405_v17 = vor.u32 %v3799_v12, %v3404_v11  ;;  %v3396_v18 = vld [vmem:[#allocation5 + $0x30] sm:$0xf]  ;;  %v3797_v19 = vld [vmem:[#allocation5 + $0x34] sm:$0xf0] }
  0x39   : > { %v3485_v20 = vor.u32 %v3819_v16, %v3484_v15  ;;  %v3397_v21 = vor.u32 %v3797_v19, %v3396_v18  ;;  %v3388_v22 = vld [vmem:[#allocation5 + $0x20] sm:$0xf]  ;;  %v3795_v23 = vld [vmem:[#allocation5 + $0x24] sm:$0xf0]  ;;  %v3476_v24 = vld [vmem:[#allocation5 + $0xd0] sm:$0xf] }
  0x3a   : > { %1256 = vmatpush.bf16.msra.mxu1 %v3493_v14  ;;  %v3817_v25 = vld [vmem:[#allocation5 + $0xd4] sm:$0xf0]  ;;  %v3389_v26 = vor.u32 %v3795_v23, %v3388_v22  ;;  %v3380_v27 = vld [vmem:[#allocation5 + $0x10] sm:$0xf]  ;;  %v3468_v30 = vld [vmem:[#allocation5 + $0xc0] sm:$0xf] }
  0x3b   : > { %1168 = vmatpush.bf16.msra.mxu0 %v3421_v6  ;;  %3879 = vmatpush.bf16.msra.mxu3 %v3421_v6  ;;  %v3477_v28 = vor.u32 %v3817_v25, %v3476_v24  ;;  %v3793_v29 = vld [vmem:[#allocation5 + $0x14] sm:$0xf0]  ;;  %v3815_v31 = vld [vmem:[#allocation5 + $0xc4] sm:$0xf0]  ;;  %v3372_v34 = vld [vmem:[#allocation5] sm:$0xf] }
  0x3c   : > { %v3381_v32 = vor.u32 %v3793_v29, %v3380_v27  ;;  %v3469_v33 = vor.u32 %v3815_v31, %v3468_v30  ;;  %v3791_v35 = vld [vmem:[#allocation5 + $0x4] sm:$0xf0]  ;;  %v3116_v36 = vld [vmem:[%s4375_s1] sm:$0xf]  ;;  %v3728_v38 = vld [vmem:[%s4375_s1 + $0xc] sm:$0xf0] }
  0x3d   : > { %v3373_v37 = vor.u32 %v3791_v35, %v3372_v34  ;;  %v3308_v39 = vld [vmem:[%s4375_s1 + $0x180] sm:$0xf]  ;;  %v3776_v40 = vld [vmem:[%s4375_s1 + $0x18c] sm:$0xf0]  ;;  %v4389_v41 = vor.u32 %v3728_v38, %v3116_v36  ;;  %v3813_v44 = vld [vmem:[#allocation5 + $0xb4] sm:$0xf0] }
  0x3e   : > { %1257 = vmatpush.bf16.msra.mxu1 %v3485_v20  ;;  %v4391_v42 = vor.u32 %v3776_v40, %v3308_v39  ;;  %v3460_v43 = vld [vmem:[#allocation5 + $0xb0] sm:$0xf]  ;;  %v3452_v46 = vld [vmem:[#allocation5 + $0xa0] sm:$0xf]  ;;  %v3811_v47 = vld [vmem:[#allocation5 + $0xa4] sm:$0xf0] }
  0x3f   : > { %1169 = vmatpush.bf16.msra.mxu0 %v3413_v10  ;;  %3880 = vmatpush.bf16.msra.mxu3 %v3413_v10  ;;  %v3461_v45 = vor.u32 %v3813_v44, %v3460_v43  ;;  %v3453_v48 = vor.u32 %v3811_v47, %v3452_v46  ;;  %v3132_v49 = vld [vmem:[%s4375_s1 + $0x20] sm:$0xf]  ;;  %v3732_v50 = vld [vmem:[%s4375_s1 + $0x2c] sm:$0xf0]  ;;  %v3809_v56 = vld [vmem:[#allocation5 + $0x94] sm:$0xf0] }
  0x40   : > { %v3324_v51 = vld [vmem:[%s4375_s1 + $0x1a0] sm:$0xf]  ;;  %v3780_v52 = vld [vmem:[%s4375_s1 + $0x1ac] sm:$0xf0]  ;;  %v4399_v53 = vor.u32 %v3732_v50, %v3132_v49  ;;  %v3807_v59 = vld [vmem:[#allocation5 + $0x84] sm:$0xf0] }
  0x41   : > { %v4401_v54 = vor.u32 %v3780_v52, %v3324_v51  ;;  %v3444_v55 = vld [vmem:[#allocation5 + $0x90] sm:$0xf]  ;;  %v3436_v58 = vld [vmem:[#allocation5 + $0x80] sm:$0xf]  ;;  %v3837_v4 = vld [vmem:[#allocation5 + $0x174] sm:$0xf0] }
  0x42   : > { %1258 = vmatpush.bf16.msra.mxu1 %v3477_v28  ;;  %v3445_v57 = vor.u32 %v3809_v56, %v3444_v55  ;;  %v3437_v60 = vor.u32 %v3807_v59, %v3436_v58  ;;  %v3148_v61 = vld [vmem:[%s4375_s1 + $0x40] sm:$0xf]  ;;  %v3736_v62 = vld [vmem:[%s4375_s1 + $0x4c] sm:$0xf0]  ;;  %v3835_v7 = vld [vmem:[#allocation5 + $0x164] sm:$0xf0] }
  0x43   : > { %1170 = vmatpush.bf16.msra.mxu0 %v3405_v17  ;;  %3881 = vmatpush.bf16.msra.mxu3 %v3405_v17  ;;  %5728 = vst [vmem:[#allocation10_spill] sm:$0xff] %v4401_v54  ;;  %v3340_v63 = vld [vmem:[%s4375_s1 + $0x1c0] sm:$0xf]  ;;  %v3784_v0 = vld [vmem:[%s4375_s1 + $0x1cc] sm:$0xf0]  ;;  %v4409_v1 = vor.u32 %v3736_v62, %v3148_v61  ;;  %vm2558_vm0 = vcmask 523264  }
  0x44   : > { %v4411_v2 = vor.u32 %v3784_v0, %v3340_v63  ;;  %v3556_v3 = vld [vmem:[#allocation5 + $0x170] sm:$0xf]  ;;  %v3548_v5 = vld [vmem:[#allocation5 + $0x160] sm:$0xf]  ;;  %v3833_v16 = vld [vmem:[#allocation5 + $0x154] sm:$0xf0] }
  0x45   : > { %v3557_v6 = vor.u32 %v3837_v4, %v3556_v3  ;;  %v3549_v8 = vor.u32 %v3835_v7, %v3548_v5  ;;  %v3164_v9 = vld [vmem:[%s4375_s1 + $0x60] sm:$0xf]  ;;  %v3740_v10 = vld [vmem:[%s4375_s1 + $0x6c] sm:$0xf0]  ;;  %v3831_v19 = vld [vmem:[#allocation5 + $0x144] sm:$0xf0] }
  0x46   : > { %1259 = vmatpush.bf16.msra.mxu1 %v3469_v33  ;;  %5729 = vst [vmem:[#allocation11_spill] sm:$0xff] %v4411_v2  ;;  %v3356_v11 = vld [vmem:[%s4375_s1 + $0x1e0] sm:$0xf]  ;;  %v3788_v12 = vld [vmem:[%s4375_s1 + $0x1ec] sm:$0xf0]  ;;  %v4419_v13 = vor.u32 %v3740_v10, %v3164_v9  ;;  %s5792_s29 = sadd.s32 4294967295, %s4229_s14  }
  0x47   : > { %1171 = vmatpush.bf16.msra.mxu0 %v3397_v21  ;;  %3882 = vmatpush.bf16.msra.mxu3 %v3397_v21  ;;  %v3540_v15 = vld [vmem:[#allocation5 + $0x150] sm:$0xf]  ;;  %v3532_v17 = vld [vmem:[#allocation5 + $0x140] sm:$0xf]  ;;  %v3774_v23 = vld [vmem:[%s4375_s1 + $0x184] sm:$0xf] }
  0x48   : > { %1345 = vmatpush.bf16.msra.mxu2 %v3557_v6  ;;  %v3541_v18 = vor.u32 %v3833_v16, %v3540_v15  ;;  %v3180_v21 = vld [vmem:[%s4375_s1 + $0x80] sm:$0xf]  ;;  %v3744_v22 = vld [vmem:[%s4375_s1 + $0x8c] sm:$0xf0]  ;;  %v3310_v24 = vld [vmem:[%s4375_s1 + $0x190] sm:$0xf0] }
  0x49   : > { %v4429_v25 = vor.u32 %v3744_v22, %v3180_v21  ;;  %v3524_v27 = vld [vmem:[#allocation5 + $0x130] sm:$0xf]  ;;  %v3516_v29 = vld [vmem:[#allocation5 + $0x120] sm:$0xf]  ;;  %v3827_v31 = vld [vmem:[#allocation5 + $0x124] sm:$0xf0] }
  0x4a   : > { %1260 = vmatpush.bf16.msra.mxu1 %v3461_v45  ;;  %v3748_v34 = vld [vmem:[%s4375_s1 + $0xac] sm:$0xf0]  ;;  %v3778_v35 = vld [vmem:[%s4375_s1 + $0x1a4] sm:$0xf]  ;;  %v3326_v36 = vld [vmem:[%s4375_s1 + $0x1b0] sm:$0xf0] }
  0x4b   : > { %1172 = vmatpush.bf16.msra.mxu0 %v3389_v26  ;;  %3883 = vmatpush.bf16.msra.mxu3 %v3389_v26  ;;  %v4431_v26 = vor.u32 %v3774_v23, %v3310_v24  ;;  %v4441_v38 = vor.u32 %v3778_v35, %v3326_v36  ;;  %v3508_v39 = vld [vmem:[#allocation5 + $0x110] sm:$0xf]  ;;  %v3825_v40 = vld [vmem:[#allocation5 + $0x114] sm:$0xf0]  ;;  %v3500_v43 = vld [vmem:[#allocation5 + $0x100] sm:$0xf] }
  0x4c   : > { %1346 = vmatpush.bf16.msra.mxu2 %v3549_v8  ;;  %v3509_v44 = vor.u32 %v3825_v40, %v3508_v39  ;;  %v3212_v47 = vld [vmem:[%s4375_s1 + $0xc0] sm:$0xf]  ;;  %v3782_v49 = vld [vmem:[%s4375_s1 + $0x1c4] sm:$0xf]  ;;  %v3342_v50 = vld [vmem:[%s4375_s1 + $0x1d0] sm:$0xf0] }
  0x4d   : > { %5731 = vst [vmem:[#allocation13_spill] sm:$0xff] %v4431_v26  ;;  %v4451_v52 = vor.u32 %v3782_v49, %v3342_v50  ;;  %v3620_v55 = vld [vmem:[#allocation5 + $0x1f0] sm:$0xf]  ;;  %v3853_v56 = vld [vmem:[#allocation5 + $0x1f4] sm:$0xf0]  ;;  %s3112_s30 = sshll.u32 %s5792_s29, 5 }
  0x4e   : > { %1261 = vmatpush.bf16.msra.mxu1 %v3453_v48  ;;  %5732 = vst [vmem:[#allocation14_spill] sm:$0xff] %v4441_v38  ;;  %v3124_v58 = vld [vmem:[%s4375_s1 + $0x8] sm:$0xf]  ;;  %v3729_v59 = vld [vmem:[%s4375_s1 + $0x14] sm:$0xf0]  ;;  %p388_p1 = scmp.lt.s32.totalorder %s3112_s30, 63 }
  0x4f   : > { %1173 = vmatpush.bf16.msra.mxu0 %v3381_v32  ;;  %3884 = vmatpush.bf16.msra.mxu3 %v3381_v32  ;;  %v3517_v32 = vor.u32 %v3827_v31, %v3516_v29  ;;  %5733 = vst [vmem:[#allocation15_spill] sm:$0xff] %v4451_v52  ;;  %v3612_v61 = vld [vmem:[#allocation5 + $0x1e0] sm:$0xf]  ;;  %v3851_v62 = vld [vmem:[#allocation5 + $0x1e4] sm:$0xf0]  ;;  %vm2979_vm1 = vcmask 7168  }
  0x50   : > { %1347 = vmatpush.bf16.msra.mxu2 %v3541_v18  ;;  %v3726_v63 = vld [vmem:[%s4375_s1 + $0x4] sm:$0xf]  ;;  %v3613_v0 = vor.u32 %v3851_v62, %v3612_v61  ;;  %v3118_v3 = vld [vmem:[%s4375_s1 + $0x10] sm:$0xf0]  ;;  %v3228_v4 = vld [vmem:[%s4375_s1 + $0xe0] sm:$0xf] }
  0x51   : > { %v4463_v5 = vor.u32 %v3726_v63, %v3118_v3  ;;  %v3786_v7 = vld [vmem:[%s4375_s1 + $0x1e4] sm:$0xf]  ;;  %v3804_v15 = vld [vmem:[#allocation5 + $0x74] sm:$0xf]  ;;  %v3140_v22 = vld [vmem:[%s4375_s1 + $0x28] sm:$0xf] }
  0x52   : > { %1262 = vmatpush.bf16.msra.mxu1 %v3445_v57  ;;  %v3733_v23 = vld [vmem:[%s4375_s1 + $0x34] sm:$0xf0]  ;;  %v3730_v29 = vld [vmem:[%s4375_s1 + $0x24] sm:$0xf]  ;;  %v3134_v31 = vld [vmem:[%s4375_s1 + $0x30] sm:$0xf0] }
  0x53   : > { %1174 = vmatpush.bf16.msra.mxu0 %v3373_v37  ;;  %3885 = vmatpush.bf16.msra.mxu3 %v3373_v37  ;;  %v4477_v24 = vor.u32 %v3733_v23, %v3140_v22  ;;  %v3316_v35 = vld [vmem:[%s4375_s1 + $0x188] sm:$0xf]  ;;  %v3777_v36 = vld [vmem:[%s4375_s1 + $0x194] sm:$0xf0]  ;;  %v3800_v62 = vld [vmem:[#allocation5 + $0x54] sm:$0xf] }
  0x54   : > { %v4491_v40 = vor.u32 %v3777_v36, %v3316_v35  ;;  %v3843_v61 = vld [vmem:[#allocation5 + $0x1a4] sm:$0xf0]  ;;  %v3734_v3 = vld [vmem:[%s4375_s1 + $0x44] sm:$0xf]  ;;  %s5799_s30 = smov (!%p388_p1, %s3112_s30), 63 }
  0x55   : > { %v3794_v36 = vld [vmem:[#allocation5 + $0x24] sm:$0xf]  ;;  %s3113_s14 = sshll.u32 %s5799_s30, 3 }
  0x56   : > { %1175 = vmatmul.bf16.vlgmr.msra.gmra.mxu0 %v4389_v41  ;;  %1235 = vmatmul.bf16.vlgmr.msra.gmra.mxu3 %v4391_v42  ;;  %5735 = vst [vmem:[#allocation17_spill] sm:$0xff] %v4491_v40  ;;  %s5490_s18 = scalar_lea.vmem %s5692_s9, %s3113_s14 }
  0x57   : > { %3886 = vmatpush.bf16.msrb.mxu3 %v3493_v14  ;;  %1263 = vmatpush.bf16.msra.mxu1 %v3437_v60  ;;  %v4421_v14 = vor.u32 %v3788_v12, %v3356_v11  ;;  %v3604_v11 = vld [vmem:[#allocation5 + $0x1d0] sm:$0xf]  ;;  %v3849_v12 = vld [vmem:[#allocation5 + $0x1d4] sm:$0xf0] }
  0x58   : > { %v3605_v16 = vor.u32 %v3849_v12, %v3604_v11  ;;  %v3818_v11 = vld [vmem:[#allocation5 + $0xe4] sm:$0xf]  ;;  %v3486_v12 = vld [vmem:[#allocation5 + $0xe8] sm:$0xf0] }
  0x59   : > { %5730 = vst [vmem:[#allocation12_spill] sm:$0xff] %v4421_v14 }
  0x5a   : > { %1264 = vmatmul.bf16.vlgmr.msra.gmra.mxu1 %v4463_v5 }
  0x5b   : > { %3887 = vmatpush.bf16.msrb.mxu3 %v3485_v20  ;;  %v3533_v20 = vor.u32 %v3831_v19, %v3532_v17  ;;  %v3430_v17 = vld [vmem:[#allocation5 + $0x78] sm:$0xf0] }
  0x5c   : > { %v3494_v19 = vld [vmem:[#allocation5 + $0xf8] sm:$0xf0] }
  0x5d   : > { %1348 = vmatpush.bf16.msra.mxu2 %v3533_v20 }
  0x5f   : > { %3888 = vmatpush.bf16.msrb.mxu3 %v3477_v28  ;;  %v3829_v28 = vld [vmem:[#allocation5 + $0x134] sm:$0xf0] }
  0x60   : > { %v3525_v30 = vor.u32 %v3829_v28, %v3524_v27  ;;  %v3596_v27 = vld [vmem:[#allocation5 + $0x1c0] sm:$0xf]  ;;  %v3847_v28 = vld [vmem:[#allocation5 + $0x1c4] sm:$0xf0] }
  0x62   : > { %1349 = vmatpush.bf16.msra.mxu2 %v3525_v30 }
  0x63   : > { %3889 = vmatpush.bf16.msrb.mxu3 %v3469_v33  ;;  %v3196_v33 = vld [vmem:[%s4375_s1 + $0xa0] sm:$0xf] }
  0x64   : > { %v4439_v37 = vor.u32 %v3748_v34, %v3196_v33  ;;  %v4483_v33 = vor.u32 %v3730_v29, %v3134_v31  ;;  %v3760_v34 = vld [vmem:[%s4375_s1 + $0x10c] sm:$0xf0]  ;;  %v3796_v29 = vld [vmem:[#allocation5 + $0x34] sm:$0xf] }
  0x66   : > { %1180 = vmatmul.bf16.gmra.mxu0 %v4399_v53  ;;  %1240 = vmatmul.bf16.gmra.mxu3 %v4401_v54  ;;  %v3190_v54 = vld [vmem:[%s4375_s1 + $0x98] sm:$0xf0] }
  0x67   : > { %3890 = vmatpush.bf16.msrb.mxu3 %v3461_v45  ;;  %1350 = vmatpush.bf16.msra.mxu2 %v3517_v32  ;;  %v3823_v45 = vld [vmem:[#allocation5 + $0x104] sm:$0xf0] }
  0x68   : > { %v3501_v46 = vor.u32 %v3823_v45, %v3500_v43  ;;  %v3845_v45 = vld [vmem:[#allocation5 + $0x1b4] sm:$0xf0] }
  0x6a   : > { %1269 = vmatmul.bf16.gmra.mxu1 %v4483_v33 }
  0x6b   : > { %3891 = vmatpush.bf16.msrb.mxu3 %v3453_v48  ;;  %1351 = vmatpush.bf16.msra.mxu2 %v3509_v44  ;;  %v3752_v48 = vld [vmem:[%s4375_s1 + $0xcc] sm:$0xf0] }
  0x6c   : > { %v4449_v51 = vor.u32 %v3752_v48, %v3212_v47  ;;  %v3802_v47 = vld [vmem:[#allocation5 + $0x64] sm:$0xf]  ;;  %v3422_v48 = vld [vmem:[#allocation5 + $0x68] sm:$0xf0] }
  0x6d   : > { %v3425_v50 = vor.u32 %v3802_v47, %v3422_v48  ;;  %v3172_v47 = vld [vmem:[%s4375_s1 + $0x68] sm:$0xf]  ;;  %v3741_v48 = vld [vmem:[%s4375_s1 + $0x74] sm:$0xf0] }
  0x6f   : > { %3892 = vmatpush.bf16.msrb.mxu3 %v3445_v57  ;;  %1352 = vmatpush.bf16.msra.mxu2 %v3501_v46  ;;  %v3621_v57 = vor.u32 %v3853_v56, %v3620_v55  ;;  %v3156_v55 = vld [vmem:[%s4375_s1 + $0x48] sm:$0xf]  ;;  %v3737_v56 = vld [vmem:[%s4375_s1 + $0x54] sm:$0xf0] }
  0x73   : > { %3893 = vmatpush.bf16.msrb.mxu3 %v3437_v60  ;;  %v4457_v60 = vor.u32 %v3729_v59, %v3124_v58  ;;  %v3580_v59 = vld [vmem:[#allocation5 + $0x1a0] sm:$0xf] }
  0x74   : > { %v3581_v63 = vor.u32 %v3843_v61, %v3580_v59  ;;  %v3839_v59 = vld [vmem:[#allocation5 + $0x184] sm:$0xf0]  ;;  %v3792_v61 = vld [vmem:[#allocation5 + $0x14] sm:$0xf] }
  0x75   : > { %1353 = vmatmul.bf16.vlgmr.msra.gmra.mxu2 %v4457_v60 }
  0x76   : > { %1185 = vmatmul.bf16.gmra.mxu0 %v4409_v1  ;;  %1245 = vmatmul.bf16.gmra.mxu3 %v4411_v2 }
  0x77   : > { %3894 = vmatpush.bf16.msra.mxu3 %v3557_v6  ;;  %v3756_v6 = vld [vmem:[%s4375_s1 + $0xec] sm:$0xf0] }
  0x78   : > { %v4469_v9 = vor.u32 %v3756_v6, %v3228_v4  ;;  %v3150_v4 = vld [vmem:[%s4375_s1 + $0x50] sm:$0xf0]  ;;  %v3260_v6 = vld [vmem:[%s4375_s1 + $0x120] sm:$0xf] }
  0x7b   : > { %3895 = vmatpush.bf16.msra.mxu3 %v3549_v8  ;;  %v3358_v8 = vld [vmem:[%s4375_s1 + $0x1f0] sm:$0xf0] }
  0x7c   : > { %v4471_v10 = vor.u32 %v3786_v7, %v3358_v8  ;;  %v4509_v8 = vor.u32 %v3734_v3, %v3150_v4  ;;  %v3166_v3 = vld [vmem:[%s4375_s1 + $0x70] sm:$0xf0]  ;;  %v3276_v4 = vld [vmem:[%s4375_s1 + $0x140] sm:$0xf] }
  0x7e   : > { %5734 = vst [vmem:[#allocation16_spill] sm:$0xff] %v4471_v10  ;;  %1274 = vmatmul.bf16.gmra.mxu1 %v4509_v8 }
  0x7f   : > { %3896 = vmatpush.bf16.msra.mxu3 %v3541_v18  ;;  %v3820_v18 = vld [vmem:[#allocation5 + $0xf4] sm:$0xf] }
  0x80   : > { %v3497_v21 = vor.u32 %v3820_v18, %v3494_v19  ;;  %v3489_v18 = vor.u32 %v3818_v11, %v3486_v12  ;;  %v3798_v19 = vld [vmem:[#allocation5 + $0x44] sm:$0xf]  ;;  %v3768_v11 = vld [vmem:[%s4375_s1 + $0x14c] sm:$0xf0]  ;;  %v3348_v12 = vld [vmem:[%s4375_s1 + $0x1c8] sm:$0xf] }
  0x82   : > { %1612 = vmatpush.bf16.msrb.mxu1 %v3497_v21 }
  0x83   : > { %3897 = vmatpush.bf16.msra.mxu3 %v3533_v20  ;;  %v3433_v20 = vor.u32 %v3804_v15, %v3430_v17  ;;  %v3764_v15 = vld [vmem:[%s4375_s1 + $0x12c] sm:$0xf0]  ;;  %v3781_v17 = vld [vmem:[%s4375_s1 + $0x1b4] sm:$0xf0] }
  0x84   : > { %v4517_v23 = vor.u32 %v3764_v15, %v3260_v6  ;;  %v3785_v15 = vld [vmem:[%s4375_s1 + $0x1d4] sm:$0xf0] }
  0x85   : > { %1523 = vmatpush.bf16.msrb.mxu0 %v3433_v20  ;;  %1358 = vmatmul.bf16.gmra.mxu2 %v4477_v24  ;;  %v3406_v20 = vld [vmem:[#allocation5 + $0x48] sm:$0xf0] }
  0x86   : > { %1190 = vmatmul.bf16.gmra.mxu0 %v4419_v13  ;;  %1250 = vmatmul.bf16.gmra.mxu3 %v4421_v14  ;;  %v3409_v22 = vor.u32 %v3798_v19, %v3406_v20  ;;  %v4545_v20 = vor.u32 %v3768_v11, %v3276_v4  ;;  %v3789_v4 = vld [vmem:[%s4375_s1 + $0x1f4] sm:$0xf0]  ;;  %v3454_v14 = vld [vmem:[#allocation5 + $0xa8] sm:$0xf0] }
  0x87   : > { %3898 = vmatpush.bf16.msra.mxu3 %v3525_v30  ;;  %v3597_v30 = vor.u32 %v3847_v28, %v3596_v27  ;;  %1613 = vmatpush.bf16.msrb.mxu1 %v3489_v18 }
  0x89   : > { %1524 = vmatpush.bf16.msrb.mxu0 %v3425_v50  ;;  %v4529_v50 = vor.u32 %v3741_v48, %v3172_v47  ;;  %v3745_v47 = vld [vmem:[%s4375_s1 + $0x94] sm:$0xf0] }
  0x8b   : > { %3899 = vmatpush.bf16.msra.mxu3 %v3517_v32  ;;  %v3244_v32 = vld [vmem:[%s4375_s1 + $0x100] sm:$0xf] }
  0x8c   : > { %v4489_v39 = vor.u32 %v3760_v34, %v3244_v32  ;;  %v3572_v32 = vld [vmem:[#allocation5 + $0x190] sm:$0xf]  ;;  %v3841_v34 = vld [vmem:[#allocation5 + $0x194] sm:$0xf0] }
  0x8d   : > { %v3573_v35 = vor.u32 %v3841_v34, %v3572_v32  ;;  %v3816_v32 = vld [vmem:[#allocation5 + $0xd4] sm:$0xf] }
  0x8f   : > { %3900 = vmatpush.bf16.msra.mxu3 %v3509_v44  ;;  %v3588_v44 = vld [vmem:[#allocation5 + $0x1b0] sm:$0xf] }
  0x93   : > { %3901 = vmatpush.bf16.msra.mxu3 %v3501_v46  ;;  %v3589_v46 = vor.u32 %v3845_v45, %v3588_v44  ;;  %v3390_v44 = vld [vmem:[#allocation5 + $0x28] sm:$0xf0] }
  0x96   : > { %1195 = vmatmul.bf16.gmra.mxu0 %v4429_v25  ;;  %1324 = vmatmul.bf16.vlgmr.msrb.gmra.mxu3 %v4431_v26  ;;  %v3230_v26 = vld [vmem:[%s4375_s1 + $0xf0] sm:$0xf0] }
  0x97   : > { %1434 = vmatpush.bf16.msrb.mxu3 %v3621_v57  ;;  %v4501_v57 = vor.u32 %v3737_v56, %v3156_v55  ;;  %v3564_v56 = vld [vmem:[#allocation5 + $0x180] sm:$0xf] }
  0x99   : > { %1363 = vmatmul.bf16.gmra.mxu2 %v4501_v57 }
  0x9b   : > { %1435 = vmatpush.bf16.msrb.mxu3 %v3613_v0  ;;  %v3414_v0 = vld [vmem:[#allocation5 + $0x58] sm:$0xf0] }
  0x9c   : > { %v3417_v7 = vor.u32 %v3800_v62, %v3414_v0  ;;  %v3565_v62 = vor.u32 %v3839_v59, %v3564_v56  ;;  %v3738_v0 = vld [vmem:[%s4375_s1 + $0x64] sm:$0xf] }
  0x9d   : > { %v3742_v59 = vld [vmem:[%s4375_s1 + $0x84] sm:$0xf] }
  0x9e   : > { %1525 = vmatpush.bf16.msrb.mxu0 %v3417_v7  ;;  %v4537_v7 = vor.u32 %v3738_v0, %v3166_v3  ;;  %v3772_v0 = vld [vmem:[%s4375_s1 + $0x16c] sm:$0xf0]  ;;  %v3364_v3 = vld [vmem:[%s4375_s1 + $0x1e8] sm:$0xf] }
  0x9f   : > { %1436 = vmatpush.bf16.msrb.mxu3 %v3605_v16  ;;  %v3332_v16 = vld [vmem:[%s4375_s1 + $0x1a8] sm:$0xf] }
  0xa0   : > { %v4519_v27 = vor.u32 %v3781_v17, %v3332_v16  ;;  %1279 = vmatmul.bf16.gmra.mxu1 %v4537_v7  ;;  %v3790_v16 = vld [vmem:[#allocation5 + $0x4] sm:$0xf]  ;;  %v3374_v17 = vld [vmem:[#allocation5 + $0x8] sm:$0xf0] }
  0xa1   : > { %v3377_v19 = vor.u32 %v3790_v16, %v3374_v17  ;;  %v3204_v17 = vld [vmem:[%s4375_s1 + $0xa8] sm:$0xf] }
  0xa2   : > { %5736 = vst [vmem:[#allocation18_spill] sm:$0xff] %v4519_v27  ;;  %1526 = vmatpush.bf16.msrb.mxu0 %v3409_v22  ;;  %v4547_v22 = vor.u32 %v3785_v15, %v3348_v12  ;;  %v4575_v12 = vor.u32 %v3789_v4, %v3364_v3 }
  0xa3   : > { %1437 = vmatpush.bf16.msrb.mxu3 %v3597_v30  ;;  %v3398_v30 = vld [vmem:[#allocation5 + $0x38] sm:$0xf0] }
  0xa4   : > { %v3401_v31 = vor.u32 %v3796_v29, %v3398_v30  ;;  %5737 = vst [vmem:[#allocation19_spill] sm:$0xff] %v4547_v22  ;;  %v3852_v30 = vld [vmem:[#allocation5 + $0x1f4] sm:$0xf] }
  0xa5   : > { %5738 = vst [vmem:[#allocation20_spill] sm:$0xff] %v4575_v12 }
  0xa6   : > { %1200 = vmatmul.bf16.gmra.mxu0 %v4439_v37  ;;  %1329 = vmatmul.bf16.gmra.mxu3 %v4441_v38 }
  0xa7   : > { %1438 = vmatpush.bf16.msrb.mxu3 %v3589_v46  ;;  %1527 = vmatpush.bf16.msrb.mxu0 %v3401_v31  ;;  %v3393_v46 = vor.u32 %v3794_v36, %v3390_v44  ;;  %v3622_v31 = vld [vmem:[#allocation5 + $0x1f8] sm:$0xf0] }
  0xa8   : > { %v3625_v34 = vor.u32 %v3852_v30, %v3622_v31 }
  0xa9   : > { %1368 = vmatmul.bf16.gmra.mxu2 %v4529_v50 }
  0xab   : > { %1439 = vmatpush.bf16.msrb.mxu3 %v3581_v63  ;;  %1528 = vmatpush.bf16.msrb.mxu0 %v3393_v46  ;;  %v3382_v63 = vld [vmem:[#allocation5 + $0x18] sm:$0xf0]  ;;  %v3188_v46 = vld [vmem:[%s4375_s1 + $0x88] sm:$0xf] }
  0xac   : > { %v3385_v6 = vor.u32 %v3792_v61, %v3382_v63  ;;  %v4557_v48 = vor.u32 %v3745_v47, %v3188_v46  ;;  %v3182_v61 = vld [vmem:[%s4375_s1 + $0x90] sm:$0xf0]  ;;  %v3292_v63 = vld [vmem:[%s4375_s1 + $0x160] sm:$0xf]  ;;  %v3470_v46 = vld [vmem:[#allocation5 + $0xc8] sm:$0xf0] }
  0xad   : > { %v4573_v11 = vor.u32 %v3772_v0, %v3292_v63  ;;  %v4600_v63 = vld [vmem:[%s5685_s2] sm:$0x3] }
  0xae   : > { %5739 = vst [vmem:[#allocation21_spill] sm:$0xff] %v4600_v63 }
  0xaf   : > { %1440 = vmatpush.bf16.msrb.mxu3 %v3573_v35  ;;  %1529 = vmatpush.bf16.msrb.mxu0 %v3385_v6  ;;  %v3478_v35 = vld [vmem:[#allocation5 + $0xd8] sm:$0xf0] }
  0xb0   : > { %v3481_v36 = vor.u32 %v3816_v32, %v3478_v35  ;;  %v3746_v32 = vld [vmem:[%s4375_s1 + $0xa4] sm:$0xf] }
  0xb1   : > { %v3814_v35 = vld [vmem:[#allocation5 + $0xc4] sm:$0xf] }
  0xb2   : > { %1614 = vmatpush.bf16.msrb.mxu1 %v3481_v36  ;;  %v3473_v47 = vor.u32 %v3814_v35, %v3470_v46 }
  0xb3   : > { %1441 = vmatpush.bf16.msrb.mxu3 %v3565_v62  ;;  %1530 = vmatpush.bf16.msrb.mxu0 %v3377_v19  ;;  %v4564_v62 = vor.u32 %v3742_v59, %v3182_v61  ;;  %v3749_v19 = vld [vmem:[%s4375_s1 + $0xb4] sm:$0xf0]  ;;  %v3727_v59 = vld [vmem:[%s4375_s1 + $0xc] sm:$0xf]  ;;  %v3126_v61 = vld [vmem:[%s4375_s1 + $0x18] sm:$0xf0] }
  0xb4   : > { %v4585_v30 = vor.u32 %v3749_v19, %v3204_v17  ;;  %v4604_v3 = vor.u32 %v3727_v59, %v3126_v61  ;;  %v4609_v17 = vperm.slane %v4600_v63, 0  ;;  %v3850_v19 = vld [vmem:[#allocation5 + $0x1e4] sm:$0xf]  ;;  %v3753_v59 = vld [vmem:[%s4375_s1 + $0xd4] sm:$0xf0] }
  0xb5   : > { %1284 = vmatmul.bf16.gmra.mxu1 %v4564_v62 }
  0xb6   : > { %1205 = vmatmul.bf16.gmra.mxu0 %v4449_v51  ;;  %1334 = vmatmul.bf16.gmra.mxu3 %v4451_v52  ;;  %5740 = vst [vmem:[#allocation22_spill] sm:$0xff] %v4604_v3  ;;  %v3214_v52 = vld [vmem:[%s4375_s1 + $0xd0] sm:$0xf0] }
  0xb7   : > { %1615 = vmatpush.bf16.msrb.mxu1 %v3473_v47  ;;  %v3220_v47 = vld [vmem:[%s4375_s1 + $0xc8] sm:$0xf] }
  0xb9   : > { %1373 = vmatmul.bf16.gmra.mxu2 %v4557_v48 }
  0xc6   : > { %1210 = vmatmul.bf16.gmra.mxu0 %v4469_v9  ;;  %1339 = vmatmul.bf16.gmra.mxu3 %v4471_v10  ;;  %v4619_v10 = vor.u32 %v3753_v59, %v3220_v47  ;;  %v3462_v59 = vld [vmem:[#allocation5 + $0xb8] sm:$0xf0] }
  0xc8   : > { %5741 = vst [vmem:[#allocation23_spill] sm:$0xff] %v4619_v10 }
  0xc9   : > { %1378 = vmatmul.bf16.gmra.mxu2 %v4585_v30 }
  0xd3   : > { %v4493_v43 = vpop.f32.mrf.mxu0 }
  0xd6   : > { %1215 = vmatmul.bf16.gmra.mxu0 %v4489_v39  ;;  %1413 = vmatmul.bf16.vlgmr.msra.gmra.mxu3 %v4491_v40 }
  0xd7   : > { %1790 = vmatpush.bf16.msra.mxu3 %v3625_v34  ;;  %v3198_v34 = vld [vmem:[%s4375_s1 + $0xb0] sm:$0xf0] }
  0xd8   : > { %v4592_v36 = vor.u32 %v3746_v32, %v3198_v34  ;;  %v3614_v32 = vld [vmem:[#allocation5 + $0x1e8] sm:$0xf0] }
  0xd9   : > { %v4497_v49 = vpop.f32.mrf.mxu3  ;;  %v3617_v34 = vor.u32 %v3850_v19, %v3614_v32  ;;  %1383 = vmatmul.bf16.gmra.mxu2 %v4619_v10  ;;  %v3731_v19 = vld [vmem:[%s4375_s1 + $0x2c] sm:$0xf]  ;;  %v3142_v32 = vld [vmem:[%s4375_s1 + $0x38] sm:$0xf0] }
  0xda   : > { %1289 = vmatmul.bf16.gmra.mxu1 %v4592_v36  ;;  %v1237_v35 = vadd.f32 %v4497_v49, %v4609_v17 }
  0xdb   : > { %v4503_v58 = vpop.f32.mrf.mxu0  ;;  %1791 = vmatpush.bf16.msra.mxu3 %v3617_v34 }
  0xe1   : > { %v4515_v21 = vpop.f32.mrf.mxu3 }
  0xe2   : > { %v1239_v49 = vadd.f32 %v4515_v21, %v4609_v17 }
  0xe3   : > { %v4521_v28 = vpop.f32.mrf.mxu0 }
  0xe6   : > { %1220 = vmatmul.bf16.gmra.mxu0 %v4517_v23  ;;  %1418 = vmatmul.bf16.gmra.mxu3 %v4519_v27 }
  0xe9   : > { %v4525_v45 = vpop.f32.mrf.mxu3 }
  0xeb   : > { %v4531_v55 = vpop.f32.mrf.mxu0 }
  0xf1   : > { %v4543_v18 = vpop.f32.mrf.mxu3 }
  0xf3   : > { %v4549_v29 = vpop.f32.mrf.mxu0 }
  0xf6   : > { %1225 = vmatmul.bf16.gmra.mxu0 %v4545_v20  ;;  %1423 = vmatmul.bf16.gmra.mxu3 %v4547_v22 }
  0xf9   : > { %v4553_v44 = vpop.f32.mrf.mxu3 }
  0xfb   : > { %v4559_v56 = vpop.f32.mrf.mxu0 }
 0x101   : > { %v4571_v6 = vpop.f32.mrf.mxu3 }
 0x103   : > { %v4577_v15 = vpop.f32.mrf.mxu0 }
 0x106   : > { %1230 = vmatmul.bf16.gmra.mxu0 %v4573_v11  ;;  %1428 = vmatmul.bf16.gmra.mxu3 %v4575_v12 }
 0x109   : > { %v4581_v16 = vpop.f32.mrf.mxu3 }
 0x10b   : > { %v4587_v31 = vpop.f32.mrf.mxu0 }
 0x111   : > { %v4602_v0 = vpop.f32.mrf.mxu3 }
 0x113   : > { %v4606_v4 = vpop.f32.mrf.mxu0 }
 0x116   : > { %1442 = vmatmul.bf16.vlgmr.msrb.gmra.mxu3 %v4604_v3  ;;  %1531 = vmatmul.bf16.vlgmr.msrb.gmra.mxu0 %v4389_v41  ;;  %v3750_v41 = vld [vmem:[%s4375_s1 + $0xc4] sm:$0xf] }
 0x117   : > { %v4626_v22 = vor.u32 %v3750_v41, %v3214_v52  ;;  %v3812_v52 = vld [vmem:[#allocation5 + $0xb4] sm:$0xf]  ;;  %v1242_v41 = vadd.f32 %v4525_v45, %v4609_v17  ;;  %v1244_v45 = vadd.f32 %v4543_v18, %v4609_v17 }
 0x118   : > { %v3465_v21 = vor.u32 %v3812_v52, %v3462_v59  ;;  %v3735_v52 = vld [vmem:[%s4375_s1 + $0x4c] sm:$0xf]  ;;  %v3158_v59 = vld [vmem:[%s4375_s1 + $0x58] sm:$0xf0]  ;;  %v3848_v18 = vld [vmem:[#allocation5 + $0x1d4] sm:$0xf] }
 0x119   : > { %v1325_v46 = vpop.f32.mrf.mxu3  ;;  %5742 = vst [vmem:[#allocation24_spill] sm:$0xff] %v4626_v22  ;;  %1294 = vmatmul.bf16.gmra.mxu1 %v4626_v22 }
 0x11a   : > { %v4617_v61 = vadd.f32 %v1325_v46, %v1237_v35  ;;  %v4635_v46 = vor.u32 %v3731_v19, %v3142_v32  ;;  %1616 = vmatpush.bf16.msrb.mxu1 %v3465_v21  ;;  %v3236_v19 = vld [vmem:[%s4375_s1 + $0xe8] sm:$0xf]  ;;  %v3757_v32 = vld [vmem:[%s4375_s1 + $0xf4] sm:$0xf0] }
 0x11b   : > { %v4621_v12 = vpop.f32.mrf.mxu0  ;;  %v4647_v38 = vor.u32 %v3757_v32, %v3236_v19  ;;  %v3836_v32 = vld [vmem:[#allocation5 + $0x174] sm:$0xf] }
 0x11c   : > { %5743 = vst [vmem:[#allocation25_spill] sm:$0xff] %v4635_v46 }
 0x11d   : > { %5744 = vst [vmem:[#allocation26_spill] sm:$0xff] %v4647_v38  ;;  %1388 = vmatmul.bf16.gmra.mxu2 %v4647_v38  ;;  %v3174_v38 = vld [vmem:[%s4375_s1 + $0x78] sm:$0xf0] }
 0x121   : > { %v1327_v34 = vpop.f32.mrf.mxu3 }
 0x122   : > { %v4633_v35 = vadd.f32 %v1327_v34, %v1239_v49 }
 0x123   : > { %v4637_v47 = vpop.f32.mrf.mxu0 }
 0x126   : > { %1447 = vmatmul.bf16.gmra.mxu3 %v4635_v46  ;;  %1536 = vmatmul.bf16.gmra.mxu0 %v4399_v53  ;;  %v3754_v53 = vld [vmem:[%s4375_s1 + $0xe4] sm:$0xf]  ;;  %v3558_v46 = vld [vmem:[#allocation5 + $0x178] sm:$0xf0] }
 0x127   : > { %v4654_v40 = vor.u32 %v3754_v53, %v3230_v26  ;;  %v3561_v26 = vor.u32 %v3836_v32, %v3558_v46  ;;  %v3606_v53 = vld [vmem:[#allocation5 + $0x1d8] sm:$0xf0]  ;;  %v1177_v46 = vadd.f32 %v4493_v43, %v4609_v17  ;;  %v1354_v43 = vpop.f32.mrf.mxu2 }
 0x128   : > { %v3609_v3 = vor.u32 %v3848_v18, %v3606_v53  ;;  %v3246_v18 = vld [vmem:[%s4375_s1 + $0x110] sm:$0xf0]  ;;  %v1265_v53 = vpop.f32.mrf.mxu1 }
 0x129   : > { %v1330_v49 = vpop.f32.mrf.mxu3  ;;  %5745 = vst [vmem:[#allocation27_spill] sm:$0xff] %v4654_v40  ;;  %1299 = vmatmul.bf16.gmra.mxu1 %v4654_v40  ;;  %1701 = vmatpush.bf16.msrb.mxu2 %v3561_v26  ;;  %v3758_v26 = vld [vmem:[%s4375_s1 + $0x104] sm:$0xf]  ;;  %v1266_v2 = vadd.f32 %v1265_v53, %v1177_v46  ;;  %v3739_v40 = vld [vmem:[%s4375_s1 + $0x6c] sm:$0xf]  ;;  %v1182_v53 = vadd.f32 %v4521_v28, %v4609_v17 }
 0x12a   : > { %v4645_v34 = vadd.f32 %v1330_v49, %v1242_v41  ;;  %v4663_v49 = vor.u32 %v3735_v52, %v3158_v59  ;;  %1792 = vmatpush.bf16.msra.mxu3 %v3609_v3  ;;  %v3252_v59 = vld [vmem:[%s4375_s1 + $0x108] sm:$0xf]  ;;  %v4684_v3 = vor.u32 %v3758_v26, %v3246_v18 }
 0x12b   : > { %v4649_v27 = vpop.f32.mrf.mxu0 }
 0x12c   : > { %5746 = vst [vmem:[#allocation28_spill] sm:$0xff] %v4663_v49 }
 0x12d   : > { %5748 = vst [vmem:[#allocation30_spill] sm:$0xff] %v4684_v3 }
 0x130   : > { %v1267_v18 = vpop.f32.mrf.mxu1 }
 0x131   : > { %v1332_v21 = vpop.f32.mrf.mxu3 }
 0x132   : > { %v4661_v41 = vadd.f32 %v1332_v21, %v1244_v45  ;;  %v1247_v45 = vadd.f32 %v4553_v44, %v4609_v17  ;;  %v3761_v21 = vld [vmem:[%s4375_s1 + $0x114] sm:$0xf0]  ;;  %v3810_v44 = vld [vmem:[#allocation5 + $0xa4] sm:$0xf] }
 0x133   : > { %v4665_v19 = vpop.f32.mrf.mxu0  ;;  %v3457_v63 = vor.u32 %v3810_v44, %v3454_v14  ;;  %v4697_v14 = vor.u32 %v3739_v40, %v3174_v38  ;;  %v3268_v38 = vld [vmem:[%s4375_s1 + $0x128] sm:$0xf]  ;;  %v3765_v40 = vld [vmem:[%s4375_s1 + $0x134] sm:$0xf0] }
 0x135   : > { %1617 = vmatpush.bf16.msrb.mxu1 %v3457_v63  ;;  %5749 = vst [vmem:[#allocation31_spill] sm:$0xff] %v4697_v14  ;;  %v1252_v63 = vadd.f32 %v4581_v16, %v4609_v17  ;;  %v3550_v16 = vld [vmem:[#allocation5 + $0x168] sm:$0xf0] }
 0x136   : > { %1452 = vmatmul.bf16.gmra.mxu3 %v4663_v49  ;;  %1541 = vmatmul.bf16.gmra.mxu0 %v4409_v1  ;;  %v4677_v1 = vor.u32 %v3761_v21, %v3252_v59  ;;  %v1179_v21 = vadd.f32 %v4503_v58, %v4609_v17 }
 0x138   : > { %5747 = vst [vmem:[#allocation29_spill] sm:$0xff] %v4677_v1  ;;  %1393 = vmatmul.bf16.gmra.mxu2 %v4677_v1  ;;  %v3743_v1 = vld [vmem:[%s4375_s1 + $0x8c] sm:$0xf] }
 0x139   : > { %v1335_v52 = vpop.f32.mrf.mxu3  ;;  %1304 = vmatmul.bf16.gmra.mxu1 %v4684_v3 }
 0x13a   : > { %v4675_v32 = vadd.f32 %v1335_v52, %v1247_v45  ;;  %v1249_v45 = vadd.f32 %v4571_v6, %v4609_v17  ;;  %v4690_v52 = vadd.f32 %v1354_v43, %v1266_v2  ;;  %v1268_v2 = vadd.f32 %v1267_v18, %v1179_v21  ;;  %v1356_v6 = vpop.f32.mrf.mxu2  ;;  %v3762_v21 = vld [vmem:[%s4375_s1 + $0x124] sm:$0xf] }
 0x13b   : > { %v4679_v49 = vpop.f32.mrf.mxu0 }
 0x13c   : > { %v4705_v44 = vadd.f32 %v1356_v6, %v1268_v2  ;;  %v1270_v2 = vpop.f32.mrf.mxu1  ;;  %v3262_v6 = vld [vmem:[%s4375_s1 + $0x130] sm:$0xf0] }
 0x13d   : > { %v4720_v3 = vor.u32 %v3762_v21, %v3262_v6 }
 0x13f   : > { %5751 = vst [vmem:[#allocation33_spill] sm:$0xff] %v4720_v3 }
 0x141   : > { %v1337_v59 = vpop.f32.mrf.mxu3 }
 0x142   : > { %v4695_v26 = vadd.f32 %v1337_v59, %v1249_v45  ;;  %v4713_v45 = vor.u32 %v3765_v40, %v3268_v38  ;;  %v3834_v59 = vld [vmem:[#allocation5 + $0x164] sm:$0xf]  ;;  %v1359_v28 = vpop.f32.mrf.mxu2  ;;  %v1184_v40 = vadd.f32 %v4531_v55, %v4609_v17 }
 0x143   : > { %v4699_v46 = vpop.f32.mrf.mxu0  ;;  %v3553_v18 = vor.u32 %v3834_v59, %v3550_v16 }
 0x144   : > { %5750 = vst [vmem:[#allocation32_spill] sm:$0xff] %v4713_v45  ;;  %v1272_v21 = vpop.f32.mrf.mxu1 }
 0x145   : > { %1702 = vmatpush.bf16.msrb.mxu2 %v3553_v18  ;;  %v3598_v18 = vld [vmem:[#allocation5 + $0x1c8] sm:$0xf0] }
 0x146   : > { %1457 = vmatmul.bf16.gmra.mxu3 %v4697_v14  ;;  %1546 = vmatmul.bf16.gmra.mxu0 %v4419_v13  ;;  %v1271_v14 = vadd.f32 %v1270_v2, %v1182_v53  ;;  %v4733_v53 = vor.u32 %v3743_v1, %v3190_v54  ;;  %v3808_v2 = vld [vmem:[#allocation5 + $0x94] sm:$0xf] }
 0x148   : > { %1398 = vmatmul.bf16.gmra.mxu2 %v4713_v45  ;;  %5752 = vst [vmem:[#allocation34_spill] sm:$0xff] %v4733_v53 }
 0x149   : > { %v1340_v58 = vpop.f32.mrf.mxu3  ;;  %1309 = vmatmul.bf16.gmra.mxu1 %v4720_v3  ;;  %v3206_v3 = vld [vmem:[%s4375_s1 + $0xb8] sm:$0xf0] }
 0x14a   : > { %v4711_v43 = vadd.f32 %v1340_v58, %v1252_v63  ;;  %v1254_v63 = vadd.f32 %v4602_v0, %v4609_v17  ;;  %v4726_v58 = vadd.f32 %v1359_v28, %v1271_v14  ;;  %v1273_v0 = vadd.f32 %v1272_v21, %v1184_v40  ;;  %v3846_v14 = vld [vmem:[#allocation5 + $0x1c4] sm:$0xf]  ;;  %v1361_v55 = vpop.f32.mrf.mxu2  ;;  %v3446_v28 = vld [vmem:[#allocation5 + $0x98] sm:$0xf0] }
 0x14b   : > { %v4715_v13 = vpop.f32.mrf.mxu0  ;;  %v3601_v6 = vor.u32 %v3846_v14, %v3598_v18  ;;  %v3449_v1 = vor.u32 %v3808_v2, %v3446_v28  ;;  %v3278_v18 = vld [vmem:[%s4375_s1 + $0x150] sm:$0xf0]  ;;  %v3747_v28 = vld [vmem:[%s4375_s1 + $0xac] sm:$0xf] }
 0x14c   : > { %v4739_v54 = vadd.f32 %v1361_v55, %v1273_v0  ;;  %v3766_v0 = vld [vmem:[%s4375_s1 + $0x144] sm:$0xf]  ;;  %v1275_v2 = vpop.f32.mrf.mxu1 }
 0x14d   : > { %1793 = vmatpush.bf16.msra.mxu3 %v3601_v6  ;;  %1618 = vmatpush.bf16.msrb.mxu1 %v3449_v1  ;;  %v4755_v55 = vor.u32 %v3766_v0, %v3278_v18  ;;  %v3542_v0 = vld [vmem:[#allocation5 + $0x158] sm:$0xf0] }
 0x14f   : > { %5755 = vst [vmem:[#allocation37_spill] sm:$0xff] %v4755_v55 }
 0x151   : > { %v1342_v38 = vpop.f32.mrf.mxu3 }
 0x152   : > { %v4731_v59 = vadd.f32 %v1342_v38, %v1254_v63  ;;  %v3284_v38 = vld [vmem:[%s4375_s1 + $0x148] sm:$0xf]  ;;  %v1364_v45 = vpop.f32.mrf.mxu2 }
 0x153   : > { %v4735_v16 = vpop.f32.mrf.mxu0 }
 0x156   : > { %1462 = vmatmul.bf16.gmra.mxu3 %v4733_v53  ;;  %1551 = vmatmul.bf16.gmra.mxu0 %v4429_v25  ;;  %v3769_v53 = vld [vmem:[%s4375_s1 + $0x154] sm:$0xf0]  ;;  %v1187_v25 = vadd.f32 %v4549_v29, %v4609_v17 }
 0x157   : > { %v4748_v21 = vor.u32 %v3769_v53, %v3284_v38  ;;  %v1189_v53 = vadd.f32 %v4559_v56, %v4609_v17  ;;  %v3832_v38 = vld [vmem:[#allocation5 + $0x154] sm:$0xf]  ;;  %v3830_v56 = vld [vmem:[#allocation5 + $0x144] sm:$0xf] }
 0x158   : > { %v1276_v6 = vadd.f32 %v1275_v2, %v1187_v25  ;;  %v3545_v18 = vor.u32 %v3832_v38, %v3542_v0  ;;  %v1192_v38 = vadd.f32 %v4577_v15, %v4609_v17 }
 0x159   : > { %v1414_v63 = vpop.f32.mrf.mxu3  ;;  %5754 = vst [vmem:[#allocation36_spill] sm:$0xff] %v4748_v21  ;;  %1403 = vmatmul.bf16.gmra.mxu2 %v4748_v21  ;;  %1314 = vmatmul.bf16.gmra.mxu1 %v4755_v55  ;;  %v3222_v55 = vld [vmem:[%s4375_s1 + $0xd8] sm:$0xf0] }
 0x15a   : > { %v4746_v40 = vadd.f32 %v1414_v63, %v4617_v61  ;;  %v4759_v29 = vadd.f32 %v1364_v45, %v1276_v6  ;;  %v4767_v63 = vor.u32 %v3747_v28, %v3206_v3  ;;  %1703 = vmatpush.bf16.msrb.mxu2 %v3545_v18  ;;  %v1277_v45 = vpop.f32.mrf.mxu1  ;;  %v3534_v6 = vld [vmem:[#allocation5 + $0x148] sm:$0xf0]  ;;  %v3526_v18 = vld [vmem:[#allocation5 + $0x138] sm:$0xf0] }
 0x15b   : > { %v4750_v14 = vpop.f32.mrf.mxu0  ;;  %v1278_v2 = vadd.f32 %v1277_v45, %v1189_v53  ;;  %v3537_v3 = vor.u32 %v3830_v56, %v3534_v6  ;;  %v3828_v53 = vld [vmem:[#allocation5 + $0x134] sm:$0xf]  ;;  %v3770_v56 = vld [vmem:[%s4375_s1 + $0x164] sm:$0xf] }
 0x15c   : > { %5753 = vst [vmem:[#allocation35_spill] sm:$0xff] %v4746_v40  ;;  %v3773_v40 = vld [vmem:[%s4375_s1 + $0x174] sm:$0xf0]  ;;  %v3294_v6 = vld [vmem:[%s4375_s1 + $0x170] sm:$0xf0] }
 0x15d   : > { %5757 = vst [vmem:[#allocation39_spill] sm:$0xff] %v4767_v63  ;;  %v4789_v15 = vor.u32 %v3770_v56, %v3294_v6  ;;  %v3824_v56 = vld [vmem:[#allocation5 + $0x114] sm:$0xf]  ;;  %v3510_v6 = vld [vmem:[#allocation5 + $0x118] sm:$0xf0] }
 0x15e   : > { %1704 = vmatpush.bf16.msrb.mxu2 %v3537_v3 }
 0x161   : > { %v1416_v61 = vpop.f32.mrf.mxu3 }
 0x162   : > { %v4765_v1 = vadd.f32 %v1416_v61, %v4633_v35  ;;  %v1366_v35 = vpop.f32.mrf.mxu2  ;;  %v1280_v3 = vpop.f32.mrf.mxu1 }
 0x163   : > { %v4769_v25 = vpop.f32.mrf.mxu0  ;;  %v4773_v28 = vadd.f32 %v1366_v35, %v1278_v2  ;;  %v3529_v2 = vor.u32 %v3828_v53, %v3526_v18  ;;  %v3806_v35 = vld [vmem:[#allocation5 + $0x84] sm:$0xf]  ;;  %v1194_v18 = vadd.f32 %v4587_v31, %v4609_v17 }
 0x164   : > { %5756 = vst [vmem:[#allocation38_spill] sm:$0xff] %v4765_v1  ;;  %v3300_v1 = vld [vmem:[%s4375_s1 + $0x168] sm:$0xf]  ;;  %v3822_v31 = vld [vmem:[#allocation5 + $0x104] sm:$0xf] }
 0x165   : > { %1705 = vmatpush.bf16.msrb.mxu2 %v3529_v2 }
 0x166   : > { %1467 = vmatmul.bf16.gmra.mxu3 %v4767_v63  ;;  %1556 = vmatmul.bf16.gmra.mxu0 %v4439_v37  ;;  %v4782_v37 = vor.u32 %v3773_v40, %v3300_v1  ;;  %v3826_v1 = vld [vmem:[#allocation5 + $0x124] sm:$0xf]  ;;  %v3751_v63 = vld [vmem:[%s4375_s1 + $0xcc] sm:$0xf] }
 0x169   : > { %v1419_v61 = vpop.f32.mrf.mxu3  ;;  %1408 = vmatmul.bf16.gmra.mxu2 %v4782_v37  ;;  %1319 = vmatmul.bf16.gmra.mxu1 %v4789_v15 }
 0x16a   : > { %v4780_v0 = vadd.f32 %v1419_v61, %v4645_v34  ;;  %v3438_v34 = vld [vmem:[#allocation5 + $0x88] sm:$0xf0]  ;;  %v1281_v61 = vadd.f32 %v1280_v3, %v1192_v38  ;;  %v1369_v21 = vpop.f32.mrf.mxu2  ;;  %v4801_v38 = vor.u32 %v3751_v63, %v3222_v55  ;;  %v3844_v3 = vld [vmem:[#allocation5 + $0x1b4] sm:$0xf] }
 0x16b   : > { %v4784_v45 = vpop.f32.mrf.mxu0  ;;  %v3441_v40 = vor.u32 %v3806_v35, %v3438_v34  ;;  %v3590_v34 = vld [vmem:[#allocation5 + $0x1b8] sm:$0xf0]  ;;  %v3502_v63 = vld [vmem:[#allocation5 + $0x108] sm:$0xf0] }
 0x16c   : > { %5758 = vst [vmem:[#allocation40_spill] sm:$0xff] %v4780_v0  ;;  %v3518_v0 = vld [vmem:[#allocation5 + $0x128] sm:$0xf0]  ;;  %v4793_v10 = vadd.f32 %v1369_v21, %v1281_v61  ;;  %v1282_v21 = vpop.f32.mrf.mxu1 }
 0x16d   : > { %v3521_v22 = vor.u32 %v3826_v1, %v3518_v0  ;;  %1619 = vmatpush.bf16.msrb.mxu1 %v3441_v40  ;;  %v3513_v0 = vor.u32 %v3824_v56, %v3510_v6  ;;  %v3505_v40 = vor.u32 %v3822_v31, %v3502_v63  ;;  %v3869_v63 = vld [vmem:[#allocation7 + $0x78] sm:$0xff] }
 0x16f   : > { %1706 = vmatpush.bf16.msrb.mxu2 %v3521_v22  ;;  %v1283_v22 = vadd.f32 %v1282_v21, %v1194_v18  ;;  %v3238_v21 = vld [vmem:[%s4375_s1 + $0xf8] sm:$0xf0] }
 0x171   : > { %v1421_v53 = vpop.f32.mrf.mxu3  ;;  %2196 = vmatpush.bf16.msra.mxu1 %v3869_v63  ;;  %v3582_v63 = vld [vmem:[#allocation5 + $0x1a8] sm:$0xf0] }
 0x172   : > { %v4799_v2 = vadd.f32 %v1421_v53, %v4661_v41  ;;  %v3593_v41 = vor.u32 %v3844_v3, %v3590_v34  ;;  %v1371_v55 = vpop.f32.mrf.mxu2  ;;  %v1197_v53 = vadd.f32 %v4606_v4, %v4609_v17  ;;  %v1199_v4 = vadd.f32 %v4621_v12, %v4609_v17 }
 0x173   : > { %v4803_v35 = vpop.f32.mrf.mxu0  ;;  %1707 = vmatpush.bf16.msrb.mxu2 %v3513_v0  ;;  %v4807_v61 = vadd.f32 %v1371_v55, %v1283_v22  ;;  %v3755_v0 = vld [vmem:[%s4375_s1 + $0xec] sm:$0xf] }
 0x174   : > { %1794 = vmatpush.bf16.msra.mxu3 %v3593_v41  ;;  %v1285_v18 = vpop.f32.mrf.mxu1  ;;  %v4827_v31 = vor.u32 %v3755_v0, %v3238_v21  ;;  %v3759_v0 = vld [vmem:[%s4375_s1 + $0x10c] sm:$0xf]  ;;  %v3254_v21 = vld [vmem:[%s4375_s1 + $0x118] sm:$0xf0] }
 0x175   : > { %v1286_v6 = vadd.f32 %v1285_v18, %v1197_v53 }
 0x176   : > { %1472 = vmatmul.bf16.gmra.mxu3 %v4801_v38  ;;  %1561 = vmatmul.bf16.gmra.mxu0 %v4449_v51 }
 0x177   : > { %1708 = vmatpush.bf16.msrb.mxu2 %v3505_v40 }
 0x179   : > { %v1424_v1 = vpop.f32.mrf.mxu3  ;;  %1620 = vmatmul.bf16.vlgmr.msrb.gmra.mxu1 %v4463_v5  ;;  %v3861_v5 = vld [vmem:[#allocation7 + $0x38] sm:$0xff] }
 0x17a   : > { %v4812_v56 = vadd.f32 %v1424_v1, %v4675_v32  ;;  %1709 = vmatmul.bf16.vlgmr.msrb.gmra.mxu2 %v4457_v60  ;;  %v1374_v22 = vpop.f32.mrf.mxu2  ;;  %2107 = vmatpush.bf16.msra.mxu0 %v3861_v5  ;;  %v1202_v1 = vadd.f32 %v4637_v47, %v4609_v17  ;;  %v1204_v47 = vadd.f32 %v4649_v27, %v4609_v17 }
 0x17b   : > { %v4814_v51 = vpop.f32.mrf.mxu0  ;;  %v4819_v3 = vadd.f32 %v1374_v22, %v1286_v6 }
 0x17c   : > { %v1287_v60 = vpop.f32.mrf.mxu1 }
 0x17d   : > { %v1288_v55 = vadd.f32 %v1287_v60, %v1199_v4  ;;  %v4853_v60 = vor.u32 %v3759_v0, %v3254_v21  ;;  %v3763_v21 = vld [vmem:[%s4375_s1 + $0x12c] sm:$0xf] }
 0x181   : > { %v1426_v34 = vpop.f32.mrf.mxu3 }
 0x182   : > { %v4825_v32 = vadd.f32 %v1426_v34, %v4695_v26  ;;  %v1376_v40 = vpop.f32.mrf.mxu2 }
 0x183   : > { %v4829_v41 = vpop.f32.mrf.mxu0  ;;  %v4833_v12 = vadd.f32 %v1376_v40, %v1288_v55 }
 0x186   : > { %1477 = vmatmul.bf16.gmra.mxu3 %v4827_v31  ;;  %1566 = vmatmul.bf16.gmra.mxu0 %v4469_v9  ;;  %v1290_v9 = vpop.f32.mrf.mxu1 }
 0x187   : > { %v1291_v6 = vadd.f32 %v1290_v9, %v1202_v1  ;;  %v1207_v1 = vadd.f32 %v4665_v19, %v4609_v17 }
 0x189   : > { %v1429_v26 = vpop.f32.mrf.mxu3  ;;  %1625 = vmatmul.bf16.gmra.mxu1 %v4483_v33  ;;  %v3842_v33 = vld [vmem:[#allocation5 + $0x1a4] sm:$0xf] }
 0x18a   : > { %v4838_v53 = vadd.f32 %v1429_v26, %v4711_v43  ;;  %1714 = vmatmul.bf16.gmra.mxu2 %v4477_v24  ;;  %v1379_v22 = vpop.f32.mrf.mxu2  ;;  %v3585_v40 = vor.u32 %v3842_v33, %v3582_v63 }
 0x18b   : > { %v4840_v18 = vpop.f32.mrf.mxu0  ;;  %v4845_v34 = vadd.f32 %v1379_v22, %v1291_v6  ;;  %v3270_v22 = vld [vmem:[%s4375_s1 + $0x138] sm:$0xf0] }
 0x18c   : > { %1795 = vmatpush.bf16.msra.mxu3 %v3585_v40 }
 0x18e   : > { %v1292_v24 = vpop.f32.mrf.mxu1 }
 0x18f   : > { %v1293_v5 = vadd.f32 %v1292_v24, %v1204_v47 }
 0x191   : > { %v1431_v4 = vpop.f32.mrf.mxu3 }
 0x192   : > { %v4851_v43 = vadd.f32 %v1431_v4, %v4731_v59  ;;  %v1381_v26 = vpop.f32.mrf.mxu2 }
 0x193   : > { %v4855_v55 = vpop.f32.mrf.mxu0  ;;  %v4859_v27 = vadd.f32 %v1381_v26, %v1293_v5  ;;  %v1209_v5 = vadd.f32 %v4679_v49, %v4609_v17  ;;  %v3868_v49 = vld [vmem:[#allocation7 + $0x70] sm:$0xff] }
 0x194   : > { %2197 = vmatpush.bf16.msra.mxu1 %v3868_v49 }
 0x196   : > { %1482 = vmatmul.bf16.gmra.mxu3 %v4853_v60  ;;  %1571 = vmatmul.bf16.gmra.mxu0 %v4489_v39  ;;  %v1295_v39 = vpop.f32.mrf.mxu1 }
 0x197   : > { %v1296_v0 = vadd.f32 %v1295_v39, %v1207_v1 }
 0x199   : > { %v1443_v59 = vpop.f32.mrf.mxu3  ;;  %1630 = vmatmul.bf16.gmra.mxu1 %v4509_v8 }
 0x19a   : > { %v1444_v9 = vadd.f32 %v1443_v59, %v4690_v52  ;;  %1719 = vmatmul.bf16.gmra.mxu2 %v4501_v57  ;;  %v1384_v4 = vpop.f32.mrf.mxu2  ;;  %v4875_v52 = vor.u32 %v3763_v21, %v3270_v22  ;;  %v3860_v59 = vld [vmem:[#allocation7 + $0x30] sm:$0xff] }
 0x19b   : > { %v4864_v6 = vpop.f32.mrf.mxu0  ;;  %v4869_v47 = vadd.f32 %v1384_v4, %v1296_v0  ;;  %2108 = vmatpush.bf16.msra.mxu0 %v3860_v59  ;;  %v3767_v4 = vld [vmem:[%s4375_s1 + $0x14c] sm:$0xf] }
 0x19c   : > { %v1879_v57 = vmax.f32 %v1444_v9, 0.0  ;;  %v1212_v9 = vadd.f32 %v4699_v46, %v4609_v17 }
 0x19e   : > { %v1297_v40 = vpop.f32.mrf.mxu1 }
 0x19f   : > { %v1298_v8 = vadd.f32 %v1297_v40, %v1209_v5 }
 0x1a1   : > { %v1445_v24 = vpop.f32.mrf.mxu3 }
 0x1a2   : > { %v1446_v19 = vadd.f32 %v1445_v24, %v4705_v44  ;;  %v1386_v1 = vpop.f32.mrf.mxu2  ;;  %v3286_v24 = vld [vmem:[%s4375_s1 + $0x158] sm:$0xf0] }
 0x1a3   : > { %v4877_v33 = vpop.f32.mrf.mxu0  ;;  %v4883_v44 = vadd.f32 %v1386_v1, %v1298_v8  ;;  %v3574_v1 = vld [vmem:[#allocation5 + $0x198] sm:$0xf0] }
 0x1a4   : > { %v1881_v63 = vmax.f32 %v1446_v19, 0.0 }
 0x1a6   : > { %v4879_v26 = vpack.c.bf16 %v1881_v63, %v1879_v57  ;;  %1487 = vmatmul.bf16.gmra.mxu3 %v4875_v52  ;;  %1576 = vmatmul.bf16.gmra.mxu0 %v4517_v23  ;;  %v1300_v23 = vpop.f32.mrf.mxu1  ;;  %v1214_v63 = vadd.f32 %v4715_v13, %v4609_v17 }
 0x1a7   : > { %v1301_v22 = vadd.f32 %v1300_v23, %v1212_v9 }
 0x1a9   : > { %v1448_v39 = vpop.f32.mrf.mxu3  ;;  %1635 = vmatmul.bf16.gmra.mxu1 %v4537_v7  ;;  %v3840_v7 = vld [vmem:[#allocation5 + $0x194] sm:$0xf] }
 0x1aa   : > { %v1449_v0 = vadd.f32 %v1448_v39, %v4726_v58  ;;  %1724 = vmatmul.bf16.gmra.mxu2 %v4529_v50  ;;  %v1389_v5 = vpop.f32.mrf.mxu2  ;;  %v4899_v58 = vor.u32 %v3767_v4, %v3286_v24  ;;  %v3577_v13 = vor.u32 %v3840_v7, %v3574_v1 }
 0x1ab   : > { %v4888_v21 = vpop.f32.mrf.mxu0  ;;  %v4893_v19 = vadd.f32 %v1389_v5, %v1301_v22  ;;  %v3771_v5 = vld [vmem:[%s4375_s1 + $0x16c] sm:$0xf] }
 0x1ac   : > { %v1883_v50 = vmax.f32 %v1449_v0, 0.0  ;;  %1796 = vmatpush.bf16.msra.mxu3 %v3577_v13  ;;  %v1217_v0 = vadd.f32 %v4735_v16, %v4609_v17  ;;  %v3867_v13 = vld [vmem:[#allocation7 + $0x68] sm:$0xff] }
 0x1ad   : > { %2198 = vmatpush.bf16.msra.mxu1 %v3867_v13 }
 0x1ae   : > { %v1302_v59 = vpop.f32.mrf.mxu1 }
 0x1af   : > { %v1303_v49 = vadd.f32 %v1302_v59, %v1214_v63 }
 0x1b1   : > { %v1450_v57 = vpop.f32.mrf.mxu3 }
 0x1b2   : > { %v1451_v46 = vadd.f32 %v1450_v57, %v4739_v54  ;;  %v1391_v54 = vpop.f32.mrf.mxu2  ;;  %v3302_v57 = vld [vmem:[%s4375_s1 + $0x178] sm:$0xf0] }
 0x1b3   : > { %v4901_v40 = vpop.f32.mrf.mxu0  ;;  %v4907_v9 = vadd.f32 %v1391_v54, %v1303_v49 }
 0x1b4   : > { %v1885_v8 = vmax.f32 %v1451_v46, 0.0 }
 0x1b6   : > { %1492 = vmatmul.bf16.gmra.mxu3 %v4899_v58  ;;  %1581 = vmatmul.bf16.gmra.mxu0 %v4545_v20  ;;  %v4905_v39 = vpack.c.bf16 %v1885_v8, %v1883_v50  ;;  %v1305_v20 = vpop.f32.mrf.mxu1  ;;  %v1219_v8 = vadd.f32 %v4750_v14, %v4609_v17 }
 0x1b7   : > { %v1306_v24 = vadd.f32 %v1305_v20, %v1217_v0  ;;  %v1222_v0 = vadd.f32 %v4769_v25, %v4609_v17 }
 0x1b9   : > { %v1453_v23 = vpop.f32.mrf.mxu3  ;;  %1640 = vmatmul.bf16.gmra.mxu1 %v4564_v62  ;;  %v3859_v62 = vld [vmem:[#allocation7 + $0x28] sm:$0xff] }
 0x1ba   : > { %v1454_v22 = vadd.f32 %v1453_v23, %v4759_v29  ;;  %1729 = vmatmul.bf16.gmra.mxu2 %v4557_v48  ;;  %v4923_v29 = vor.u32 %v3771_v5, %v3302_v57  ;;  %2109 = vmatpush.bf16.msra.mxu0 %v3859_v62  ;;  %v3775_v5 = vld [vmem:[%s4375_s1 + $0x18c] sm:$0xf]  ;;  %v3318_v57 = vld [vmem:[%s4375_s1 + $0x198] sm:$0xf0] }
 0x1bb   : > { %v4912_v4 = vpop.f32.mrf.mxu0  ;;  %v1394_v63 = vpop.f32.mrf.mxu2  ;;  %v3566_v62 = vld [vmem:[#allocation5 + $0x188] sm:$0xf0] }
 0x1bc   : > { %v4917_v46 = vadd.f32 %v1394_v63, %v1306_v24  ;;  %v1887_v48 = vmax.f32 %v1454_v22, 0.0 }
 0x1be   : > { %v1307_v7 = vpop.f32.mrf.mxu1 }
 0x1bf   : > { %v1308_v1 = vadd.f32 %v1307_v7, %v1219_v8 }
 0x1c1   : > { %v1455_v50 = vpop.f32.mrf.mxu3 }
 0x1c2   : > { %v1456_v16 = vadd.f32 %v1455_v50, %v4773_v28 }
 0x1c3   : > { %v4925_v59 = vpop.f32.mrf.mxu0  ;;  %v1396_v14 = vpop.f32.mrf.mxu2 }
 0x1c4   : > { %v1889_v49 = vmax.f32 %v1456_v16, 0.0  ;;  %v4931_v28 = vadd.f32 %v1396_v14, %v1308_v1  ;;  %v1224_v16 = vadd.f32 %v4784_v45, %v4609_v17 }
 0x1c6   : > { %1497 = vmatmul.bf16.gmra.mxu3 %v4923_v29  ;;  %1586 = vmatmul.bf16.gmra.mxu0 %v4573_v11  ;;  %v4929_v54 = vpack.c.bf16 %v1889_v49, %v1887_v48  ;;  %v1310_v11 = vpop.f32.mrf.mxu1 }
 0x1c7   : > { %v1311_v24 = vadd.f32 %v1310_v11, %v1222_v0  ;;  %v1227_v0 = vadd.f32 %v4803_v35, %v4609_v17  ;;  %v1229_v35 = vadd.f32 %v4814_v51, %v4609_v17 }
 0x1c9   : > { %v1458_v23 = vpop.f32.mrf.mxu3  ;;  %1645 = vmatmul.bf16.gmra.mxu1 %v4592_v36  ;;  %v3838_v36 = vld [vmem:[#allocation5 + $0x184] sm:$0xf] }
 0x1ca   : > { %v1459_v22 = vadd.f32 %v1458_v23, %v4793_v10  ;;  %1734 = vmatmul.bf16.gmra.mxu2 %v4585_v30  ;;  %v4947_v10 = vor.u32 %v3775_v5, %v3318_v57  ;;  %v3569_v45 = vor.u32 %v3838_v36, %v3566_v62  ;;  %v3779_v57 = vld [vmem:[%s4375_s1 + $0x1ac] sm:$0xf] }
 0x1cb   : > { %v4936_v20 = vpop.f32.mrf.mxu0  ;;  %v1399_v63 = vpop.f32.mrf.mxu2 }
 0x1cc   : > { %v4941_v50 = vadd.f32 %v1399_v63, %v1311_v24  ;;  %v1891_v30 = vmax.f32 %v1459_v22, 0.0  ;;  %1797 = vmatpush.bf16.msra.mxu3 %v3569_v45  ;;  %v3334_v63 = vld [vmem:[%s4375_s1 + $0x1b8] sm:$0xf0] }
 0x1ce   : > { %v1312_v7 = vpop.f32.mrf.mxu1 }
 0x1cf   : > { %v1313_v1 = vadd.f32 %v1312_v7, %v1224_v16  ;;  %v4971_v7 = vor.u32 %v3779_v57, %v3334_v63  ;;  %v1232_v57 = vadd.f32 %v4829_v41, %v4609_v17  ;;  %v3854_v41 = vld [vmem:[#allocation7] sm:$0xff] }
 0x1d1   : > { %v1460_v8 = vpop.f32.mrf.mxu3 }
 0x1d2   : > { %v1461_v25 = vadd.f32 %v1460_v8, %v4807_v61 }
 0x1d3   : > { %v4949_v48 = vpop.f32.mrf.mxu0  ;;  %v1401_v61 = vpop.f32.mrf.mxu2 }
 0x1d4   : > { %v1893_v49 = vmax.f32 %v1461_v25, 0.0  ;;  %v4955_v14 = vadd.f32 %v1401_v61, %v1313_v1  ;;  %v5760_v25 = vld [vmem:[#allocation24_spill] sm:$0xff]  ;;  %v3857_v61 = vld [vmem:[#allocation7 + $0x18] sm:$0xff] }
 0x1d6   : > { %1502 = vmatmul.bf16.gmra.mxu3 %v4947_v10  ;;  %1591 = vmatmul.bf16.gmra.mxu0 %v4391_v42  ;;  %v4953_v13 = vpack.c.bf16 %v1893_v49, %v1891_v30  ;;  %v5759_v42 = vld [vmem:[#allocation23_spill] sm:$0xff]  ;;  %v1315_v24 = vpop.f32.mrf.mxu1  ;;  %v3858_v49 = vld [vmem:[#allocation7 + $0x20] sm:$0xff] }
 0x1d7   : > { %v1316_v5 = vadd.f32 %v1315_v24, %v1227_v0  ;;  %2110 = vmatpush.bf16.msra.mxu0 %v3858_v49 }
 0x1d9   : > { %v1463_v23 = vpop.f32.mrf.mxu3  ;;  %1650 = vmatmul.bf16.gmra.mxu1 %v5760_v25  ;;  %v5762_v25 = vld [vmem:[#allocation26_spill] sm:$0xff] }
 0x1da   : > { %v1464_v22 = vadd.f32 %v1463_v23, %v4819_v3  ;;  %1739 = vmatmul.bf16.gmra.mxu2 %v5759_v42  ;;  %v5761_v23 = vld [vmem:[#allocation10_spill] sm:$0xff] }
 0x1db   : > { %v4960_v11 = vpop.f32.mrf.mxu0  ;;  %v3866_v42 = vld [vmem:[#allocation7 + $0x60] sm:$0xff]  ;;  %2111 = vmatpush.bf16.msra.mxu0 %v3857_v61  ;;  %v5763_v61 = vld [vmem:[#allocation27_spill] sm:$0xff] }
 0x1dc   : > { %v1404_v8 = vpop.f32.mrf.mxu2  ;;  %v1895_v1 = vmax.f32 %v1464_v22, 0.0  ;;  %2199 = vmatpush.bf16.msra.mxu1 %v3866_v42 }
 0x1dd   : > { %v4965_v16 = vadd.f32 %v1404_v8, %v1316_v5  ;;  %v3856_v5 = vld [vmem:[#allocation7 + $0x10] sm:$0xff]  ;;  %v3855_v8 = vld [vmem:[#allocation7 + $0x8] sm:$0xff] }
 0x1de   : > { %v1317_v45 = vpop.f32.mrf.mxu1 }
 0x1df   : > { %v1318_v0 = vadd.f32 %v1317_v45, %v1229_v35  ;;  %2112 = vmatpush.bf16.msra.mxu0 %v3856_v5 }
 0x1e1   : > { %v1465_v30 = vpop.f32.mrf.mxu3 }
 0x1e2   : > { %v1466_v3 = vadd.f32 %v1465_v30, %v4833_v12 }
 0x1e3   : > { %v4973_v62 = vpop.f32.mrf.mxu0  ;;  %2113 = vmatpush.bf16.msra.mxu0 %v3855_v8 }
 0x1e4   : > { %v1897_v36 = vmax.f32 %v1466_v3, 0.0  ;;  %v1406_v51 = vpop.f32.mrf.mxu2  ;;  %v3783_v3 = vld [vmem:[%s4375_s1 + $0x1cc] sm:$0xf] }
 0x1e5   : > { %v4979_v12 = vadd.f32 %v1406_v51, %v1318_v0 }
 0x1e6   : > { %1507 = vmatmul.bf16.gmra.mxu3 %v4971_v7  ;;  %1596 = vmatmul.bf16.gmra.mxu0 %v5761_v23  ;;  %v4977_v24 = vpack.c.bf16 %v1897_v36, %v1895_v1  ;;  %v1320_v30 = vpop.f32.mrf.mxu1  ;;  %v3350_v1 = vld [vmem:[%s4375_s1 + $0x1d8] sm:$0xf0] }
 0x1e7   : > { %v1321_v35 = vadd.f32 %v1320_v30, %v1232_v57  ;;  %v4995_v42 = vor.u32 %v3783_v3, %v3350_v1  ;;  %2114 = vmatpush.bf16.msra.mxu0 %v3854_v41  ;;  %v5764_v57 = vld [vmem:[#allocation21_spill] sm:$0xff]  ;;  %v3787_v41 = vld [vmem:[%s4375_s1 + $0x1ec] sm:$0xf] }
 0x1e8   : > { %v4998_v8 = vperm.slane %v5764_v57, 1 }
 0x1e9   : > { %v1468_v22 = vpop.f32.mrf.mxu3  ;;  %1655 = vmatmul.bf16.gmra.mxu1 %v5763_v61 }
 0x1ea   : > { %v1469_v63 = vadd.f32 %v1468_v22, %v4845_v34  ;;  %1744 = vmatmul.bf16.gmra.mxu2 %v5762_v25  ;;  %v1234_v34 = vadd.f32 %v4840_v18, %v4609_v17  ;;  %v5765_v25 = vld [vmem:[#allocation11_spill] sm:$0xff]  ;;  %v1533_v3 = vadd.f32 %v4855_v55, %v4998_v8  ;;  %v1535_v57 = vadd.f32 %v4864_v6, %v4998_v8 }
 0x1eb   : > { %v4985_v49 = vpop.f32.mrf.mxu0 }
 0x1ec   : > { %v1409_v36 = vpop.f32.mrf.mxu2  ;;  %v1899_v51 = vmax.f32 %v1469_v63, 0.0 }
 0x1ed   : > { %v4989_v45 = vadd.f32 %v1409_v36, %v1321_v35  ;;  %v5766_v36 = vld [vmem:[#allocation29_spill] sm:$0xff] }
 0x1ee   : > { %v1322_v5 = vpop.f32.mrf.mxu1 }
 0x1ef   : > { %v1323_v30 = vadd.f32 %v1322_v5, %v1234_v34 }
 0x1f1   : > { %v1470_v23 = vpop.f32.mrf.mxu3 }
 0x1f2   : > { %v1471_v0 = vadd.f32 %v1470_v23, %v4859_v27 }
 0x1f3   : > { %v5004_v18 = vpop.f32.mrf.mxu0 }
 0x1f4   : > { %v1901_v22 = vmax.f32 %v1471_v0, 0.0  ;;  %v1411_v17 = vpop.f32.mrf.mxu2  ;;  %v3366_v0 = vld [vmem:[%s4375_s1 + $0x1f8] sm:$0xf0] }
 0x1f5   : > { %v5006_v27 = vadd.f32 %v1411_v17, %v1323_v30 }
 0x1f6   : > { %1512 = vmatmul.bf16.gmra.mxu3 %v4995_v42  ;;  %1601 = vmatmul.bf16.gmra.mxu0 %v5765_v25  ;;  %v5002_v35 = vpack.c.bf16 %v1901_v22, %v1899_v51  ;;  %v1621_v61 = vpop.f32.mrf.mxu1  ;;  %v5767_v51 = vld [vmem:[#allocation30_spill] sm:$0xff] }
 0x1f7   : > { %v1622_v23 = vadd.f32 %v1621_v61, %v1533_v3  ;;  %v5768_v3 = vld [vmem:[#allocation12_spill] sm:$0xff]  ;;  %v3865_v61 = vld [vmem:[#allocation7 + $0x58] sm:$0xff] }
 0x1f8   : > { %2200 = vmatpush.bf16.msra.mxu1 %v3865_v61 }
 0x1f9   : > { %v1473_v63 = vpop.f32.mrf.mxu3  ;;  %1660 = vmatmul.bf16.gmra.mxu1 %v5767_v51 }
 0x1fa   : > { %v1474_v1 = vadd.f32 %v1473_v63, %v4869_v47  ;;  %1749 = vmatmul.bf16.gmra.mxu2 %v5766_v36  ;;  %v5022_v47 = vor.u32 %v3787_v41, %v3366_v0  ;;  %v5769_v0 = vld [vmem:[#allocation32_spill] sm:$0xff] }
 0x1fb   : > { %v5019_v25 = vpop.f32.mrf.mxu0 }
 0x1fc   : > { %v1903_v30 = vmax.f32 %v1474_v1, 0.0 }
 0x1fd   : > { %v1710_v34 = vpop.f32.mrf.mxu2 }
 0x1fe   : > { %v5015_v5 = vadd.f32 %v1710_v34, %v1622_v23  ;;  %v1623_v63 = vpop.f32.mrf.mxu1 }
 0x1ff   : > { %v1624_v36 = vadd.f32 %v1623_v63, %v1535_v57  ;;  %v5770_v63 = vld [vmem:[#allocation33_spill] sm:$0xff] }
 0x201   : > { %v1475_v22 = vpop.f32.mrf.mxu3 }
 0x202   : > { %v1476_v55 = vadd.f32 %v1475_v22, %v4883_v44  ;;  %v1538_v44 = vadd.f32 %v4877_v33, %v4998_v8 }
 0x203   : > { %v5033_v41 = vpop.f32.mrf.mxu0 }
 0x204   : > { %v1905_v17 = vmax.f32 %v1476_v55, 0.0 }
 0x205   : > { %v1712_v34 = vpop.f32.mrf.mxu2 }
 0x206   : > { %1517 = vmatmul.bf16.gmra.mxu3 %v5022_v47  ;;  %1606 = vmatmul.bf16.gmra.mxu0 %v5768_v3  ;;  %v5026_v23 = vpack.c.bf16 %v1905_v17, %v1903_v30  ;;  %v5028_v51 = vadd.f32 %v1712_v34, %v1624_v36  ;;  %v1626_v22 = vpop.f32.mrf.mxu1  ;;  %v1540_v3 = vadd.f32 %v4888_v21, %v4998_v8 }
 0x207   : > { %v1627_v55 = vadd.f32 %v1626_v22, %v1538_v44  ;;  %v5771_v44 = vld [vmem:[#allocation22_spill] sm:$0xff] }
 0x209   : > { %v1478_v6 = vpop.f32.mrf.mxu3  ;;  %1665 = vmatmul.bf16.gmra.mxu1 %v5770_v63  ;;  %v5772_v63 = vld [vmem:[#allocation36_spill] sm:$0xff] }
 0x20a   : > { %v1479_v1 = vadd.f32 %v1478_v6, %v4893_v19  ;;  %1754 = vmatmul.bf16.gmra.mxu2 %v5769_v0  ;;  %v3877_v19 = vld [vmem:[%s5688_s5 + $0x38] sm:$0xff] }
 0x20b   : > { %v5045_v6 = vpop.f32.mrf.mxu0  ;;  %2401 = vmatpush.bf16.msra.mxu2 %v3877_v19  ;;  %v1545_v19 = vadd.f32 %v4912_v4, %v4998_v8  ;;  %v1548_v4 = vadd.f32 %v4925_v59, %v4998_v8 }
 0x20c   : > { %v1907_v33 = vmax.f32 %v1479_v1, 0.0  ;;  %v1543_v1 = vadd.f32 %v4901_v40, %v4998_v8 }
 0x20d   : > { %v1715_v57 = vpop.f32.mrf.mxu2 }
 0x20e   : > { %v5037_v17 = vadd.f32 %v1715_v57, %v1627_v55  ;;  %v1628_v34 = vpop.f32.mrf.mxu1 }
 0x20f   : > { %v1629_v0 = vadd.f32 %v1628_v34, %v1540_v3  ;;  %v5773_v3 = vld [vmem:[#allocation37_spill] sm:$0xff] }
 0x211   : > { %v1480_v30 = vpop.f32.mrf.mxu3 }
 0x212   : > { %v1481_v36 = vadd.f32 %v1480_v30, %v4907_v9 }
 0x214   : > { %v1909_v61 = vmax.f32 %v1481_v36, 0.0 }
 0x215   : > { %v1717_v21 = vpop.f32.mrf.mxu2 }
 0x216   : > { %1798 = vmatmul.bf16.vlgmr.msra.gmra.mxu3 %v5771_v44  ;;  %2115 = vmatmul.bf16.vlgmr.msra.gmra.mxu0 %v4879_v26  ;;  %v5049_v22 = vpack.c.bf16 %v1909_v61, %v1907_v33  ;;  %v5051_v9 = vadd.f32 %v1717_v21, %v1629_v0  ;;  %v1631_v30 = vpop.f32.mrf.mxu1  ;;  %v5057_v44 = vpop.f32.mrf.mxu0  ;;  %v5774_v21 = vld [vmem:[#allocation25_spill] sm:$0xff] }
 0x217   : > { %v1632_v36 = vadd.f32 %v1631_v30, %v1543_v1  ;;  %v3864_v1 = vld [vmem:[#allocation7 + $0x50] sm:$0xff] }
 0x218   : > { %2201 = vmatpush.bf16.msra.mxu1 %v3864_v1 }
 0x219   : > { %v1483_v55 = vpop.f32.mrf.mxu3  ;;  %1670 = vmatmul.bf16.gmra.mxu1 %v5773_v3 }
 0x21a   : > { %v1484_v57 = vadd.f32 %v1483_v55, %v4917_v46  ;;  %1759 = vmatmul.bf16.gmra.mxu2 %v5772_v63 }
 0x21c   : > { %v1911_v40 = vmax.f32 %v1484_v57, 0.0 }
 0x21d   : > { %v1720_v26 = vpop.f32.mrf.mxu2 }
 0x21e   : > { %v5060_v61 = vadd.f32 %v1720_v26, %v1632_v36  ;;  %v1633_v46 = vpop.f32.mrf.mxu1 }
 0x21f   : > { %v1634_v55 = vadd.f32 %v1633_v46, %v1545_v19 }
 0x221   : > { %v1485_v33 = vpop.f32.mrf.mxu3 }
 0x222   : > { %v1486_v34 = vadd.f32 %v1485_v33, %v4931_v28  ;;  %v5073_v28 = vpop.f32.mrf.mxu0 }
 0x224   : > { %v1913_v0 = vmax.f32 %v1486_v34, 0.0 }
 0x225   : > { %v1722_v30 = vpop.f32.mrf.mxu2 }
 0x226   : > { %1803 = vmatmul.bf16.gmra.mxu3 %v5774_v21  ;;  %2120 = vmatmul.bf16.gmra.mxu0 %v4905_v39  ;;  %v5067_v63 = vpack.c.bf16 %v1913_v0, %v1911_v40  ;;  %v5069_v26 = vadd.f32 %v1722_v30, %v1634_v55  ;;  %v1636_v3 = vpop.f32.mrf.mxu1  ;;  %v1550_v40 = vadd.f32 %v4936_v20, %v4998_v8  ;;  %v5775_v55 = vld [vmem:[#allocation28_spill] sm:$0xff] }
 0x227   : > { %v1637_v39 = vadd.f32 %v1636_v3, %v1548_v4 }
 0x229   : > { %v1488_v36 = vpop.f32.mrf.mxu3  ;;  %1675 = vmatmul.bf16.gmra.mxu1 %v4789_v15 }
 0x22a   : > { %v1489_v57 = vadd.f32 %v1488_v36, %v4941_v50  ;;  %1764 = vmatmul.bf16.gmra.mxu2 %v4782_v37  ;;  %v5083_v59 = vpop.f32.mrf.mxu0  ;;  %v3876_v37 = vld [vmem:[%s5688_s5 + $0x30] sm:$0xff]  ;;  %v1553_v36 = vadd.f32 %v4949_v48, %v4998_v8 }
 0x22b   : > { %2402 = vmatpush.bf16.msra.mxu2 %v3876_v37  ;;  %v5778_v37 = vld [vmem:[#allocation31_spill] sm:$0xff] }
 0x22c   : > { %v1915_v46 = vmax.f32 %v1489_v57, 0.0  ;;  %v5776_v57 = vld [vmem:[#allocation17_spill] sm:$0xff]  ;;  %v3863_v48 = vld [vmem:[#allocation7 + $0x48] sm:$0xff] }
 0x22d   : > { %v1725_v33 = vpop.f32.mrf.mxu2  ;;  %2202 = vmatpush.bf16.msra.mxu1 %v3863_v48 }
 0x22e   : > { %v5078_v34 = vadd.f32 %v1725_v33, %v1637_v39  ;;  %v1638_v50 = vpop.f32.mrf.mxu1 }
 0x22f   : > { %v1639_v15 = vadd.f32 %v1638_v50, %v1550_v40 }
 0x231   : > { %v1490_v19 = vpop.f32.mrf.mxu3 }
 0x232   : > { %v1491_v0 = vadd.f32 %v1490_v19, %v4955_v14  ;;  %v5098_v39 = vpop.f32.mrf.mxu0 }
 0x234   : > { %v1917_v21 = vmax.f32 %v1491_v0, 0.0 }
 0x235   : > { %v1727_v20 = vpop.f32.mrf.mxu2 }
 0x236   : > { %1808 = vmatmul.bf16.gmra.mxu3 %v5775_v55  ;;  %2125 = vmatmul.bf16.gmra.mxu0 %v4929_v54  ;;  %v5090_v1 = vpack.c.bf16 %v1917_v21, %v1915_v46  ;;  %v5092_v14 = vadd.f32 %v1727_v20, %v1639_v15  ;;  %v1641_v3 = vpop.f32.mrf.mxu1  ;;  %v5777_v54 = vld [vmem:[#allocation13_spill] sm:$0xff]  ;;  %v1558_v15 = vadd.f32 %v4973_v62, %v4998_v8  ;;  %v5779_v20 = vld [vmem:[#allocation18_spill] sm:$0xff] }
 0x237   : > { %v5100_v33 = vadd.f32 %v1641_v3, %v1553_v36  ;;  %v3875_v62 = vld [vmem:[%s5688_s5 + $0x28] sm:$0xff] }
 0x238   : > { %2403 = vmatpush.bf16.msra.mxu2 %v3875_v62 }
 0x239   : > { %v1493_v30 = vpop.f32.mrf.mxu3  ;;  %1680 = vmatmul.bf16.gmra.mxu1 %v5777_v54 }
 0x23a   : > { %v1494_v4 = vadd.f32 %v1493_v30, %v4965_v16  ;;  %1769 = vmatmul.bf16.gmra.mxu2 %v5776_v57  ;;  %v5110_v50 = vpop.f32.mrf.mxu0 }
 0x23c   : > { %v1919_v0 = vmax.f32 %v1494_v4, 0.0  ;;  %v5780_v4 = vld [vmem:[#allocation14_spill] sm:$0xff] }
 0x23e   : > { %v5104_v21 = vpop.f32.mrf.mxu1 }
 0x241   : > { %v1495_v19 = vpop.f32.mrf.mxu3 }
 0x242   : > { %v1496_v40 = vadd.f32 %v1495_v19, %v4979_v12  ;;  %v5119_v57 = vpop.f32.mrf.mxu0 }
 0x244   : > { %v1921_v46 = vmax.f32 %v1496_v40, 0.0 }
 0x246   : > { %1813 = vmatmul.bf16.gmra.mxu3 %v5778_v37  ;;  %2130 = vmatmul.bf16.gmra.mxu0 %v4953_v13  ;;  %v5108_v16 = vpack.c.bf16 %v1921_v46, %v1919_v0  ;;  %v1646_v30 = vpop.f32.mrf.mxu1  ;;  %v1563_v37 = vadd.f32 %v5004_v18, %v4998_v8  ;;  %v5786_v18 = vld [vmem:[#allocation39_spill] sm:$0xff] }
 0x247   : > { %v5116_v36 = vadd.f32 %v1646_v30, %v1558_v15  ;;  %v5783_v15 = vld [vmem:[#allocation19_spill] sm:$0xff] }
 0x248   : > { %v5784_v30 = vld [vmem:[#allocation15_spill] sm:$0xff] }
 0x249   : > { %v1498_v55 = vpop.f32.mrf.mxu3  ;;  %1685 = vmatmul.bf16.gmra.mxu1 %v5780_v4 }
 0x24a   : > { %v1499_v12 = vadd.f32 %v1498_v55, %v4989_v45  ;;  %1774 = vmatmul.bf16.gmra.mxu2 %v5779_v20  ;;  %v5781_v45 = vld [vmem:[#allocation34_spill] sm:$0xff]  ;;  %v5134_v55 = vpop.f32.mrf.mxu0 }
 0x24c   : > { %v1923_v54 = vmax.f32 %v1499_v12, 0.0 }
 0x24e   : > { %v5125_v40 = vpop.f32.mrf.mxu1 }
 0x251   : > { %v1500_v13 = vpop.f32.mrf.mxu3 }
 0x252   : > { %v1501_v3 = vadd.f32 %v1500_v13, %v5006_v27  ;;  %v5782_v27 = vld [vmem:[#allocation35_spill] sm:$0xff]  ;;  %v5143_v62 = vpop.f32.mrf.mxu0 }
 0x254   : > { %v1925_v19 = vmax.f32 %v1501_v3, 0.0 }
 0x256   : > { %1818 = vmatmul.bf16.gmra.mxu3 %v5781_v45  ;;  %2135 = vmatmul.bf16.gmra.mxu0 %v4977_v24  ;;  %v5129_v0 = vpack.c.bf16 %v1925_v19, %v1923_v54  ;;  %v1651_v12 = vpop.f32.mrf.mxu1  ;;  %v5785_v24 = vld [vmem:[#allocation38_spill] sm:$0xff] }
 0x257   : > { %v5137_v20 = vadd.f32 %v1651_v12, %v1563_v37  ;;  %v3862_v45 = vld [vmem:[#allocation7 + $0x40] sm:$0xff] }
 0x258   : > { %2203 = vmatpush.bf16.msra.mxu1 %v3862_v45 }
 0x259   : > { %v1503_v46 = vpop.f32.mrf.mxu3  ;;  %1690 = vmatmul.bf16.gmra.mxu1 %v5784_v30 }
 0x25a   : > { %v1504_v48 = vadd.f32 %v1503_v46, %v5782_v27  ;;  %1779 = vmatmul.bf16.gmra.mxu2 %v5783_v15  ;;  %v1568_v27 = vadd.f32 %v5033_v41, %v4998_v8  ;;  %v5787_v15 = vld [vmem:[#allocation40_spill] sm:$0xff]  ;;  %v3874_v41 = vld [vmem:[%s5688_s5 + $0x20] sm:$0xff] }
 0x25b   : > { %2404 = vmatpush.bf16.msra.mxu2 %v3874_v41 }
 0x25c   : > { %v1927_v3 = vmax.f32 %v1504_v48, 0.0  ;;  %v5788_v48 = vld [vmem:[#allocation20_spill] sm:$0xff] }
 0x25e   : > { %v5141_v19 = vpop.f32.mrf.mxu1 }
 0x261   : > { %v1505_v4 = vpop.f32.mrf.mxu3 }
 0x262   : > { %v1506_v13 = vadd.f32 %v1505_v4, %v5785_v24  ;;  %v5155_v24 = vpop.f32.mrf.mxu0 }
 0x264   : > { %v1929_v54 = vmax.f32 %v1506_v13, 0.0  ;;  %v5789_v13 = vld [vmem:[#allocation16_spill] sm:$0xff] }
 0x266   : > { %1823 = vmatmul.bf16.gmra.mxu3 %v5786_v18  ;;  %2140 = vmatmul.bf16.gmra.mxu0 %v5002_v35  ;;  %v5147_v46 = vpack.c.bf16 %v1929_v54, %v1927_v3  ;;  %v1656_v30 = vpop.f32.mrf.mxu1 }
 0x267   : > { %v5153_v4 = vadd.f32 %v1656_v30, %v1568_v27 }
 0x269   : > { %v1508_v37 = vpop.f32.mrf.mxu3  ;;  %1695 = vmatmul.bf16.gmra.mxu1 %v5789_v13 }
 0x26a   : > { %v1509_v12 = vadd.f32 %v1508_v37, %v5787_v15  ;;  %1784 = vmatmul.bf16.gmra.mxu2 %v5788_v48  ;;  %v1573_v15 = vadd.f32 %v5057_v44, %v4998_v8 }
 0x26c   : > { %v1931_v54 = vmax.f32 %v1509_v12, 0.0 }
 0x26e   : > { %v5162_v45 = vpop.f32.mrf.mxu1 }
 0x271   : > { %v1510_v35 = vpop.f32.mrf.mxu3 }
 0x272   : > { %v1511_v3 = vadd.f32 %v1510_v35, %v4799_v2  ;;  %v5170_v2 = vpop.f32.mrf.mxu0 }
 0x274   : > { %v1933_v18 = vmax.f32 %v1511_v3, 0.0 }
 0x276   : > { %1828 = vmatmul.bf16.gmra.mxu3 %v4801_v38  ;;  %2145 = vmatmul.bf16.gmra.mxu0 %v5026_v23  ;;  %v5166_v37 = vpack.c.bf16 %v1933_v18, %v1931_v54  ;;  %v1661_v48 = vpop.f32.mrf.mxu1 }
 0x277   : > { %v5173_v30 = vadd.f32 %v1661_v48, %v1573_v15 }
 0x279   : > { %v1513_v27 = vpop.f32.mrf.mxu3 }
 0x27a   : > { %v1514_v12 = vadd.f32 %v1513_v27, %v4812_v56  ;;  %v5176_v38 = vpop.f32.mrf.mxu0  ;;  %v1578_v56 = vadd.f32 %v5083_v59, %v4998_v8 }
 0x27c   : > { %v1935_v23 = vmax.f32 %v1514_v12, 0.0 }
 0x27e   : > { %v5178_v54 = vpop.f32.mrf.mxu1 }
 0x281   : > { %v1515_v13 = vpop.f32.mrf.mxu3 }
 0x282   : > { %v1516_v35 = vadd.f32 %v1515_v13, %v4825_v32  ;;  %v5187_v32 = vpop.f32.mrf.mxu0 }
 0x284   : > { %v1937_v3 = vmax.f32 %v1516_v35, 0.0 }
 0x286   : > { %1833 = vmatmul.bf16.gmra.mxu3 %v4827_v31  ;;  %2150 = vmatmul.bf16.gmra.mxu0 %v5049_v22  ;;  %v5182_v44 = vpack.c.bf16 %v1937_v3, %v1935_v23  ;;  %v1666_v27 = vpop.f32.mrf.mxu1  ;;  %v3873_v22 = vld [vmem:[%s5688_s5 + $0x18] sm:$0xff] }
 0x287   : > { %v5189_v15 = vadd.f32 %v1666_v27, %v1578_v56  ;;  %2405 = vmatpush.bf16.msra.mxu2 %v3873_v22 }
 0x289   : > { %v1518_v18 = vpop.f32.mrf.mxu3 }
 0x28a   : > { %v1519_v41 = vadd.f32 %v1518_v18, %v4838_v53  ;;  %v5201_v59 = vpop.f32.mrf.mxu0 }
 0x28c   : > { %v1939_v13 = vmax.f32 %v1519_v41, 0.0 }
 0x28e   : > { %v5195_v35 = vpop.f32.mrf.mxu1 }
 0x291   : > { %v1520_v12 = vpop.f32.mrf.mxu3 }
 0x292   : > { %v1521_v48 = vadd.f32 %v1520_v12, %v4851_v43  ;;  %v1583_v43 = vadd.f32 %v5110_v50, %v4998_v8  ;;  %v5208_v27 = vpop.f32.mrf.mxu0 }
 0x294   : > { %v1941_v31 = vmax.f32 %v1521_v48, 0.0 }
 0x296   : > { %1838 = vmatmul.bf16.gmra.mxu3 %v4853_v60  ;;  %2155 = vmatmul.bf16.gmra.mxu0 %v5067_v63  ;;  %v5199_v53 = vpack.c.bf16 %v1941_v31, %v1939_v13  ;;  %v1671_v3 = vpop.f32.mrf.mxu1  ;;  %v5213_v13 = vpop.f32.mrf.mxu2 }
 0x297   : > { %v5205_v18 = vadd.f32 %v1671_v3, %v1583_v43 }
 0x299   : > { %v1799_v23 = vpop.f32.mrf.mxu3 }
 0x29a   : > { %v1800_v56 = vadd.f32 %v1799_v23, %v5015_v5  ;;  %v1588_v5 = vadd.f32 %v5134_v55, %v4998_v8  ;;  %v5219_v22 = vpop.f32.mrf.mxu0 }
 0x29c   : > { %v1880_v63 = vmax.f32 %v1800_v56, 0.0 }
 0x29e   : > { %v5211_v48 = vpop.f32.mrf.mxu1  ;;  %v1732_v43 = vpop.f32.mrf.mxu2 }
 0x2a1   : > { %v1801_v41 = vpop.f32.mrf.mxu3 }
 0x2a2   : > { %v1802_v60 = vadd.f32 %v1801_v41, %v5028_v51  ;;  %v5230_v55 = vpop.f32.mrf.mxu0 }
 0x2a3   : > { %5790 = vst [vmem:[#allocation23_spill] sm:$0xff] %v5230_v55 }
 0x2a4   : > { %v1882_v12 = vmax.f32 %v1802_v60, 0.0 }
 0x2a6   : > { %v1944_v31 = vpack.c.bf16 %v1882_v12, %v1880_v63  ;;  %1843 = vmatmul.bf16.gmra.mxu3 %v4875_v52  ;;  %2160 = vmatmul.bf16.gmra.mxu0 %v5090_v1  ;;  %v1676_v23 = vpop.f32.mrf.mxu1  ;;  %v3872_v1 = vld [vmem:[%s5688_s5 + $0x10] sm:$0xff] }
 0x2a7   : > { %v5221_v51 = vadd.f32 %v1676_v23, %v1588_v5  ;;  %2406 = vmatpush.bf16.msra.mxu2 %v3872_v1 }
 0x2a8   : > { %2204 = vmatmul.bf16.vlgmr.msra.gmra.mxu1 %v1944_v31  ;;  %v1735_v31 = vpop.f32.mrf.mxu2 }
 0x2a9   : > { %v1804_v50 = vpop.f32.mrf.mxu3 }
 0x2aa   : > { %v1805_v3 = vadd.f32 %v1804_v50, %v5037_v17  ;;  %v5238_v23 = vpop.f32.mrf.mxu0 }
 0x2ac   : > { %v1884_v60 = vmax.f32 %v1805_v3, 0.0 }
 0x2ae   : > { %v5228_v63 = vpop.f32.mrf.mxu1 }
 0x2b1   : > { %v1806_v56 = vpop.f32.mrf.mxu3 }
 0x2b2   : > { %v1807_v41 = vadd.f32 %v1806_v56, %v5051_v9  ;;  %v1593_v9 = vadd.f32 %v5155_v24, %v4998_v8 }
 0x2b4   : > { %v1886_v52 = vmax.f32 %v1807_v41, 0.0  ;;  %v1737_v41 = vpop.f32.mrf.mxu2 }
 0x2b6   : > { %1848 = vmatmul.bf16.gmra.mxu3 %v4899_v58  ;;  %2165 = vmatmul.bf16.gmra.mxu0 %v5108_v16  ;;  %v1946_v12 = vpack.c.bf16 %v1886_v52, %v1884_v60  ;;  %v1681_v50 = vpop.f32.mrf.mxu1 }
 0x2b7   : > { %v5236_v5 = vadd.f32 %v1681_v50, %v1593_v9  ;;  %v5248_v9 = vpop.f32.mrf.mxu0 }
 0x2b8   : > { %2209 = vmatmul.bf16.gmra.mxu1 %v1946_v12  ;;  %v1598_v12 = vadd.f32 %v5176_v38, %v4998_v8 }
 0x2b9   : > { %v1809_v17 = vpop.f32.mrf.mxu3 }
 0x2ba   : > { %v1810_v3 = vadd.f32 %v1809_v17, %v5060_v61 }
 0x2bc   : > { %v1888_v16 = vmax.f32 %v1810_v3, 0.0  ;;  %v5250_v17 = vpop.f32.mrf.mxu2 }
 0x2be   : > { %v5242_v52 = vpop.f32.mrf.mxu1 }
 0x2c1   : > { %v1811_v56 = vpop.f32.mrf.mxu3 }
 0x2c2   : > { %v1812_v58 = vadd.f32 %v1811_v56, %v5069_v26  ;;  %v5256_v56 = vpop.f32.mrf.mxu0 }
 0x2c4   : > { %v1890_v60 = vmax.f32 %v1812_v58, 0.0 }
 0x2c6   : > { %1853 = vmatmul.bf16.gmra.mxu3 %v4923_v29  ;;  %2170 = vmatmul.bf16.gmra.mxu0 %v5129_v0  ;;  %v1948_v24 = vpack.c.bf16 %v1890_v60, %v1888_v16  ;;  %v1686_v61 = vpop.f32.mrf.mxu1  ;;  %v3871_v60 = vld [vmem:[%s5688_s5 + $0x8] sm:$0xff] }
 0x2c7   : > { %v5252_v26 = vadd.f32 %v1686_v61, %v1598_v12  ;;  %2407 = vmatpush.bf16.msra.mxu2 %v3871_v60 }
 0x2c8   : > { %2214 = vmatmul.bf16.gmra.mxu1 %v1948_v24  ;;  %v1742_v24 = vpop.f32.mrf.mxu2 }
 0x2c9   : > { %v1814_v1 = vpop.f32.mrf.mxu3 }
 0x2ca   : > { %v1815_v50 = vadd.f32 %v1814_v1, %v5078_v34  ;;  %v1555_v34 = vadd.f32 %v4960_v11, %v4998_v8  ;;  %v1603_v1 = vadd.f32 %v5201_v59, %v4998_v8  ;;  %v5272_v61 = vpop.f32.mrf.mxu0 }
 0x2cc   : > { %v1892_v0 = vmax.f32 %v1815_v50, 0.0  ;;  %v1644_v12 = vadd.f32 %v5104_v21, %v1555_v34 }
 0x2ce   : > { %v5258_v16 = vpop.f32.mrf.mxu1 }
 0x2d1   : > { %v1816_v3 = vpop.f32.mrf.mxu3 }
 0x2d2   : > { %v1817_v29 = vadd.f32 %v1816_v3, %v5092_v14  ;;  %v1733_v3 = vadd.f32 %v1732_v43, %v1644_v12  ;;  %v5282_v21 = vpop.f32.mrf.mxu0  ;;  %v1608_v43 = vadd.f32 %v5219_v22, %v4998_v8  ;;  %v1736_v12 = vadd.f32 %v1735_v31, %v5116_v36  ;;  %v3870_v36 = vld [vmem:[%s5688_s5] sm:$0xff] }
 0x2d3   : > { %2408 = vmatpush.bf16.msra.mxu2 %v3870_v36 }
 0x2d4   : > { %v1894_v58 = vmax.f32 %v1817_v29, 0.0 }
 0x2d6   : > { %1858 = vmatmul.bf16.gmra.mxu3 %v4947_v10  ;;  %2175 = vmatmul.bf16.gmra.mxu0 %v5147_v46  ;;  %v1950_v38 = vpack.c.bf16 %v1894_v58, %v1892_v0  ;;  %v1691_v10 = vpop.f32.mrf.mxu1  ;;  %v1731_v46 = vadd.f32 %v5213_v13, %v5100_v33  ;;  %v1745_v0 = vpop.f32.mrf.mxu2  ;;  %v1560_v33 = vadd.f32 %v4985_v49, %v4998_v8 }
 0x2d7   : > { %v5274_v50 = vadd.f32 %v1691_v10, %v1603_v1 }
 0x2d8   : > { %2219 = vmatmul.bf16.gmra.mxu1 %v1950_v38  ;;  %v1649_v34 = vadd.f32 %v5125_v40, %v1560_v33  ;;  %v1565_v40 = vadd.f32 %v5019_v25, %v4998_v8 }
 0x2d9   : > { %v1819_v14 = vpop.f32.mrf.mxu3 }
 0x2da   : > { %v1820_v29 = vadd.f32 %v1819_v14, %v1731_v46  ;;  %v1654_v31 = vadd.f32 %v5141_v19, %v1565_v40  ;;  %v1570_v19 = vadd.f32 %v5045_v6, %v4998_v8 }
 0x2dc   : > { %v1896_v38 = vmax.f32 %v1820_v29, 0.0 }
 0x2de   : > { %v5276_v55 = vpop.f32.mrf.mxu1  ;;  %v1747_v14 = vpop.f32.mrf.mxu2 }
 0x2e1   : > { %v1821_v11 = vpop.f32.mrf.mxu3 }
 0x2e2   : > { %v1822_v58 = vadd.f32 %v1821_v11, %v1733_v3  ;;  %v5290_v3 = vpop.f32.mrf.mxu0 }
 0x2e4   : > { %v1898_v60 = vmax.f32 %v1822_v58, 0.0 }
 0x2e6   : > { %v1952_v59 = vpack.c.bf16 %v1898_v60, %v1896_v38  ;;  %1863 = vmatmul.bf16.gmra.mxu3 %v4971_v7  ;;  %2180 = vmatmul.bf16.gmra.mxu0 %v5166_v37  ;;  %v1696_v1 = vpop.f32.mrf.mxu1  ;;  %v1738_v7 = vadd.f32 %v1737_v41, %v1649_v34  ;;  %v1750_v58 = vpop.f32.mrf.mxu2  ;;  %v1741_v60 = vadd.f32 %v5250_v17, %v5137_v20 }
 0x2e7   : > { %v5288_v10 = vadd.f32 %v1696_v1, %v1608_v43  ;;  %v1659_v17 = vadd.f32 %v5162_v45, %v1570_v19  ;;  %v1751_v45 = vadd.f32 %v1750_v58, %v5173_v30 }
 0x2e8   : > { %2224 = vmatmul.bf16.gmra.mxu1 %v1952_v59 }
 0x2e9   : > { %v1824_v13 = vpop.f32.mrf.mxu3 }
 0x2ea   : > { %v1825_v37 = vadd.f32 %v1824_v13, %v1736_v12  ;;  %v5300_v41 = vpop.f32.mrf.mxu0 }
 0x2ec   : > { %v1900_v29 = vmax.f32 %v1825_v37, 0.0 }
 0x2ee   : > { %v1752_v59 = vpop.f32.mrf.mxu2  ;;  %v5315_v40 = vpop.f32.mrf.mxu1 }
 0x2f1   : > { %v1826_v46 = vpop.f32.mrf.mxu3 }
 0x2f2   : > { %v1827_v49 = vadd.f32 %v1826_v46, %v1738_v7  ;;  %v5304_v1 = vpop.f32.mrf.mxu0  ;;  %v1748_v7 = vadd.f32 %v1747_v14, %v1659_v17 }
 0x2f4   : > { %v1902_v11 = vmax.f32 %v1827_v49, 0.0 }
 0x2f6   : > { %v1954_v38 = vpack.c.bf16 %v1902_v11, %v1900_v29  ;;  %1868 = vmatmul.bf16.gmra.mxu3 %v4995_v42  ;;  %2185 = vmatmul.bf16.gmra.mxu0 %v5182_v44  ;;  %v1743_v42 = vadd.f32 %v1742_v24, %v1654_v31  ;;  %v1755_v20 = vpop.f32.mrf.mxu2  ;;  %v1746_v24 = vadd.f32 %v1745_v0, %v5153_v4 }
 0x2f7   : > { %v1756_v19 = vadd.f32 %v1755_v20, %v5189_v15 }
 0x2f8   : > { %2229 = vmatmul.bf16.gmra.mxu1 %v1954_v38 }
 0x2f9   : > { %v1829_v22 = vpop.f32.mrf.mxu3 }
 0x2fa   : > { %v1830_v44 = vadd.f32 %v1829_v22, %v1741_v60 }
 0x2fc   : > { %v1904_v43 = vmax.f32 %v1830_v44, 0.0 }
 0x2fe   : > { %v1757_v29 = vpop.f32.mrf.mxu2 }
 0x301   : > { %v1831_v33 = vpop.f32.mrf.mxu3 }
 0x302   : > { %v1832_v13 = vadd.f32 %v1831_v33, %v1743_v42 }
 0x304   : > { %v1906_v34 = vmax.f32 %v1832_v13, 0.0 }
 0x306   : > { %v1956_v25 = vpack.c.bf16 %v1906_v34, %v1904_v43  ;;  %1873 = vmatmul.bf16.gmra.mxu3 %v5022_v47  ;;  %2190 = vmatmul.bf16.gmra.mxu0 %v5199_v53  ;;  %v1575_v53 = vadd.f32 %v5073_v28, %v4998_v8  ;;  %v1760_v4 = vpop.f32.mrf.mxu2  ;;  %v5321_v28 = vld [vmem:[%s5687_s4] ss:$0 sm:$0xff] }
 0x307   : > { %v2117_v58 = vadd.f32 %v5321_v28, %v5238_v23  ;;  %v2122_v20 = vadd.f32 %v5321_v28, %v5256_v56 }
 0x308   : > { %2234 = vmatmul.bf16.gmra.mxu1 %v1956_v25  ;;  %v1664_v36 = vadd.f32 %v5178_v54, %v1575_v53  ;;  %v1580_v54 = vadd.f32 %v5098_v39, %v4998_v8  ;;  %v1585_v53 = vadd.f32 %v5119_v57, %v4998_v8 }
 0x309   : > { %v1834_v12 = vpop.f32.mrf.mxu3 }
 0x30a   : > { %v1835_v37 = vadd.f32 %v1834_v12, %v1746_v24  ;;  %v1753_v0 = vadd.f32 %v1752_v59, %v1664_v36  ;;  %v2119_v59 = vadd.f32 %v5321_v28, %v5248_v9  ;;  %v1669_v43 = vadd.f32 %v5195_v35, %v1580_v54 }
 0x30c   : > { %v1908_v11 = vmax.f32 %v1835_v37, 0.0  ;;  %v1758_v17 = vadd.f32 %v1757_v29, %v1669_v43  ;;  %v2124_v29 = vadd.f32 %v5321_v28, %v5272_v61 }
 0x30e   : > { %v1762_v13 = vpop.f32.mrf.mxu2 }
 0x311   : > { %v1836_v46 = vpop.f32.mrf.mxu3 }
 0x312   : > { %v1837_v49 = vadd.f32 %v1836_v46, %v1748_v7 }
 0x314   : > { %v1910_v38 = vmax.f32 %v1837_v49, 0.0 }
 0x316   : > { %v1958_v47 = vpack.c.bf16 %v1910_v38, %v1908_v11  ;;  %v1765_v46 = vpop.f32.mrf.mxu2  ;;  %v5331_v38 = vpop.f32.mrf.mxu0 }
 0x318   : > { %2239 = vmatmul.bf16.gmra.mxu1 %v1958_v47 }
 0x319   : > { %v1839_v6 = vpop.f32.mrf.mxu3 }
 0x31a   : > { %v1840_v14 = vadd.f32 %v1839_v6, %v1751_v45  ;;  %v1674_v6 = vadd.f32 %v5211_v48, %v1585_v53  ;;  %v1595_v53 = vadd.f32 %v5170_v2, %v4998_v8 }
 0x31c   : > { %v1912_v60 = vmax.f32 %v1840_v14, 0.0 }
 0x31e   : > { %v1767_v36 = vpop.f32.mrf.mxu2 }
 0x321   : > { %v1841_v22 = vpop.f32.mrf.mxu3 }
 0x322   : > { %v1842_v31 = vadd.f32 %v1841_v22, %v1753_v0  ;;  %v5340_v0 = vpop.f32.mrf.mxu0  ;;  %v1761_v22 = vadd.f32 %v1760_v4, %v5205_v18  ;;  %v2127_v4 = vadd.f32 %v5321_v28, %v5282_v21 }
 0x324   : > { %v1914_v42 = vmax.f32 %v1842_v31, 0.0 }
 0x325   : > { %v2205_v44 = vpop.f32.mrf.mxu1 }
 0x326   : > { %v1960_v33 = vpack.c.bf16 %v1914_v42, %v1912_v60  ;;  %v2206_v34 = vadd.f32 %v2205_v44, %v2117_v58  ;;  %v1763_v60 = vadd.f32 %v1762_v13, %v1674_v6  ;;  %v1770_v48 = vpop.f32.mrf.mxu2  ;;  %v2129_v13 = vadd.f32 %v5321_v28, %v5290_v3 }
 0x327   : > { %v1684_v6 = vadd.f32 %v5242_v52, %v1595_v53  ;;  %v1600_v52 = vadd.f32 %v5187_v32, %v4998_v8 }
 0x328   : > { %2244 = vmatmul.bf16.gmra.mxu1 %v1960_v33  ;;  %v2285_v24 = vmax.f32 %v2206_v34, 0.0  ;;  %v1590_v34 = vadd.f32 %v5143_v62, %v4998_v8 }
 0x329   : > { %v1844_v30 = vpop.f32.mrf.mxu3 }
 0x32a   : > { %v1845_v7 = vadd.f32 %v1844_v30, %v1756_v19  ;;  %v5343_v43 = vpop.f32.mrf.mxu0 }
 0x32c   : > { %v1916_v23 = vmax.f32 %v1845_v7, 0.0 }
 0x32d   : > { %v2207_v25 = vpop.f32.mrf.mxu1 }
 0x32e   : > { %v2208_v12 = vadd.f32 %v2207_v25, %v2119_v59  ;;  %v1679_v25 = vadd.f32 %v5228_v63, %v1590_v34 }
 0x330   : > { %v2286_v39 = vmax.f32 %v2208_v12, 0.0  ;;  %v1768_v7 = vadd.f32 %v1767_v36, %v1679_v25 }
 0x331   : > { %v1846_v37 = vpop.f32.mrf.mxu3 }
 0x332   : > { %v2317_v49 = vpack.c.bf16 %v2286_v39, %v2285_v24  ;;  %v1847_v11 = vadd.f32 %v1846_v37, %v1758_v17  ;;  %v1766_v17 = vadd.f32 %v1765_v46, %v5221_v51  ;;  %v1772_v39 = vpop.f32.mrf.mxu2  ;;  %v2132_v46 = vadd.f32 %v5321_v28, %v5300_v41 }
 0x334   : > { %v1918_v47 = vmax.f32 %v1847_v11, 0.0  ;;  %2409 = vmatmul.bf16.vlgmr.msra.gmra.mxu2 %v2317_v49  ;;  %v5353_v11 = vpop.f32.mrf.mxu0 }
 0x335   : > { %v2210_v9 = vpop.f32.mrf.mxu1 }
 0x336   : > { %v1962_v35 = vpack.c.bf16 %v1918_v47, %v1916_v23  ;;  %v2211_v45 = vadd.f32 %v2210_v9, %v2122_v20 }
 0x338   : > { %2249 = vmatmul.bf16.gmra.mxu1 %v1962_v35  ;;  %v2287_v57 = vmax.f32 %v2211_v45, 0.0 }
 0x339   : > { %v1849_v15 = vpop.f32.mrf.mxu3 }
 0x33a   : > { %v1850_v42 = vadd.f32 %v1849_v15, %v1761_v22  ;;  %v1775_v15 = vpop.f32.mrf.mxu2 }
 0x33c   : > { %v1920_v30 = vmax.f32 %v1850_v42, 0.0  ;;  %v5359_v20 = vpop.f32.mrf.mxu0 }
 0x33d   : > { %v2212_v14 = vpop.f32.mrf.mxu1 }
 0x33e   : > { %v2213_v31 = vadd.f32 %v2212_v14, %v2124_v29  ;;  %v2134_v29 = vadd.f32 %v5321_v28, %v5304_v1  ;;  %v1771_v14 = vadd.f32 %v1770_v48, %v5236_v5  ;;  %v2139_v48 = vadd.f32 %v5321_v28, %v5340_v0 }
 0x340   : > { %v2288_v44 = vmax.f32 %v2213_v31, 0.0  ;;  %v1773_v31 = vadd.f32 %v1772_v39, %v1684_v6 }
 0x341   : > { %v1851_v33 = vpop.f32.mrf.mxu3 }
 0x342   : > { %v1852_v54 = vadd.f32 %v1851_v33, %v1763_v60  ;;  %v2318_v56 = vpack.c.bf16 %v2288_v44, %v2287_v57  ;;  %v1777_v33 = vpop.f32.mrf.mxu2 }
 0x344   : > { %v1922_v58 = vmax.f32 %v1852_v54, 0.0  ;;  %2414 = vmatmul.bf16.gmra.mxu2 %v2318_v56 }
 0x345   : > { %v2215_v61 = vpop.f32.mrf.mxu1 }
 0x346   : > { %v1964_v59 = vpack.c.bf16 %v1922_v58, %v1920_v30  ;;  %v2216_v19 = vadd.f32 %v2215_v61, %v2127_v4  ;;  %v2148_v30 = vpop.f32.mrf.mxu0  ;;  %v2137_v61 = vadd.f32 %v5321_v28, %v5331_v38  ;;  %v1776_v4 = vadd.f32 %v1775_v15, %v5252_v26 }
 0x348   : > { %2254 = vmatmul.bf16.gmra.mxu1 %v1964_v59  ;;  %v2289_v37 = vmax.f32 %v2216_v19, 0.0  ;;  %v1689_v59 = vadd.f32 %v5258_v16, %v1600_v52 }
 0x349   : > { %v1854_v18 = vpop.f32.mrf.mxu3 }
 0x34a   : > { %v1855_v49 = vadd.f32 %v1854_v18, %v1766_v17 }
 0x34c   : > { %v1924_v9 = vmax.f32 %v1855_v49, 0.0 }
 0x34d   : > { %v2217_v12 = vpop.f32.mrf.mxu1 }
 0x34e   : > { %v2218_v24 = vadd.f32 %v2217_v12, %v2129_v13  ;;  %v1780_v13 = vpop.f32.mrf.mxu2  ;;  %v5373_v19 = vpop.f32.mrf.mxu0  ;;  %v1778_v12 = vadd.f32 %v1777_v33, %v1689_v59 }
 0x34f   : > { %v1781_v53 = vadd.f32 %v1780_v13, %v5274_v50  ;;  %v2152_v13 = vadd.f32 %v5321_v28, %v5373_v19 }
 0x350   : > { %v2290_v62 = vmax.f32 %v2218_v24, 0.0 }
 0x351   : > { %v1856_v23 = vpop.f32.mrf.mxu3 }
 0x352   : > { %v1857_v47 = vadd.f32 %v1856_v23, %v1768_v7  ;;  %v2319_v21 = vpack.c.bf16 %v2290_v62, %v2289_v37  ;;  %v1605_v62 = vadd.f32 %v5208_v27, %v4998_v8 }
 0x354   : > { %v1926_v35 = vmax.f32 %v1857_v47, 0.0  ;;  %2419 = vmatmul.bf16.gmra.mxu2 %v2319_v21  ;;  %v2142_v21 = vadd.f32 %v5321_v28, %v5343_v43 }
 0x355   : > { %v2220_v3 = vpop.f32.mrf.mxu1 }
 0x356   : > { %v1966_v63 = vpack.c.bf16 %v1926_v35, %v1924_v9  ;;  %v2221_v36 = vadd.f32 %v2220_v3, %v2132_v46  ;;  %v1782_v26 = vpop.f32.mrf.mxu2  ;;  %v2153_v23 = vpop.f32.mrf.mxu0  ;;  %v2144_v9 = vadd.f32 %v5321_v28, %v5353_v11  ;;  %v1694_v35 = vadd.f32 %v5276_v55, %v1605_v62  ;;  %v5791_v55 = vld [vmem:[#allocation23_spill] sm:$0xff] }
 0x358   : > { %2259 = vmatmul.bf16.gmra.mxu1 %v1966_v63  ;;  %v2291_v2 = vmax.f32 %v2221_v36, 0.0  ;;  %v1783_v46 = vadd.f32 %v1782_v26, %v1694_v35 }
 0x359   : > { %v1859_v51 = vpop.f32.mrf.mxu3 }
 0x35a   : > { %v1860_v60 = vadd.f32 %v1859_v51, %v1771_v14 }
 0x35c   : > { %v1928_v54 = vmax.f32 %v1860_v60, 0.0  ;;  %v1610_v60 = vadd.f32 %v5791_v55, %v4998_v8 }
 0x35d   : > { %v2222_v45 = vpop.f32.mrf.mxu1 }
 0x35e   : > { %v2223_v22 = vadd.f32 %v2222_v45, %v2134_v29  ;;  %v1785_v36 = vpop.f32.mrf.mxu2 }
 0x360   : > { %v2292_v57 = vmax.f32 %v2223_v22, 0.0  ;;  %v2156_v22 = vpop.f32.mrf.mxu0 }
 0x361   : > { %v1861_v42 = vpop.f32.mrf.mxu3 }
 0x362   : > { %v1862_v44 = vadd.f32 %v1861_v42, %v1773_v31  ;;  %v2320_v41 = vpack.c.bf16 %v2292_v57, %v2291_v2  ;;  %v2147_v57 = vadd.f32 %v5321_v28, %v5359_v20  ;;  %v2149_v42 = vadd.f32 %v5321_v28, %v2148_v30 }
 0x364   : > { %v1930_v56 = vmax.f32 %v1862_v44, 0.0  ;;  %2424 = vmatmul.bf16.gmra.mxu2 %v2320_v41  ;;  %v1699_v44 = vadd.f32 %v5315_v40, %v1610_v60 }
 0x365   : > { %v2225_v1 = vpop.f32.mrf.mxu1 }
 0x366   : > { %v1968_v58 = vpack.c.bf16 %v1930_v56, %v1928_v54  ;;  %v2226_v34 = vadd.f32 %v2225_v1, %v2137_v61  ;;  %v1787_v41 = vpop.f32.mrf.mxu2  ;;  %v1786_v1 = vadd.f32 %v1785_v36, %v5288_v10  ;;  %v2154_v10 = vadd.f32 %v5321_v28, %v2153_v23 }
 0x367   : > { %v1788_v52 = vadd.f32 %v1787_v41, %v1699_v44 }
 0x368   : > { %2264 = vmatmul.bf16.gmra.mxu1 %v1968_v58  ;;  %v2293_v32 = vmax.f32 %v2226_v34, 0.0  ;;  %v2158_v54 = vpop.f32.mrf.mxu0 }
 0x369   : > { %v1864_v5 = vpop.f32.mrf.mxu3 }
 0x36a   : > { %v1865_v17 = vadd.f32 %v1864_v5, %v1776_v4 }
 0x36c   : > { %v1932_v37 = vmax.f32 %v1865_v17, 0.0 }
 0x36d   : > { %v2227_v18 = vpop.f32.mrf.mxu1 }
 0x36e   : > { %v2228_v25 = vadd.f32 %v2227_v18, %v2139_v48 }
 0x370   : > { %v2294_v24 = vmax.f32 %v2228_v25, 0.0  ;;  %v2161_v40 = vpop.f32.mrf.mxu0 }
 0x371   : > { %v1866_v7 = vpop.f32.mrf.mxu3 }
 0x372   : > { %v2321_v39 = vpack.c.bf16 %v2294_v24, %v2293_v32  ;;  %v1867_v38 = vadd.f32 %v1866_v7, %v1778_v12 }
 0x374   : > { %v1934_v49 = vmax.f32 %v1867_v38, 0.0  ;;  %2429 = vmatmul.bf16.gmra.mxu2 %v2321_v39 }
 0x375   : > { %v2230_v0 = vpop.f32.mrf.mxu1 }
 0x376   : > { %v1970_v16 = vpack.c.bf16 %v1934_v49, %v1932_v37  ;;  %v2231_v3 = vadd.f32 %v2230_v0, %v2142_v21  ;;  %v2157_v37 = vadd.f32 %v5321_v28, %v2156_v22  ;;  %v2159_v0 = vadd.f32 %v5321_v28, %v2158_v54  ;;  %v5398_v21 = vld [vmem:[%s5689_s6] ss:$0 sm:$0xff] }
 0x378   : > { %2269 = vmatmul.bf16.gmra.mxu1 %v1970_v16  ;;  %v2295_v15 = vmax.f32 %v2231_v3, 0.0  ;;  %v2163_v7 = vpop.f32.mrf.mxu0 }
 0x379   : > { %v1869_v47 = vpop.f32.mrf.mxu3 }
 0x37a   : > { %v1870_v27 = vadd.f32 %v1869_v47, %v1781_v53  ;;  %v5404_v53 = vld [vmem:[%s5690_s7] ss:$0 sm:$0xff] }
 0x37c   : > { %v1936_v43 = vmax.f32 %v1870_v27, 0.0 }
 0x37d   : > { %v2232_v63 = vpop.f32.mrf.mxu1 }
 0x37e   : > { %v2233_v51 = vadd.f32 %v2232_v63, %v2144_v9 }
 0x380   : > { %v2296_v29 = vmax.f32 %v2233_v51, 0.0  ;;  %v2166_v49 = vpop.f32.mrf.mxu0  ;;  %v2162_v51 = vadd.f32 %v5321_v28, %v2161_v40 }
 0x381   : > { %v1871_v6 = vpop.f32.mrf.mxu3 }
 0x382   : > { %v2322_v45 = vpack.c.bf16 %v2296_v29, %v2295_v15  ;;  %v1872_v14 = vadd.f32 %v1871_v6, %v1783_v46  ;;  %v2164_v15 = vadd.f32 %v5321_v28, %v2163_v7 }
 0x384   : > { %v1938_v31 = vmax.f32 %v1872_v14, 0.0  ;;  %2434 = vmatmul.bf16.gmra.mxu2 %v2322_v45 }
 0x385   : > { %v2235_v11 = vpop.f32.mrf.mxu1 }
 0x386   : > { %v1972_v2 = vpack.c.bf16 %v1938_v31, %v1936_v43  ;;  %v2236_v33 = vadd.f32 %v2235_v11, %v2147_v57 }
 0x388   : > { %2274 = vmatmul.bf16.gmra.mxu1 %v1972_v2  ;;  %v2297_v5 = vmax.f32 %v2236_v33, 0.0  ;;  %v2168_v9 = vpop.f32.mrf.mxu0  ;;  %v2167_v33 = vadd.f32 %v5321_v28, %v2166_v49 }
 0x389   : > { %v1874_v50 = vpop.f32.mrf.mxu3 }
 0x38a   : > { %v1875_v61 = vadd.f32 %v1874_v50, %v1786_v1 }
 0x38c   : > { %v1940_v18 = vmax.f32 %v1875_v61, 0.0 }
 0x38d   : > { %v2237_v56 = vpop.f32.mrf.mxu1 }
 0x38e   : > { %v2238_v58 = vadd.f32 %v2237_v56, %v2149_v42  ;;  %v2169_v56 = vadd.f32 %v5321_v28, %v2168_v9 }
 0x390   : > { %v2298_v8 = vmax.f32 %v2238_v58, 0.0  ;;  %v2171_v14 = vpop.f32.mrf.mxu0 }
 0x391   : > { %v1876_v48 = vpop.f32.mrf.mxu3 }
 0x392   : > { %v2323_v59 = vpack.c.bf16 %v2298_v8, %v2297_v5  ;;  %v1877_v34 = vadd.f32 %v1876_v48, %v1788_v52 }
 0x394   : > { %v1942_v20 = vmax.f32 %v1877_v34, 0.0  ;;  %2439 = vmatmul.bf16.gmra.mxu2 %v2323_v59 }
 0x395   : > { %v2240_v30 = vpop.f32.mrf.mxu1 }
 0x396   : > { %v1974_v4 = vpack.c.bf16 %v1942_v20, %v1940_v18  ;;  %v2241_v25 = vadd.f32 %v2240_v30, %v2152_v13 }
 0x398   : > { %2279 = vmatmul.bf16.gmra.mxu1 %v1974_v4  ;;  %v2299_v17 = vmax.f32 %v2241_v25, 0.0  ;;  %v2173_v41 = vpop.f32.mrf.mxu0 }
 0x39d   : > { %v2242_v12 = vpop.f32.mrf.mxu1 }
 0x39e   : > { %v2243_v32 = vadd.f32 %v2242_v12, %v2154_v10  ;;  %v2172_v12 = vadd.f32 %v5321_v28, %v2171_v14 }
 0x3a0   : > { %v2300_v24 = vmax.f32 %v2243_v32, 0.0  ;;  %v2176_v30 = vpop.f32.mrf.mxu0 }
 0x3a2   : > { %v2324_v39 = vpack.c.bf16 %v2300_v24, %v2299_v17  ;;  %v2174_v17 = vadd.f32 %v5321_v28, %v2173_v41 }
 0x3a4   : > { %2444 = vmatmul.bf16.gmra.mxu2 %v2324_v39 }
 0x3a5   : > { %v2245_v38 = vpop.f32.mrf.mxu1 }
 0x3a6   : > { %v2246_v16 = vadd.f32 %v2245_v38, %v2157_v37 }
 0x3a8   : > { %v2301_v19 = vmax.f32 %v2246_v16, 0.0  ;;  %v2178_v39 = vpop.f32.mrf.mxu0 }
 0x3ad   : > { %v2247_v62 = vpop.f32.mrf.mxu1 }
 0x3ae   : > { %v2248_v26 = vadd.f32 %v2247_v62, %v2159_v0 }
 0x3b0   : > { %v2302_v47 = vmax.f32 %v2248_v26, 0.0 }
 0x3b2   : > { %v2325_v23 = vpack.c.bf16 %v2302_v47, %v2301_v19 }
 0x3b4   : > { %2449 = vmatmul.bf16.gmra.mxu2 %v2325_v23 }
 0x3b5   : > { %v2250_v35 = vpop.f32.mrf.mxu1 }
 0x3b6   : > { %v2251_v27 = vadd.f32 %v2250_v35, %v2162_v51 }
 0x3b7   : > { %v2410_v3 = vpop.f32.mrf.mxu2 }
 0x3b8   : > { %v2411_v63 = vadd.f32 %v5398_v21, %v2410_v3  ;;  %v2303_v43 = vmax.f32 %v2251_v27, 0.0  ;;  %v2181_v3 = vpop.f32.mrf.mxu0  ;;  %v2179_v27 = vadd.f32 %v5321_v28, %v2178_v39 }
 0x3ba   : > { %v2490_v46 = vmax.f32 %v2411_v63, 0.0 }
 0x3bc   : > { %v2526_v29 = vmul.f32 %v5404_v53, %v2490_v46  ;;  %v2177_v46 = vadd.f32 %v5321_v28, %v2176_v30 }
 0x3bd   : > { %v2252_v6 = vpop.f32.mrf.mxu1 }
 0x3be   : > { %v2253_v36 = vadd.f32 %v2252_v6, %v2164_v15  ;;  %v2559_v45 = vsel %vm2558_vm0, %v2526_v29, 0.0 }
 0x3bf   : > { %v2412_v22 = vpop.f32.mrf.mxu2  ;;  %2560 = vadd.xlane.f32.xlu0 %v2559_v45 }
 0x3c0   : > { %v2304_v31 = vmax.f32 %v2253_v36, 0.0  ;;  %v2413_v11 = vadd.f32 %v5398_v21, %v2412_v22 }
 0x3c2   : > { %v2326_v2 = vpack.c.bf16 %v2304_v31, %v2303_v43  ;;  %v2491_v55 = vmax.f32 %v2413_v11, 0.0 }
 0x3c4   : > { %2454 = vmatmul.bf16.gmra.mxu2 %v2326_v2  ;;  %v2527_v60 = vmul.f32 %v5404_v53, %v2491_v55  ;;  %v2183_v2 = vpop.f32.mrf.mxu0 }
 0x3c5   : > { %v2255_v50 = vpop.f32.mrf.mxu1 }
 0x3c6   : > { %v2562_v57 = vsel %vm2558_vm0, %v2527_v60, 0.0  ;;  %v2256_v1 = vadd.f32 %v2255_v50, %v2167_v33  ;;  %v2182_v33 = vadd.f32 %v5321_v28, %v2181_v3 }
 0x3c7   : > { %v2415_v42 = vpop.f32.mrf.mxu2  ;;  %2563 = vadd.xlane.f32.xlu0 %v2562_v57 }
 0x3c8   : > { %v2416_v44 = vadd.f32 %v5398_v21, %v2415_v42  ;;  %v2305_v48 = vmax.f32 %v2256_v1, 0.0  ;;  %v2184_v1 = vadd.f32 %v5321_v28, %v2183_v2 }
 0x3ca   : > { %v2492_v54 = vmax.f32 %v2416_v44, 0.0 }
 0x3cc   : > { %v2528_v58 = vmul.f32 %v5404_v53, %v2492_v54 }
 0x3cd   : > { %v2257_v52 = vpop.f32.mrf.mxu1 }
 0x3ce   : > { %v2258_v5 = vadd.f32 %v2257_v52, %v2169_v56  ;;  %v2565_v61 = vsel %vm2558_vm0, %v2528_v58, 0.0  ;;  %v2186_v56 = vpop.f32.mrf.mxu0 }
 0x3cf   : > { %v2417_v8 = vpop.f32.mrf.mxu2  ;;  %2566 = vadd.xlane.f32.xlu1 %v2565_v61 }
 0x3d0   : > { %v2306_v59 = vmax.f32 %v2258_v5, 0.0  ;;  %v2418_v34 = vadd.f32 %v5398_v21, %v2417_v8 }
 0x3d2   : > { %v2327_v18 = vpack.c.bf16 %v2306_v59, %v2305_v48  ;;  %v2493_v20 = vmax.f32 %v2418_v34, 0.0 }
 0x3d4   : > { %2459 = vmatmul.bf16.gmra.mxu2 %v2327_v18  ;;  %v2529_v4 = vmul.f32 %v5404_v53, %v2493_v20 }
 0x3d5   : > { %v2260_v40 = vpop.f32.mrf.mxu1 }
 0x3d6   : > { %v2568_v13 = vsel %vm2558_vm0, %v2529_v4, 0.0  ;;  %v2261_v24 = vadd.f32 %v2260_v40, %v2172_v12  ;;  %v2188_v40 = vpop.f32.mrf.mxu0 }
 0x3d7   : > { %v2420_v10 = vpop.f32.mrf.mxu2  ;;  %2569 = vadd.xlane.f32.xlu1 %v2568_v13 }
 0x3d8   : > { %v2421_v25 = vadd.f32 %v5398_v21, %v2420_v10  ;;  %v2307_v16 = vmax.f32 %v2261_v24, 0.0  ;;  %v2189_v24 = vadd.f32 %v5321_v28, %v2188_v40 }
 0x3da   : > { %v2494_v32 = vmax.f32 %v2421_v25, 0.0 }
 0x3dc   : > { %v2530_v7 = vmul.f32 %v5404_v53, %v2494_v32  ;;  %v2187_v32 = vadd.f32 %v5321_v28, %v2186_v56  ;;  %v5464_v56 = vld [vmem:[#allocation2] ss:$0 sm:$0xff] }
 0x3dd   : > { %v2262_v38 = vpop.f32.mrf.mxu1 }
 0x3de   : > { %v2263_v37 = vadd.f32 %v2262_v38, %v2174_v17  ;;  %v2571_v49 = vsel %vm2558_vm0, %v2530_v7, 0.0 }
 0x3df   : > { %v2422_v0 = vpop.f32.mrf.mxu2  ;;  %2572 = vadd.xlane.f32.xlu2 %v2571_v49 }
 0x3e0   : > { %v2308_v62 = vmax.f32 %v2263_v37, 0.0  ;;  %v2423_v26 = vadd.f32 %v5398_v21, %v2422_v0  ;;  %v2191_v0 = vpop.f32.mrf.mxu0 }
 0x3e2   : > { %v2328_v19 = vpack.c.bf16 %v2308_v62, %v2307_v16  ;;  %v2495_v47 = vmax.f32 %v2423_v26, 0.0 }
 0x3e4   : > { %2464 = vmatmul.bf16.gmra.mxu2 %v2328_v19  ;;  %v2531_v23 = vmul.f32 %v5404_v53, %v2495_v47 }
 0x3e5   : > { %v2265_v9 = vpop.f32.mrf.mxu1 }
 0x3e6   : > { %v2574_v35 = vsel %vm2558_vm0, %v2531_v23, 0.0  ;;  %v2266_v29 = vadd.f32 %v2265_v9, %v2177_v46 }
 0x3e7   : > { %v2425_v63 = vpop.f32.mrf.mxu2  ;;  %2575 = vadd.xlane.f32.xlu2 %v2574_v35 }
 0x3e8   : > { %v2426_v51 = vadd.f32 %v5398_v21, %v2425_v63  ;;  %v2309_v43 = vmax.f32 %v2266_v29, 0.0  ;;  %v2193_v46 = vpop.f32.mrf.mxu0 }
 0x3e9   : > { %v2194_v29 = vadd.f32 %v5321_v28, %v2193_v46 }
 0x3ea   : > { %v2496_v15 = vmax.f32 %v2426_v51, 0.0 }
 0x3ec   : > { %v2532_v6 = vmul.f32 %v5404_v53, %v2496_v15  ;;  %v2192_v15 = vadd.f32 %v5321_v28, %v2191_v0 }
 0x3ed   : > { %v2267_v36 = vpop.f32.mrf.mxu1 }
 0x3ee   : > { %v2268_v45 = vadd.f32 %v2267_v36, %v2179_v27  ;;  %v2577_v14 = vsel %vm2558_vm0, %v2532_v6, 0.0 }
 0x3ef   : > { %v2427_v22 = vpop.f32.mrf.mxu2  ;;  %2578 = vadd.xlane.f32.xlu0 %v2577_v14 }
 0x3f0   : > { %v2310_v31 = vmax.f32 %v2268_v45, 0.0  ;;  %v2428_v11 = vadd.f32 %v5398_v21, %v2427_v22 }
 0x3f2   : > { %v2329_v55 = vpack.c.bf16 %v2310_v31, %v2309_v43  ;;  %v2497_v60 = vmax.f32 %v2428_v11, 0.0 }
 0x3f4   : > { %2469 = vmatmul.bf16.gmra.mxu2 %v2329_v55  ;;  %v2533_v50 = vmul.f32 %v5404_v53, %v2497_v60 }
 0x3f5   : > { %v2270_v57 = vpop.f32.mrf.mxu1 }
 0x3f6   : > { %v2580_v42 = vsel %vm2558_vm0, %v2533_v50, 0.0  ;;  %v2271_v58 = vadd.f32 %v2270_v57, %v2182_v33 }
 0x3f7   : > { %v2430_v44 = vpop.f32.mrf.mxu2  ;;  %2581 = vadd.xlane.f32.xlu1 %v2580_v42 }
 0x3f8   : > { %v2431_v41 = vadd.f32 %v5398_v21, %v2430_v44  ;;  %v2311_v59 = vmax.f32 %v2271_v58, 0.0 }
 0x3fa   : > { %v2498_v54 = vmax.f32 %v2431_v41, 0.0 }
 0x3fc   : > { %v2534_v52 = vmul.f32 %v5404_v53, %v2498_v54 }
 0x3fd   : > { %v2272_v5 = vpop.f32.mrf.mxu1 }
 0x3fe   : > { %v2273_v61 = vadd.f32 %v2272_v5, %v2184_v1  ;;  %v2583_v8 = vsel %vm2558_vm0, %v2534_v52, 0.0 }
 0x3ff   : > { %v2432_v48 = vpop.f32.mrf.mxu2  ;;  %2584 = vadd.xlane.f32.xlu2 %v2583_v8 }
 0x400   : > { %v2312_v34 = vmax.f32 %v2273_v61, 0.0  ;;  %v2433_v18 = vadd.f32 %v5398_v21, %v2432_v48 }
 0x402   : > { %v2330_v20 = vpack.c.bf16 %v2312_v34, %v2311_v59  ;;  %v2499_v30 = vmax.f32 %v2433_v18, 0.0 }
 0x404   : > { %2474 = vmatmul.bf16.gmra.mxu2 %v2330_v20  ;;  %v2535_v4 = vmul.f32 %v5404_v53, %v2499_v30 }
 0x405   : > { %v2275_v13 = vpop.f32.mrf.mxu1 }
 0x406   : > { %v2586_v10 = vsel %vm2558_vm0, %v2535_v4, 0.0  ;;  %v2276_v7 = vadd.f32 %v2275_v13, %v2187_v32 }
 0x407   : > { %v2435_v25 = vpop.f32.mrf.mxu2  ;;  %2587 = vadd.xlane.f32.xlu0 %v2586_v10 }
 0x408   : > { %v2436_v12 = vadd.f32 %v5398_v21, %v2435_v25  ;;  %v2313_v62 = vmax.f32 %v2276_v7, 0.0 }
 0x40a   : > { %v2500_v17 = vmax.f32 %v2436_v12, 0.0 }
 0x40c   : > { %v2536_v39 = vmul.f32 %v5404_v53, %v2500_v17 }
 0x40d   : > { %v2277_v38 = vpop.f32.mrf.mxu1 }
 0x40e   : > { %v2278_v37 = vadd.f32 %v2277_v38, %v2189_v24  ;;  %v2589_v49 = vsel %vm2558_vm0, %v2536_v39, 0.0 }
 0x40f   : > { %v2437_v16 = vpop.f32.mrf.mxu2  ;;  %2590 = vadd.xlane.f32.xlu1 %v2589_v49 }
 0x410   : > { %v2314_v26 = vmax.f32 %v2278_v37, 0.0  ;;  %v2438_v19 = vadd.f32 %v5398_v21, %v2437_v16 }
 0x412   : > { %v2331_v47 = vpack.c.bf16 %v2314_v26, %v2313_v62  ;;  %v2501_v23 = vmax.f32 %v2438_v19, 0.0 }
 0x414   : > { %2479 = vmatmul.bf16.gmra.mxu2 %v2331_v47  ;;  %v2537_v9 = vmul.f32 %v5404_v53, %v2501_v23 }
 0x415   : > { %v2280_v35 = vpop.f32.mrf.mxu1 }
 0x416   : > { %v2592_v3 = vsel %vm2558_vm0, %v2537_v9, 0.0  ;;  %v2281_v6 = vadd.f32 %v2280_v35, %v2192_v15 }
 0x417   : > { %v2440_v63 = vpop.f32.mrf.mxu2  ;;  %2593 = vadd.xlane.f32.xlu2 %v2592_v3 }
 0x418   : > { %v2441_v51 = vadd.f32 %v5398_v21, %v2440_v63  ;;  %v2315_v31 = vmax.f32 %v2281_v6, 0.0 }
 0x41a   : > { %v2502_v27 = vmax.f32 %v2441_v51, 0.0 }
 0x41c   : > { %v2538_v36 = vmul.f32 %v5404_v53, %v2502_v27 }
 0x41d   : > { %v2282_v45 = vpop.f32.mrf.mxu1 }
 0x41e   : > { %v2283_v14 = vadd.f32 %v2282_v45, %v2194_v29  ;;  %v2595_v22 = vsel %vm2558_vm0, %v2538_v36, 0.0 }
 0x41f   : > { %v2442_v43 = vpop.f32.mrf.mxu2  ;;  %2596 = vadd.xlane.f32.xlu0 %v2595_v22 }
 0x420   : > { %v2316_v11 = vmax.f32 %v2283_v14, 0.0  ;;  %v2443_v2 = vadd.f32 %v5398_v21, %v2442_v43 }
 0x422   : > { %v2332_v55 = vpack.c.bf16 %v2316_v11, %v2315_v31  ;;  %v2503_v60 = vmax.f32 %v2443_v2, 0.0 }
 0x424   : > { %2484 = vmatmul.bf16.gmra.mxu2 %v2332_v55  ;;  %v2539_v50 = vmul.f32 %v5404_v53, %v2503_v60 }
 0x426   : > { %v2598_v28 = vsel %vm2558_vm0, %v2539_v50, 0.0 }
 0x427   : > { %v2445_v57 = vpop.f32.mrf.mxu2  ;;  %2599 = vadd.xlane.f32.xlu1 %v2598_v28 }
 0x428   : > { %v2446_v42 = vadd.f32 %v5398_v21, %v2445_v57 }
 0x42a   : > { %v2504_v44 = vmax.f32 %v2446_v42, 0.0 }
 0x42c   : > { %v2540_v41 = vmul.f32 %v5404_v53, %v2504_v44 }
 0x42e   : > { %v2601_v33 = vsel %vm2558_vm0, %v2540_v41, 0.0 }
 0x42f   : > { %v2447_v54 = vpop.f32.mrf.mxu2  ;;  %2602 = vadd.xlane.f32.xlu2 %v2601_v33 }
 0x430   : > { %v2448_v1 = vadd.f32 %v5398_v21, %v2447_v54 }
 0x432   : > { %v2505_v58 = vmax.f32 %v2448_v1, 0.0  ;;  %v2561_v52 = vpop.xlane.xlu0 %2560 }
 0x433   : > { %v2659_v5 = vadd.f32 %v5464_v56, %v2561_v52 }
 0x434   : > { %v2541_v61 = vmul.f32 %v5404_v53, %v2505_v58 }
 0x435   : > { %v2691_v8 = vand.u32 2147483647, %v2659_v5  ;;  %vm2883_vm2 = vcmp.ge.f32.partialorder %v2659_v5, 0.0 }
 0x436   : > { %v2604_v48 = vsel %vm2558_vm0, %v2541_v61, 0.0 }
 0x437   : > { %v2723_v59 = vsub.f32 0.0, %v2691_v8  ;;  %v2450_v34 = vpop.f32.mrf.mxu2  ;;  %2605 = vadd.xlane.f32.xlu0 %v2604_v48 }
 0x438   : > { %v2451_v18 = vadd.f32 %v5398_v21, %v2450_v34 }
 0x439   : > { %v2755_v20 = vmul.f32 1.442695, %v2723_v59 }
 0x43a   : > { %v2506_v30 = vmax.f32 %v2451_v18, 0.0  ;;  %v2564_v4 = vpop.xlane.xlu0 %2563 }
 0x43b   : > { %3972 = vpow2.f32 %v2755_v20  ;;  %v5472_v40 = vadd.f32 %v5464_v56, %v2564_v4 }
 0x43c   : > { %v2542_v13 = vmul.f32 %v5404_v53, %v2506_v30 }
 0x43d   : > { %v2692_v10 = vand.u32 2147483647, %v5472_v40  ;;  %vm2884_vm3 = vcmp.ge.f32.partialorder %v5472_v40, 0.0 }
 0x43e   : > { %v2607_v25 = vsel %vm2558_vm0, %v2542_v13, 0.0 }
 0x43f   : > { %v2724_v12 = vsub.f32 0.0, %v2692_v10  ;;  %v2452_v32 = vpop.f32.mrf.mxu2  ;;  %2608 = vadd.xlane.f32.xlu1 %v2607_v25 }
 0x440   : > { %v2453_v17 = vadd.f32 %v5398_v21, %v2452_v32 }
 0x441   : > { %v3973_v24 = vpop.eup %3972  ;;  %v2757_v7 = vmul.f32 1.442695, %v2724_v12 }
 0x442   : > { %v2819_v39 = vadd.f32 1.0, %v3973_v24  ;;  %v2507_v38 = vmax.f32 %v2453_v17, 0.0  ;;  %v2567_v37 = vpop.xlane.xlu1 %2566 }
 0x443   : > { %3974 = vpow2.f32 %v2757_v7  ;;  %v5481_v49 = vadd.f32 %v5464_v56, %v2567_v37 }
 0x444   : > { %3976 = vrcp.f32 %v2819_v39  ;;  %v2543_v0 = vmul.f32 %v5404_v53, %v2507_v38 }
 0x445   : > { %v2693_v16 = vand.u32 2147483647, %v5481_v49  ;;  %vm2885_vm4 = vcmp.ge.f32.partialorder %v5481_v49, 0.0 }
 0x446   : > { %v2610_v62 = vsel %vm2558_vm0, %v2543_v0, 0.0 }
 0x447   : > { %v2725_v26 = vsub.f32 0.0, %v2693_v16  ;;  %v2455_v19 = vpop.f32.mrf.mxu2  ;;  %2611 = vadd.xlane.f32.xlu2 %v2610_v62 }
 0x448   : > { %v2456_v47 = vadd.f32 %v5398_v21, %v2455_v19 }
 0x449   : > { %v3975_v23 = vpop.eup %3974  ;;  %v2759_v9 = vmul.f32 1.442695, %v2725_v26 }
 0x44a   : > { %v3977_v35 = vpop.eup %3976  ;;  %v2820_v3 = vadd.f32 1.0, %v3975_v23  ;;  %v2508_v63 = vmax.f32 %v2456_v47, 0.0  ;;  %v2570_v51 = vpop.xlane.xlu1 %2569 }
 0x44b   : > { %v2915_v46 = vmul.f32 %v3977_v35, %v3973_v24  ;;  %3978 = vpow2.f32 %v2759_v9  ;;  %v5493_v15 = vadd.f32 %v5464_v56, %v2570_v51 }
 0x44c   : > { %3980 = vrcp.f32 %v2820_v3  ;;  %v2544_v27 = vmul.f32 %v5404_v53, %v2508_v63 }
 0x44d   : > { %v2947_v29 = vsel %vm2883_vm2, %v3977_v35, %v2915_v46  ;;  %v2694_v6 = vand.u32 2147483647, %v5493_v15  ;;  %vm2886_vm5 = vcmp.ge.f32.partialorder %v5493_v15, 0.0 }
 0x44e   : > { %2980 = vst.msk [vmem:[%s5490_s18] sm:$0xff] %vm2979_vm1, %v2947_v29  ;;  %v2613_v36 = vsel %vm2558_vm0, %v2544_v27, 0.0 }
 0x44f   : > { %v2726_v45 = vsub.f32 0.0, %v2694_v6  ;;  %v2457_v14 = vpop.f32.mrf.mxu2  ;;  %2614 = vadd.xlane.f32.xlu0 %v2613_v36 }
 0x450   : > { %v2458_v22 = vadd.f32 %v5398_v21, %v2457_v14 }
 0x451   : > { %v3979_v43 = vpop.eup %3978  ;;  %v2761_v31 = vmul.f32 1.442695, %v2726_v45 }
 0x452   : > { %v3981_v11 = vpop.eup %3980  ;;  %v2821_v2 = vadd.f32 1.0, %v3979_v43  ;;  %v2509_v55 = vmax.f32 %v2458_v22, 0.0  ;;  %v2573_v60 = vpop.xlane.xlu2 %2572 }
 0x453   : > { %v2916_v50 = vmul.f32 %v3981_v11, %v3975_v23  ;;  %3982 = vpow2.f32 %v2761_v31  ;;  %v5502_v28 = vadd.f32 %v5464_v56, %v2573_v60 }
 0x454   : > { %3984 = vrcp.f32 %v2821_v2  ;;  %v2545_v57 = vmul.f32 %v5404_v53, %v2509_v55 }
 0x455   : > { %v2948_v42 = vsel %vm2884_vm3, %v3981_v11, %v2916_v50  ;;  %v2695_v44 = vand.u32 2147483647, %v5502_v28  ;;  %vm2887_vm6 = vcmp.ge.f32.partialorder %v5502_v28, 0.0 }
 0x456   : > { %2981 = vst.msk [vmem:[%s5490_s18 + $0x8] sm:$0xff] %vm2979_vm1, %v2948_v42  ;;  %v2616_v41 = vsel %vm2558_vm0, %v2545_v57, 0.0 }
 0x457   : > { %v2727_v33 = vsub.f32 0.0, %v2695_v44  ;;  %v2460_v54 = vpop.f32.mrf.mxu2  ;;  %2617 = vadd.xlane.f32.xlu1 %v2616_v41 }
 0x458   : > { %v2461_v1 = vadd.f32 %v5398_v21, %v2460_v54 }
 0x459   : > { %v3983_v58 = vpop.eup %3982  ;;  %v2763_v52 = vmul.f32 1.442695, %v2727_v33 }
 0x45a   : > { %v3985_v5 = vpop.eup %3984  ;;  %v2822_v61 = vadd.f32 1.0, %v3983_v58  ;;  %v2510_v8 = vmax.f32 %v2461_v1, 0.0  ;;  %v2576_v48 = vpop.xlane.xlu2 %2575 }
 0x45b   : > { %v2917_v59 = vmul.f32 %v3985_v5, %v3979_v43  ;;  %3986 = vpow2.f32 %v2763_v52  ;;  %v5512_v34 = vadd.f32 %v5464_v56, %v2576_v48 }
 0x45c   : > { %3988 = vrcp.f32 %v2822_v61  ;;  %v2546_v18 = vmul.f32 %v5404_v53, %v2510_v8 }
 0x45d   : > { %v2949_v20 = vsel %vm2885_vm4, %v3985_v5, %v2917_v59  ;;  %v2696_v30 = vand.u32 2147483647, %v5512_v34  ;;  %vm2888_vm7 = vcmp.ge.f32.partialorder %v5512_v34, 0.0 }
 0x45e   : > { %2982 = vst.msk [vmem:[%s5490_s18 + $0x10] sm:$0xff] %vm2979_vm1, %v2949_v20  ;;  %v2619_v4 = vsel %vm2558_vm0, %v2546_v18, 0.0 }
 0x45f   : > { %v2728_v40 = vsub.f32 0.0, %v2696_v30  ;;  %v2462_v13 = vpop.f32.mrf.mxu2  ;;  %2620 = vadd.xlane.f32.xlu2 %v2619_v4 }
 0x460   : > { %v2463_v10 = vadd.f32 %v5398_v21, %v2462_v13 }
 0x461   : > { %v3987_v25 = vpop.eup %3986  ;;  %v2765_v12 = vmul.f32 1.442695, %v2728_v40 }
 0x462   : > { %v3989_v32 = vpop.eup %3988  ;;  %v2823_v17 = vadd.f32 1.0, %v3987_v25  ;;  %v2511_v24 = vmax.f32 %v2463_v10, 0.0  ;;  %v2579_v7 = vpop.xlane.xlu0 %2578 }
 0x463   : > { %v2918_v39 = vmul.f32 %v3989_v32, %v3983_v58  ;;  %3990 = vpow2.f32 %v2765_v12  ;;  %v5522_v38 = vadd.f32 %v5464_v56, %v2579_v7 }
 0x464   : > { %3992 = vrcp.f32 %v2823_v17  ;;  %v2547_v37 = vmul.f32 %v5404_v53, %v2511_v24 }
 0x465   : > { %v2950_v49 = vsel %vm2886_vm5, %v3989_v32, %v2918_v39  ;;  %v2697_v0 = vand.u32 2147483647, %v5522_v38  ;;  %vm2889_vm8 = vcmp.ge.f32.partialorder %v5522_v38, 0.0 }
 0x466   : > { %2983 = vst.msk [vmem:[%s5490_s18 + $0x18] sm:$0xff] %vm2979_vm1, %v2950_v49  ;;  %v2622_v16 = vsel %vm2558_vm0, %v2547_v37, 0.0 }
 0x467   : > { %v2729_v62 = vsub.f32 0.0, %v2697_v0  ;;  %v2465_v26 = vpop.f32.mrf.mxu2  ;;  %2623 = vadd.xlane.f32.xlu0 %v2622_v16 }
 0x468   : > { %v2466_v19 = vadd.f32 %v5398_v21, %v2465_v26 }
 0x469   : > { %v3991_v47 = vpop.eup %3990  ;;  %v2767_v23 = vmul.f32 1.442695, %v2729_v62 }
 0x46a   : > { %v3993_v9 = vpop.eup %3992  ;;  %v2824_v35 = vadd.f32 1.0, %v3991_v47  ;;  %v2512_v3 = vmax.f32 %v2466_v19, 0.0  ;;  %v2582_v63 = vpop.xlane.xlu1 %2581 }
 0x46b   : > { %v2919_v51 = vmul.f32 %v3993_v9, %v3987_v25  ;;  %3994 = vpow2.f32 %v2767_v23  ;;  %v5532_v46 = vadd.f32 %v5464_v56, %v2582_v63 }
 0x46c   : > { %3996 = vrcp.f32 %v2824_v35  ;;  %v2548_v15 = vmul.f32 %v5404_v53, %v2512_v3 }
 0x46d   : > { %v2951_v27 = vsel %vm2887_vm6, %v3993_v9, %v2919_v51  ;;  %v2698_v29 = vand.u32 2147483647, %v5532_v46  ;;  %vm2890_vm9 = vcmp.ge.f32.partialorder %v5532_v46, 0.0 }
 0x46e   : > { %2984 = vst.msk [vmem:[%s5490_s18 + $0x20] sm:$0xff] %vm2979_vm1, %v2951_v27  ;;  %v2625_v6 = vsel %vm2558_vm0, %v2548_v15, 0.0 }
 0x46f   : > { %v2730_v36 = vsub.f32 0.0, %v2698_v29  ;;  %v2467_v45 = vpop.f32.mrf.mxu2  ;;  %2626 = vadd.xlane.f32.xlu1 %v2625_v6 }
 0x470   : > { %v2468_v14 = vadd.f32 %v5398_v21, %v2467_v45 }
 0x471   : > { %v3995_v22 = vpop.eup %3994  ;;  %v2769_v43 = vmul.f32 1.442695, %v2730_v36 }
 0x472   : > { %v3997_v31 = vpop.eup %3996  ;;  %v2825_v11 = vadd.f32 1.0, %v3995_v22  ;;  %v2513_v2 = vmax.f32 %v2468_v14, 0.0  ;;  %v2585_v55 = vpop.xlane.xlu2 %2584 }
 0x473   : > { %v2920_v60 = vmul.f32 %v3997_v31, %v3991_v47  ;;  %3998 = vpow2.f32 %v2769_v43  ;;  %v5542_v50 = vadd.f32 %v5464_v56, %v2585_v55 }
 0x474   : > { %4000 = vrcp.f32 %v2825_v11  ;;  %v2549_v28 = vmul.f32 %v5404_v53, %v2513_v2 }
 0x475   : > { %v2952_v57 = vsel %vm2888_vm7, %v3997_v31, %v2920_v60  ;;  %v2699_v42 = vand.u32 2147483647, %v5542_v50  ;;  %vm2891_vm10 = vcmp.ge.f32.partialorder %v5542_v50, 0.0 }
 0x476   : > { %2985 = vst.msk [vmem:[%s5490_s18 + $0x28] sm:$0xff] %vm2979_vm1, %v2952_v57  ;;  %v2628_v44 = vsel %vm2558_vm0, %v2549_v28, 0.0 }
 0x477   : > { %v2731_v41 = vsub.f32 0.0, %v2699_v42  ;;  %v2470_v33 = vpop.f32.mrf.mxu2  ;;  %2629 = vadd.xlane.f32.xlu2 %v2628_v44 }
 0x478   : > { %v2471_v54 = vadd.f32 %v5398_v21, %v2470_v33 }
 0x479   : > { %v3999_v1 = vpop.eup %3998  ;;  %v2771_v58 = vmul.f32 1.442695, %v2731_v41 }
 0x47a   : > { %v4001_v52 = vpop.eup %4000  ;;  %v2826_v5 = vadd.f32 1.0, %v3999_v1  ;;  %v2514_v61 = vmax.f32 %v2471_v54, 0.0  ;;  %v2588_v8 = vpop.xlane.xlu0 %2587 }
 0x47b   : > { %v2921_v48 = vmul.f32 %v4001_v52, %v3995_v22  ;;  %4002 = vpow2.f32 %v2771_v58  ;;  %v5552_v59 = vadd.f32 %v5464_v56, %v2588_v8 }
 0x47c   : > { %4004 = vrcp.f32 %v2826_v5  ;;  %v2550_v34 = vmul.f32 %v5404_v53, %v2514_v61 }
 0x47d   : > { %v2953_v18 = vsel %vm2889_vm8, %v4001_v52, %v2921_v48  ;;  %v2700_v20 = vand.u32 2147483647, %v5552_v59  ;;  %vm2892_vm11 = vcmp.ge.f32.partialorder %v5552_v59, 0.0 }
 0x47e   : > { %2986 = vst.msk [vmem:[%s5490_s18 + $0x30] sm:$0xff] %vm2979_vm1, %v2953_v18  ;;  %v2631_v30 = vsel %vm2558_vm0, %v2550_v34, 0.0 }
 0x47f   : > { %v2732_v4 = vsub.f32 0.0, %v2700_v20  ;;  %v2472_v40 = vpop.f32.mrf.mxu2  ;;  %2632 = vadd.xlane.f32.xlu0 %v2631_v30 }
 0x480   : > { %v2473_v13 = vadd.f32 %v5398_v21, %v2472_v40 }
 0x481   : > { %v4003_v10 = vpop.eup %4002  ;;  %v2773_v25 = vmul.f32 1.442695, %v2732_v4 }
 0x482   : > { %v4005_v12 = vpop.eup %4004  ;;  %v2827_v32 = vadd.f32 1.0, %v4003_v10  ;;  %v2515_v17 = vmax.f32 %v2473_v13, 0.0  ;;  %v2591_v24 = vpop.xlane.xlu1 %2590 }
 0x483   : > { %v2922_v7 = vmul.f32 %v4005_v12, %v3999_v1  ;;  %4006 = vpow2.f32 %v2773_v25  ;;  %v5562_v39 = vadd.f32 %v5464_v56, %v2591_v24 }
 0x484   : > { %4008 = vrcp.f32 %v2827_v32  ;;  %v2551_v38 = vmul.f32 %v5404_v53, %v2515_v17 }
 0x485   : > { %v2954_v37 = vsel %vm2890_vm9, %v4005_v12, %v2922_v7  ;;  %v2701_v49 = vand.u32 2147483647, %v5562_v39  ;;  %vm2893_vm12 = vcmp.ge.f32.partialorder %v5562_v39, 0.0 }
 0x486   : > { %2987 = vst.msk [vmem:[%s5490_s18 + $0x38] sm:$0xff] %vm2979_vm1, %v2954_v37  ;;  %v2634_v0 = vsel %vm2558_vm0, %v2551_v38, 0.0 }
 0x487   : > { %v2733_v16 = vsub.f32 0.0, %v2701_v49  ;;  %v2475_v62 = vpop.f32.mrf.mxu2  ;;  %2635 = vadd.xlane.f32.xlu1 %v2634_v0 }
 0x488   : > { %v2476_v26 = vadd.f32 %v5398_v21, %v2475_v62 }
 0x489   : > { %v4007_v19 = vpop.eup %4006  ;;  %v2775_v47 = vmul.f32 1.442695, %v2733_v16 }
 0x48a   : > { %v4009_v23 = vpop.eup %4008  ;;  %v2828_v9 = vadd.f32 1.0, %v4007_v19  ;;  %v2516_v35 = vmax.f32 %v2476_v26, 0.0  ;;  %v2594_v3 = vpop.xlane.xlu2 %2593 }
 0x48b   : > { %v2923_v63 = vmul.f32 %v4009_v23, %v4003_v10  ;;  %4010 = vpow2.f32 %v2775_v47  ;;  %v5572_v51 = vadd.f32 %v5464_v56, %v2594_v3 }
 0x48c   : > { %4012 = vrcp.f32 %v2828_v9  ;;  %v2552_v46 = vmul.f32 %v5404_v53, %v2516_v35 }
 0x48d   : > { %v2955_v15 = vsel %vm2891_vm10, %v4009_v23, %v2923_v63  ;;  %v2702_v27 = vand.u32 2147483647, %v5572_v51  ;;  %vm2894_vm13 = vcmp.ge.f32.partialorder %v5572_v51, 0.0 }
 0x48e   : > { %2988 = vst.msk [vmem:[%s5490_s18 + $0x40] sm:$0xff] %vm2979_vm1, %v2955_v15  ;;  %v2637_v29 = vsel %vm2558_vm0, %v2552_v46, 0.0 }
 0x48f   : > { %v2734_v6 = vsub.f32 0.0, %v2702_v27  ;;  %v2477_v36 = vpop.f32.mrf.mxu2  ;;  %2638 = vadd.xlane.f32.xlu2 %v2637_v29 }
 0x490   : > { %v2478_v45 = vadd.f32 %v5398_v21, %v2477_v36 }
 0x491   : > { %v4011_v14 = vpop.eup %4010  ;;  %v2777_v22 = vmul.f32 1.442695, %v2734_v6 }
 0x492   : > { %v4013_v43 = vpop.eup %4012  ;;  %v2829_v31 = vadd.f32 1.0, %v4011_v14  ;;  %v2517_v11 = vmax.f32 %v2478_v45, 0.0  ;;  %v2597_v2 = vpop.xlane.xlu0 %2596 }
 0x493   : > { %v2924_v55 = vmul.f32 %v4013_v43, %v4007_v19  ;;  %4014 = vpow2.f32 %v2777_v22  ;;  %v5582_v60 = vadd.f32 %v5464_v56, %v2597_v2 }
 0x494   : > { %4016 = vrcp.f32 %v2829_v31  ;;  %v2553_v50 = vmul.f32 %v5404_v53, %v2517_v11 }
 0x495   : > { %v2956_v28 = vsel %vm2892_vm11, %v4013_v43, %v2924_v55  ;;  %v2703_v57 = vand.u32 2147483647, %v5582_v60  ;;  %vm2895_vm14 = vcmp.ge.f32.partialorder %v5582_v60, 0.0 }
 0x496   : > { %2989 = vst.msk [vmem:[%s5490_s18 + $0x48] sm:$0xff] %vm2979_vm1, %v2956_v28  ;;  %v2640_v42 = vsel %vm2558_vm0, %v2553_v50, 0.0 }
 0x497   : > { %v2735_v44 = vsub.f32 0.0, %v2703_v57  ;;  %v2480_v41 = vpop.f32.mrf.mxu2  ;;  %2641 = vadd.xlane.f32.xlu0 %v2640_v42 }
 0x498   : > { %v2481_v33 = vadd.f32 %v5398_v21, %v2480_v41 }
 0x499   : > { %v4015_v54 = vpop.eup %4014  ;;  %v2779_v1 = vmul.f32 1.442695, %v2735_v44 }
 0x49a   : > { %v4017_v58 = vpop.eup %4016  ;;  %v2830_v52 = vadd.f32 1.0, %v4015_v54  ;;  %v2518_v5 = vmax.f32 %v2481_v33, 0.0  ;;  %v2600_v61 = vpop.xlane.xlu1 %2599 }
 0x49b   : > { %v2925_v8 = vmul.f32 %v4017_v58, %v4011_v14  ;;  %4018 = vpow2.f32 %v2779_v1  ;;  %v5592_v48 = vadd.f32 %v5464_v56, %v2600_v61 }
 0x49c   : > { %4020 = vrcp.f32 %v2830_v52  ;;  %v2554_v59 = vmul.f32 %v5404_v53, %v2518_v5 }
 0x49d   : > { %v2957_v34 = vsel %vm2893_vm12, %v4017_v58, %v2925_v8  ;;  %v2704_v18 = vand.u32 2147483647, %v5592_v48  ;;  %vm2896_vm15 = vcmp.ge.f32.partialorder %v5592_v48, 0.0 }
 0x49e   : > { %2990 = vst.msk [vmem:[%s5490_s18 + $0x50] sm:$0xff] %vm2979_vm1, %v2957_v34  ;;  %v2643_v20 = vsel %vm2558_vm0, %v2554_v59, 0.0 }
 0x49f   : > { %v2736_v30 = vsub.f32 0.0, %v2704_v18  ;;  %v2482_v4 = vpop.f32.mrf.mxu2  ;;  %2644 = vadd.xlane.f32.xlu1 %v2643_v20 }
 0x4a0   : > { %v2483_v40 = vadd.f32 %v5398_v21, %v2482_v4 }
 0x4a1   : > { %v4019_v13 = vpop.eup %4018  ;;  %v2781_v10 = vmul.f32 1.442695, %v2736_v30 }
 0x4a2   : > { %v4021_v25 = vpop.eup %4020  ;;  %v2831_v12 = vadd.f32 1.0, %v4019_v13  ;;  %v2519_v32 = vmax.f32 %v2483_v40, 0.0  ;;  %v2603_v17 = vpop.xlane.xlu2 %2602 }
 0x4a3   : > { %v2926_v24 = vmul.f32 %v4021_v25, %v4015_v54  ;;  %4022 = vpow2.f32 %v2781_v10  ;;  %v2673_v7 = vadd.f32 %v5464_v56, %v2603_v17 }
 0x4a4   : > { %4024 = vrcp.f32 %v2831_v12  ;;  %v2555_v39 = vmul.f32 %v5404_v53, %v2519_v32 }
 0x4a5   : > { %v2958_v38 = vsel %vm2894_vm13, %v4021_v25, %v2926_v24  ;;  %v2705_v37 = vand.u32 2147483647, %v2673_v7  ;;  %vm2897_vm2 = vcmp.ge.f32.partialorder %v2673_v7, 0.0 }
 0x4a6   : > { %2991 = vst.msk [vmem:[%s5490_s18 + $0x58] sm:$0xff] %vm2979_vm1, %v2958_v38  ;;  %v2646_v49 = vsel %vm2558_vm0, %v2555_v39, 0.0 }
 0x4a7   : > { %v2737_v0 = vsub.f32 0.0, %v2705_v37  ;;  %v2485_v16 = vpop.f32.mrf.mxu2  ;;  %2647 = vadd.xlane.f32.xlu2 %v2646_v49 }
 0x4a8   : > { %v2486_v62 = vadd.f32 %v5398_v21, %v2485_v16 }
 0x4a9   : > { %v4023_v26 = vpop.eup %4022  ;;  %v2783_v19 = vmul.f32 1.442695, %v2737_v0 }
 0x4aa   : > { %v4025_v47 = vpop.eup %4024  ;;  %v2832_v23 = vadd.f32 1.0, %v4023_v26  ;;  %v2520_v9 = vmax.f32 %v2486_v62, 0.0  ;;  %v2606_v35 = vpop.xlane.xlu0 %2605 }
 0x4ab   : > { %v2927_v3 = vmul.f32 %v4025_v47, %v4019_v13  ;;  %4026 = vpow2.f32 %v2783_v19  ;;  %v2674_v63 = vadd.f32 %v5464_v56, %v2606_v35 }
 0x4ac   : > { %4028 = vrcp.f32 %v2832_v23  ;;  %v2556_v51 = vmul.f32 %v5404_v53, %v2520_v9 }
 0x4ad   : > { %v2959_v46 = vsel %vm2895_vm14, %v4025_v47, %v2927_v3  ;;  %v2706_v15 = vand.u32 2147483647, %v2674_v63 }
 0x4ae   : > { %2992 = vst.msk [vmem:[%s5490_s18 + $0x60] sm:$0xff] %vm2979_vm1, %v2959_v46  ;;  %v2649_v27 = vsel %vm2558_vm0, %v2556_v51, 0.0 }
 0x4af   : > { %v2738_v29 = vsub.f32 0.0, %v2706_v15  ;;  %v2487_v6 = vpop.f32.mrf.mxu2  ;;  %2650 = vadd.xlane.f32.xlu0 %v2649_v27 }
 0x4b0   : > { %v2488_v36 = vadd.f32 %v5398_v21, %v2487_v6 }
 0x4b1   : > { %v4027_v45 = vpop.eup %4026  ;;  %v2785_v14 = vmul.f32 1.442695, %v2738_v29 }
 0x4b2   : > { %v4029_v22 = vpop.eup %4028  ;;  %v2833_v43 = vadd.f32 1.0, %v4027_v45  ;;  %v2521_v31 = vmax.f32 %v2488_v36, 0.0  ;;  %v2609_v11 = vpop.xlane.xlu1 %2608 }
 0x4b3   : > { %v2928_v2 = vmul.f32 %v4029_v22, %v4023_v26  ;;  %4030 = vpow2.f32 %v2785_v14  ;;  %v2675_v55 = vadd.f32 %v5464_v56, %v2609_v11 }
 0x4b4   : > { %4032 = vrcp.f32 %v2833_v43  ;;  %v2557_v60 = vmul.f32 %v5404_v53, %v2521_v31 }
 0x4b5   : > { %v2960_v50 = vsel %vm2896_vm15, %v4029_v22, %v2928_v2  ;;  %v2707_v28 = vand.u32 2147483647, %v2675_v55  ;;  %vm2899_vm3 = vcmp.ge.f32.partialorder %v2675_v55, 0.0 }
 0x4b6   : > { %2993 = vst.msk [vmem:[%s5490_s18 + $0x68] sm:$0xff] %vm2979_vm1, %v2960_v50  ;;  %v2652_v21 = vsel %vm2558_vm0, %v2557_v60, 0.0  ;;  %vm2898_vm0 = vcmp.ge.f32.partialorder %v2674_v63, 0.0 }
 0x4b7   : > { %v2739_v57 = vsub.f32 0.0, %v2707_v28  ;;  %2653 = vadd.xlane.f32.xlu1 %v2652_v21 }
 0x4b9   : > { %v4031_v42 = vpop.eup %4030  ;;  %v2787_v44 = vmul.f32 1.442695, %v2739_v57 }
 0x4ba   : > { %v4033_v41 = vpop.eup %4032  ;;  %v2834_v33 = vadd.f32 1.0, %v4031_v42  ;;  %v2612_v54 = vpop.xlane.xlu2 %2611 }
 0x4bb   : > { %v2929_v1 = vmul.f32 %v4033_v41, %v4027_v45  ;;  %4034 = vpow2.f32 %v2787_v44  ;;  %v2676_v58 = vadd.f32 %v5464_v56, %v2612_v54 }
 0x4bc   : > { %4036 = vrcp.f32 %v2834_v33 }
 0x4bd   : > { %v2961_v53 = vsel %vm2897_vm2, %v4033_v41, %v2929_v1  ;;  %v2708_v52 = vand.u32 2147483647, %v2676_v58  ;;  %vm2900_vm4 = vcmp.ge.f32.partialorder %v2676_v58, 0.0 }
 0x4be   : > { %2994 = vst.msk [vmem:[%s5490_s18 + $0x70] sm:$0xff] %vm2979_vm1, %v2961_v53 }
 0x4bf   : > { %v2740_v5 = vsub.f32 0.0, %v2708_v52 }
 0x4c1   : > { %v4035_v61 = vpop.eup %4034  ;;  %v2789_v8 = vmul.f32 1.442695, %v2740_v5 }
 0x4c2   : > { %v4037_v48 = vpop.eup %4036  ;;  %v2835_v59 = vadd.f32 1.0, %v4035_v61  ;;  %v2615_v34 = vpop.xlane.xlu0 %2614 }
 0x4c3   : > { %v2930_v18 = vmul.f32 %v4037_v48, %v4031_v42  ;;  %4038 = vpow2.f32 %v2789_v8  ;;  %v2677_v20 = vadd.f32 %v5464_v56, %v2615_v34 }
 0x4c4   : > { %4040 = vrcp.f32 %v2835_v59 }
 0x4c5   : > { %v2962_v30 = vsel %vm2898_vm0, %v4037_v48, %v2930_v18  ;;  %v2709_v4 = vand.u32 2147483647, %v2677_v20  ;;  %vm2901_vm5 = vcmp.ge.f32.partialorder %v2677_v20, 0.0 }
 0x4c6   : > { %2995 = vst.msk [vmem:[%s5490_s18 + $0x78] sm:$0xff] %vm2979_vm1, %v2962_v30 }
 0x4c7   : > { %v2741_v40 = vsub.f32 0.0, %v2709_v4 }
 0x4c9   : > { %v4039_v13 = vpop.eup %4038  ;;  %v2791_v10 = vmul.f32 1.442695, %v2741_v40 }
 0x4ca   : > { %v4041_v25 = vpop.eup %4040  ;;  %v2836_v12 = vadd.f32 1.0, %v4039_v13  ;;  %v2618_v32 = vpop.xlane.xlu1 %2617 }
 0x4cb   : > { %v2931_v17 = vmul.f32 %v4041_v25, %v4035_v61  ;;  %4042 = vpow2.f32 %v2791_v10  ;;  %v2678_v24 = vadd.f32 %v5464_v56, %v2618_v32 }
 0x4cc   : > { %4044 = vrcp.f32 %v2836_v12 }
 0x4cd   : > { %v2963_v7 = vsel %vm2899_vm3, %v4041_v25, %v2931_v17  ;;  %v2710_v39 = vand.u32 2147483647, %v2678_v24  ;;  %vm2902_vm6 = vcmp.ge.f32.partialorder %v2678_v24, 0.0 }
 0x4ce   : > { %2996 = vst.msk [vmem:[%s5490_s18 + $0x80] sm:$0xff] %vm2979_vm1, %v2963_v7 }
 0x4cf   : > { %v2742_v38 = vsub.f32 0.0, %v2710_v39 }
 0x4d1   : > { %v4043_v37 = vpop.eup %4042  ;;  %v2793_v49 = vmul.f32 1.442695, %v2742_v38 }
 0x4d2   : > { %v4045_v0 = vpop.eup %4044  ;;  %v2837_v16 = vadd.f32 1.0, %v4043_v37  ;;  %v2621_v62 = vpop.xlane.xlu2 %2620 }
 0x4d3   : > { %v2932_v26 = vmul.f32 %v4045_v0, %v4039_v13  ;;  %4046 = vpow2.f32 %v2793_v49  ;;  %v2679_v19 = vadd.f32 %v5464_v56, %v2621_v62 }
 0x4d4   : > { %4048 = vrcp.f32 %v2837_v16 }
 0x4d5   : > { %v2964_v47 = vsel %vm2900_vm4, %v4045_v0, %v2932_v26  ;;  %v2711_v23 = vand.u32 2147483647, %v2679_v19  ;;  %vm2903_vm7 = vcmp.ge.f32.partialorder %v2679_v19, 0.0 }
 0x4d6   : > { %2997 = vst.msk [vmem:[%s5490_s18 + $0x88] sm:$0xff] %vm2979_vm1, %v2964_v47 }
 0x4d7   : > { %v2743_v9 = vsub.f32 0.0, %v2711_v23 }
 0x4d9   : > { %v4047_v35 = vpop.eup %4046  ;;  %v2795_v3 = vmul.f32 1.442695, %v2743_v9 }
 0x4da   : > { %v4049_v63 = vpop.eup %4048  ;;  %v2838_v51 = vadd.f32 1.0, %v4047_v35  ;;  %v2624_v46 = vpop.xlane.xlu0 %2623 }
 0x4db   : > { %v2933_v15 = vmul.f32 %v4049_v63, %v4043_v37  ;;  %4050 = vpow2.f32 %v2795_v3  ;;  %v2680_v27 = vadd.f32 %v5464_v56, %v2624_v46 }
 0x4dc   : > { %4052 = vrcp.f32 %v2838_v51 }
 0x4dd   : > { %v2965_v29 = vsel %vm2901_vm5, %v4049_v63, %v2933_v15  ;;  %v2712_v6 = vand.u32 2147483647, %v2680_v27  ;;  %vm2904_vm8 = vcmp.ge.f32.partialorder %v2680_v27, 0.0 }
 0x4de   : > { %2998 = vst.msk [vmem:[%s5490_s18 + $0x90] sm:$0xff] %vm2979_vm1, %v2965_v29 }
 0x4df   : > { %v2744_v36 = vsub.f32 0.0, %v2712_v6 }
 0x4e1   : > { %v4051_v45 = vpop.eup %4050  ;;  %v2797_v14 = vmul.f32 1.442695, %v2744_v36 }
 0x4e2   : > { %v4053_v22 = vpop.eup %4052  ;;  %v2839_v43 = vadd.f32 1.0, %v4051_v45  ;;  %v2627_v31 = vpop.xlane.xlu1 %2626 }
 0x4e3   : > { %v2934_v11 = vmul.f32 %v4053_v22, %v4047_v35  ;;  %4054 = vpow2.f32 %v2797_v14  ;;  %v2681_v2 = vadd.f32 %v5464_v56, %v2627_v31 }
 0x4e4   : > { %4056 = vrcp.f32 %v2839_v43 }
 0x4e5   : > { %v2966_v55 = vsel %vm2902_vm6, %v4053_v22, %v2934_v11  ;;  %v2713_v60 = vand.u32 2147483647, %v2681_v2  ;;  %vm2905_vm9 = vcmp.ge.f32.partialorder %v2681_v2, 0.0 }
 0x4e6   : > { %2999 = vst.msk [vmem:[%s5490_s18 + $0x98] sm:$0xff] %vm2979_vm1, %v2966_v55 }
 0x4e7   : > { %v2745_v50 = vsub.f32 0.0, %v2713_v60 }
 0x4e9   : > { %v4055_v28 = vpop.eup %4054  ;;  %v2799_v21 = vmul.f32 1.442695, %v2745_v50 }
 0x4ea   : > { %v4057_v57 = vpop.eup %4056  ;;  %v2840_v42 = vadd.f32 1.0, %v4055_v28  ;;  %v2630_v44 = vpop.xlane.xlu2 %2629 }
 0x4eb   : > { %v2935_v41 = vmul.f32 %v4057_v57, %v4051_v45  ;;  %4058 = vpow2.f32 %v2799_v21  ;;  %v2682_v33 = vadd.f32 %v5464_v56, %v2630_v44 }
 0x4ec   : > { %4060 = vrcp.f32 %v2840_v42 }
 0x4ed   : > { %v2967_v54 = vsel %vm2903_vm7, %v4057_v57, %v2935_v41  ;;  %v2714_v1 = vand.u32 2147483647, %v2682_v33  ;;  %vm2906_vm10 = vcmp.ge.f32.partialorder %v2682_v33, 0.0 }
 0x4ee   : > { %3000 = vst.msk [vmem:[%s5490_s18 + $0xa0] sm:$0xff] %vm2979_vm1, %v2967_v54 }
 0x4ef   : > { %v2746_v58 = vsub.f32 0.0, %v2714_v1 }
 0x4f1   : > { %v4059_v53 = vpop.eup %4058  ;;  %v2801_v52 = vmul.f32 1.442695, %v2746_v58 }
 0x4f2   : > { %v4061_v5 = vpop.eup %4060  ;;  %v2841_v61 = vadd.f32 1.0, %v4059_v53  ;;  %v2633_v8 = vpop.xlane.xlu0 %2632 }
 0x4f3   : > { %v2936_v48 = vmul.f32 %v4061_v5, %v4055_v28  ;;  %4062 = vpow2.f32 %v2801_v52  ;;  %v2683_v59 = vadd.f32 %v5464_v56, %v2633_v8 }
 0x4f4   : > { %4064 = vrcp.f32 %v2841_v61  ;;  %v4100_v61 = vld [vmem:[#allocation2] ss:$0 sm:$0xff] }
 0x4f5   : > { %v2968_v34 = vsel %vm2904_vm8, %v4061_v5, %v2936_v48  ;;  %v2715_v18 = vand.u32 2147483647, %v2683_v59  ;;  %vm2907_vm11 = vcmp.ge.f32.partialorder %v2683_v59, 0.0 }
 0x4f6   : > { %3001 = vst.msk [vmem:[%s5490_s18 + $0xa8] sm:$0xff] %vm2979_vm1, %v2968_v34 }
 0x4f7   : > { %v2747_v20 = vsub.f32 0.0, %v2715_v18 }
 0x4f9   : > { %v4063_v30 = vpop.eup %4062  ;;  %v2803_v4 = vmul.f32 1.442695, %v2747_v20 }
 0x4fa   : > { %v4065_v40 = vpop.eup %4064  ;;  %v2842_v13 = vadd.f32 1.0, %v4063_v30  ;;  %v2636_v10 = vpop.xlane.xlu1 %2635 }
 0x4fb   : > { %v2937_v25 = vmul.f32 %v4065_v40, %v4059_v53  ;;  %4066 = vpow2.f32 %v2803_v4  ;;  %v2684_v12 = vadd.f32 %v5464_v56, %v2636_v10 }
 0x4fc   : > { %4068 = vrcp.f32 %v2842_v13 }
 0x4fd   : > { %v2969_v32 = vsel %vm2905_vm9, %v4065_v40, %v2937_v25  ;;  %v2716_v17 = vand.u32 2147483647, %v2684_v12  ;;  %vm2908_vm12 = vcmp.ge.f32.partialorder %v2684_v12, 0.0 }
 0x4fe   : > { %3002 = vst.msk [vmem:[%s5490_s18 + $0xb0] sm:$0xff] %vm2979_vm1, %v2969_v32 }
 0x4ff   : > { %v2748_v24 = vsub.f32 0.0, %v2716_v17 }
 0x501   : > { %v4067_v7 = vpop.eup %4066  ;;  %v2805_v39 = vmul.f32 1.442695, %v2748_v24 }
 0x502   : > { %v4069_v38 = vpop.eup %4068  ;;  %v2843_v37 = vadd.f32 1.0, %v4067_v7  ;;  %v2639_v49 = vpop.xlane.xlu2 %2638 }
 0x503   : > { %v2938_v0 = vmul.f32 %v4069_v38, %v4063_v30  ;;  %4070 = vpow2.f32 %v2805_v39  ;;  %v2685_v16 = vadd.f32 %v5464_v56, %v2639_v49 }
 0x504   : > { %4072 = vrcp.f32 %v2843_v37 }
 0x505   : > { %v2970_v62 = vsel %vm2906_vm10, %v4069_v38, %v2938_v0  ;;  %v2717_v26 = vand.u32 2147483647, %v2685_v16  ;;  %vm2909_vm13 = vcmp.ge.f32.partialorder %v2685_v16, 0.0 }
 0x506   : > { %3003 = vst.msk [vmem:[%s5490_s18 + $0xb8] sm:$0xff] %vm2979_vm1, %v2970_v62 }
 0x507   : > { %v2749_v19 = vsub.f32 0.0, %v2717_v26 }
 0x509   : > { %v4071_v47 = vpop.eup %4070  ;;  %v2807_v23 = vmul.f32 1.442695, %v2749_v19 }
 0x50a   : > { %v4073_v9 = vpop.eup %4072  ;;  %v2844_v35 = vadd.f32 1.0, %v4071_v47  ;;  %v2642_v3 = vpop.xlane.xlu0 %2641 }
 0x50b   : > { %v2939_v63 = vmul.f32 %v4073_v9, %v4067_v7  ;;  %4074 = vpow2.f32 %v2807_v23  ;;  %v2686_v51 = vadd.f32 %v5464_v56, %v2642_v3 }
 0x50c   : > { %4076 = vrcp.f32 %v2844_v35 }
 0x50d   : > { %v2971_v46 = vsel %vm2907_vm11, %v4073_v9, %v2939_v63  ;;  %v2718_v15 = vand.u32 2147483647, %v2686_v51  ;;  %vm2910_vm14 = vcmp.ge.f32.partialorder %v2686_v51, 0.0 }
 0x50e   : > { %3004 = vst.msk [vmem:[%s5490_s18 + $0xc0] sm:$0xff] %vm2979_vm1, %v2971_v46 }
 0x50f   : > { %v2750_v27 = vsub.f32 0.0, %v2718_v15 }
 0x511   : > { %v4075_v29 = vpop.eup %4074  ;;  %v2809_v6 = vmul.f32 1.442695, %v2750_v27 }
 0x512   : > { %v4077_v36 = vpop.eup %4076  ;;  %v2845_v45 = vadd.f32 1.0, %v4075_v29  ;;  %v2645_v14 = vpop.xlane.xlu1 %2644 }
 0x513   : > { %v2940_v22 = vmul.f32 %v4077_v36, %v4071_v47  ;;  %4078 = vpow2.f32 %v2809_v6  ;;  %v2687_v43 = vadd.f32 %v5464_v56, %v2645_v14 }
 0x514   : > { %4080 = vrcp.f32 %v2845_v45 }
 0x515   : > { %v2972_v31 = vsel %vm2908_vm12, %v4077_v36, %v2940_v22  ;;  %v2719_v11 = vand.u32 2147483647, %v2687_v43  ;;  %vm2911_vm15 = vcmp.ge.f32.partialorder %v2687_v43, 0.0 }
 0x516   : > { %3005 = vst.msk [vmem:[%s5490_s18 + $0xc8] sm:$0xff] %vm2979_vm1, %v2972_v31 }
 0x517   : > { %v2751_v2 = vsub.f32 0.0, %v2719_v11 }
 0x519   : > { %v4079_v55 = vpop.eup %4078  ;;  %v2811_v60 = vmul.f32 1.442695, %v2751_v2 }
 0x51a   : > { %v4081_v50 = vpop.eup %4080  ;;  %v2846_v28 = vadd.f32 1.0, %v4079_v55  ;;  %v2648_v21 = vpop.xlane.xlu2 %2647 }
 0x51b   : > { %v2941_v57 = vmul.f32 %v4081_v50, %v4075_v29  ;;  %4082 = vpow2.f32 %v2811_v60  ;;  %v2688_v42 = vadd.f32 %v5464_v56, %v2648_v21 }
 0x51c   : > { %4084 = vrcp.f32 %v2846_v28 }
 0x51d   : > { %v2973_v44 = vsel %vm2909_vm13, %v4081_v50, %v2941_v57  ;;  %v2720_v41 = vand.u32 2147483647, %v2688_v42  ;;  %vm2912_vm2 = vcmp.ge.f32.partialorder %v2688_v42, 0.0 }
 0x51e   : > { %3006 = vst.msk [vmem:[%s5490_s18 + $0xd0] sm:$0xff] %vm2979_vm1, %v2973_v44 }
 0x51f   : > { %v2752_v33 = vsub.f32 0.0, %v2720_v41 }
 0x521   : > { %v4083_v54 = vpop.eup %4082  ;;  %v2813_v1 = vmul.f32 1.442695, %v2752_v33 }
 0x522   : > { %v4085_v58 = vpop.eup %4084  ;;  %v2847_v53 = vadd.f32 1.0, %v4083_v54  ;;  %v2651_v52 = vpop.xlane.xlu0 %2650 }
 0x523   : > { %v2942_v5 = vmul.f32 %v4085_v58, %v4079_v55  ;;  %4086 = vpow2.f32 %v2813_v1  ;;  %v2689_v8 = vadd.f32 %v4100_v61, %v2651_v52 }
 0x524   : > { %4088 = vrcp.f32 %v2847_v53 }
 0x525   : > { %v2974_v56 = vsel %vm2910_vm14, %v4085_v58, %v2942_v5  ;;  %v2721_v48 = vand.u32 2147483647, %v2689_v8  ;;  %vm2913_vm0 = vcmp.ge.f32.partialorder %v2689_v8, 0.0 }
 0x526   : > { %3007 = vst.msk [vmem:[%s5490_s18 + $0xd8] sm:$0xff] %vm2979_vm1, %v2974_v56 }
 0x527   : > { %v2753_v59 = vsub.f32 0.0, %v2721_v48 }
 0x529   : > { %v4087_v34 = vpop.eup %4086  ;;  %v2815_v18 = vmul.f32 1.442695, %v2753_v59 }
 0x52a   : > { %v4089_v20 = vpop.eup %4088  ;;  %v2848_v30 = vadd.f32 1.0, %v4087_v34  ;;  %v2654_v4 = vpop.xlane.xlu1 %2653 }
 0x52b   : > { %v2943_v40 = vmul.f32 %v4089_v20, %v4083_v54  ;;  %4090 = vpow2.f32 %v2815_v18  ;;  %v2690_v13 = vadd.f32 %v4100_v61, %v2654_v4 }
 0x52c   : > { %4092 = vrcp.f32 %v2848_v30 }
 0x52d   : > { %v2975_v10 = vsel %vm2911_vm15, %v4089_v20, %v2943_v40  ;;  %v2722_v25 = vand.u32 2147483647, %v2690_v13  ;;  %vm2914_vm3 = vcmp.ge.f32.partialorder %v2690_v13, 0.0 }
 0x52e   : > { %3008 = vst.msk [vmem:[%s5490_s18 + $0xe0] sm:$0xff] %vm2979_vm1, %v2975_v10 }
 0x52f   : > { %v2754_v12 = vsub.f32 0.0, %v2722_v25 }
 0x531   : > { %v4091_v32 = vpop.eup %4090  ;;  %v2817_v17 = vmul.f32 1.442695, %v2754_v12 }
 0x532   : > { %v4093_v24 = vpop.eup %4092  ;;  %v2849_v7 = vadd.f32 1.0, %v4091_v32 }
 0x533   : > { %v2944_v39 = vmul.f32 %v4093_v24, %v4087_v34  ;;  %4094 = vpow2.f32 %v2817_v17 }
 0x534   : > { %4096 = vrcp.f32 %v2849_v7 }
 0x535   : > { %v2976_v38 = vsel %vm2912_vm2, %v4093_v24, %v2944_v39 }
 0x536   : > { %3009 = vst.msk [vmem:[%s5490_s18 + $0xe8] sm:$0xff] %vm2979_vm1, %v2976_v38 }
 0x539   : > { %v4095_v37 = vpop.eup %4094 }
 0x53a   : > { %v4097_v49 = vpop.eup %4096  ;;  %v2850_v0 = vadd.f32 1.0, %v4095_v37 }
 0x53b   : > { %v2945_v16 = vmul.f32 %v4097_v49, %v4091_v32 }
 0x53c   : > { %4098 = vrcp.f32 %v2850_v0 }
 0x53d   : > { %v2977_v62 = vsel %vm2913_vm0, %v4097_v49, %v2945_v16 }
 0x53e   : > { %3010 = vst.msk [vmem:[%s5490_s18 + $0xf0] sm:$0xff] %vm2979_vm1, %v2977_v62 }
 0x542   : > { %v4099_v26 = vpop.eup %4098 }
 0x543   : > { %v2946_v19 = vmul.f32 %v4099_v26, %v4095_v37 }
 0x545   : > { %v2978_v47 = vsel %vm2914_vm3, %v4099_v26, %v2946_v19 }
 0x546   : > { %3011 = vst.msk [vmem:[%s5490_s18 + $0xf8] sm:$0xff] %vm2979_vm1, %v2978_v47 }
 0x547 PF: > { %s5793_s23 = smov %s4341_s11  ;;  %p22_p4 = scmp.ge.s32.totalorder %s4341_s11, 4  }
 0x548   : > { %s5794_s11 = smov %s4221_s12  ;;  %s5795_s12 = smov %s4225_s13 }
 0x549   : > { %s5796_s13 = smov %s4350_s21  ;;  %s5797_s14 = smov %s5793_s23 }
 0x54a   :  { %24 = sbr.rel (!%p22_p4) target bundleno = 7 (0x7), region = 104 }
 0x54f   :  { %3034 = vsyncpa [#allocation4], 1 }
 0x550   :  { %3036 = vsyncpa [#allocation4 + $0x1], 1 }
 0x551   :  { %3037 = vsyncpa [#allocation6], 1 }

</bundles_post_ra>
